<compile_context>
chip_gen: v6e
topology: v6e:2x2x1
jax: 0.10.0
libtpu: 0.0.40
codegen_flags: <defaults>
</compile_context>

<pallas_src>
import functools

import jax
import jax.numpy as jnp
from jax.experimental import pallas as pl
from jax.experimental.pallas import tpu as pltpu

EPS = 1e-5          # nn.BatchNorm2d default eps
PADL = 16           # left halo of the y1 scratch (bf16 packs (16,128) -> aligned store)


def _device_kind():
    try:
        return jax.devices()[0].device_kind.lower()
    except Exception:
        return ""


_KIND = _device_kind()
_IS_V5 = "v5" in _KIND
_IS_V7 = "v7" in _KIND
# 256-wide RHS fills the v6e/v7x MXU; on v5e's 128-wide MXU it only adds passes.
FUSE_SHORTCUT_INTO_CONV1 = not _IS_V5
# v7x: 64 MiB physical VMEM; v5e/v6e: 128 MiB.
VMEM_LIMIT_BYTES = (48 if _IS_V7 else 100) * 1024 * 1024

_CPARAMS = pltpu.CompilerParams(
    dimension_semantics=("parallel",),           # shard batch grid across TCs (v7x)
    vmem_limit_bytes=VMEM_LIMIT_BYTES)


def _const_spec(shape):
    """BlockSpec with a grid-constant index map: operand stays VMEM-resident
    across grid steps (weights / BN scale & shift)."""
    nd = len(shape)
    return pl.BlockSpec(shape, lambda b: (0,) * nd)


# ------------------------------------------------------------------ kernels --
def _conv1_kernel(xp_ref, w_ref, *rest, H, W, Cin, Cout, use_1conv, fused):
    """Pass 1 (one image per grid step): conv1 3x3 [+ fused 1x1 shortcut]
    as a single MXU matmul + BN1 partial statistics."""
    if use_1conv:
        if fused:
            b3_ref, a1_ref, sc_ref, st_ref = rest
            w3_ref = None
        else:
            w3_ref, b3_ref, a1_ref, sc_ref, st_ref = rest
    else:
        a1_ref, st_ref = rest
        sc_ref = w3_ref = b3_ref = None
    HW = H * W

    # im2col: 9 statically shifted slices of the padded bf16 image -> (HW, 9*Cin).
    p1 = jnp.concatenate(
        [xp_ref[0, ky:ky + H, kx:kx + W, :]
         for ky in range(3) for kx in range(3)],
        axis=-1).reshape(HW, 9 * Cin)

    acc = jnp.dot(p1, w_ref[...], preferred_element_type=jnp.float32)
    if use_1conv and fused:
        a1 = acc[:, :Cout]
        sc = acc[:, Cout:] + b3_ref[...]          # zero-padded w3 rows -> exact
    else:
        a1 = acc
        if use_1conv:
            x_flat = p1[:, 4 * Cin:5 * Cin]       # centre tap == unpadded x
            sc = jnp.dot(x_flat, w3_ref[...],
                         preferred_element_type=jnp.float32) + b3_ref[...]

    a1_ref[0] = a1
    if use_1conv:
        sc_ref[0] = sc

    # Per-image partial BN stats; cross-image reduce + scale/shift finalisation
    # is a tiny (1,Cout) op in the wrapper -> grid axis stays parallel-safe.
    s = jnp.sum(a1, axis=0, keepdims=True)
    q = jnp.sum(a1 * a1, axis=0, keepdims=True)
    st_ref[...] = jnp.concatenate([s, q], axis=-1).reshape(1, 1, 2 * Cout)


def _conv2_kernel(a1_ref, scale_ref, shift_ref, w2_ref, a2_ref, st_ref, y1p_ref,
                  *, H, W, Cout):
    """Pass 2 (one image per grid step): BN1 apply + ReLU + conv2 3x3
    (single matmul via bf16 halo scratch) + BN2 partial statistics."""
    HW = H * W
    y1 = jnp.maximum(a1_ref[0] * scale_ref[...] + shift_ref[...], 0.0)
    y1 = y1.reshape(H, W, Cout).astype(jnp.bfloat16)   # cast once, 9x smaller than p2

    # Zero ONLY the halo conv2 reads (top/bottom rows + 2 boundary columns).
    zc = jnp.zeros((H + 2, 1, Cout), jnp.bfloat16)
    zr = jnp.zeros((1, W + 2, Cout), jnp.bfloat16)
    y1p_ref[:, PADL - 1:PADL, :] = zc
    y1p_ref[:, PADL + W:PADL + W + 1, :] = zc
    y1p_ref[0:1, PADL - 1:PADL + W + 1, :] = zr
    y1p_ref[H + 1:H + 2, PADL - 1:PADL + W + 1, :] = zr
    y1p_ref[1:1 + H, PADL:PADL + W, :] = y1            # interior, PADL-aligned

    p2 = jnp.concatenate(
        [y1p_ref[ky:ky + H, PADL - 1 + kx:PADL - 1 + kx + W, :]
         for ky in range(3) for kx in range(3)],
        axis=-1).reshape(HW, 9 * Cout)
    a2 = jnp.dot(p2, w2_ref[...], preferred_element_type=jnp.float32)

    a2_ref[0] = a2
    s = jnp.sum(a2, axis=0, keepdims=True)
    q = jnp.sum(a2 * a2, axis=0, keepdims=True)
    st_ref[...] = jnp.concatenate([s, q], axis=-1).reshape(1, 1, 2 * Cout)


def _epilogue_kernel(a2_ref, sc_ref, scale_ref, shift_ref, o_ref,
                     *, H, W, Cout, use_1conv, pad_out):
    """Pass 3: BN2 apply + shortcut add + ReLU.  With pad_out=True the output
    is written already zero-padded in bf16 (it is directly the next block's
    conv input -> no wrapper pad/cast, half the inter-block HBM traffic)."""
    HW = H * W
    y2 = a2_ref[0] * scale_ref[...] + shift_ref[...]
    if use_1conv:
        sc = sc_ref[0]                                           # projected shortcut (f32)
    else:
        sc = sc_ref[0, 1:1 + H, 1:1 + W, :].reshape(HW, Cout).astype(jnp.float32)
    out = jnp.maximum(y2 + sc, 0.0)
    if pad_out:
        ob = out.reshape(H, W, Cout).astype(jnp.bfloat16)
        zc = jnp.zeros((H, 1, Cout), jnp.bfloat16)
        zr = jnp.zeros((1, W + 2, Cout), jnp.bfloat16)
        o_ref[0] = jnp.concatenate(
            [zr, jnp.concatenate([zc, ob, zc], axis=1), zr], axis=0)
    else:
        o_ref[0] = out.reshape(H, W, Cout)


# ------------------------------------------------------------------ wrapper --
def _finalize_bn(stats, g, beta, m):
    """Reduce per-image partial sums -> training-mode BN scale/shift (f32)."""
    cout = g.shape[-1]
    tot = jnp.sum(stats, axis=0)                     # (1, 2*Cout)
    mean = tot[:, :cout] * (1.0 / m)
    msq = tot[:, cout:] * (1.0 / m)
    var = msq - mean * mean                          # biased var (PyTorch BN normalisation)
    scale = g * jax.lax.rsqrt(var + EPS)
    shift = beta - mean * scale
    return scale, shift


def residual_block(xp, p, use_1conv, emit_padded):
    """One Residual block.  `xp` is the zero-padded bf16 NHWC input
    (N, H+2, W+2, Cin); returns the next block's padded bf16 input
    (emit_padded=True) or the plain f32 NHWC output."""
    N, Hp, Wp, Cin = xp.shape
    H, W = Hp - 2, Wp - 2
    Cout = p["g1"].shape[-1]
    HW = H * W
    M = N * HW
    assert use_1conv or Cin == Cout
    fused = use_1conv and FUSE_SHORTCUT_INTO_CONV1

    img_spec = pl.BlockSpec((1, Hp, Wp, Cin), lambda b: (b, 0, 0, 0))
    act_spec = pl.BlockSpec((1, HW, Cout), lambda b: (b, 0, 0))
    st_spec = pl.BlockSpec((1, 1, 2 * Cout), lambda b: (b, 0, 0))

    # ---- pass 1: conv1 (+ 1x1 shortcut) + BN1 partial stats ----------------
    args = [xp]
    in_specs = [img_spec]
    if fused:
        w3full = jnp.zeros((9 * Cin, Cout), jnp.float32).at[4 * Cin:5 * Cin].set(p["w3"])
        wcat = jnp.concatenate([p["w1"], w3full], axis=1).astype(jnp.bfloat16)
        args += [wcat, p["b3"]]
        in_specs += [_const_spec((9 * Cin, 2 * Cout)), _const_spec((1, Cout))]
    else:
        args += [p["w1"].astype(jnp.bfloat16)]
        in_specs += [_const_spec((9 * Cin, Cout))]
        if use_1conv:
            args += [p["w3"].astype(jnp.bfloat16), p["b3"]]
            in_specs += [_const_spec((Cin, Cout)), _const_spec((1, Cout))]

    out_shape = [jax.ShapeDtypeStruct((N, HW, Cout), jnp.float32)]
    out_specs = [act_spec]
    if use_1conv:
        out_shape.append(jax.ShapeDtypeStruct((N, HW, Cout), jnp.float32))
        out_specs.append(act_spec)
    out_shape.append(jax.ShapeDtypeStruct((N, 1, 2 * Cout), jnp.float32))
    out_specs.append(st_spec)

    res = pl.pallas_call(
        functools.partial(_conv1_kernel, H=H, W=W, Cin=Cin, Cout=Cout,
                          use_1conv=use_1conv, fused=fused),
        grid=(N,),
        out_shape=tuple(out_shape),
        in_specs=in_specs,
        out_specs=tuple(out_specs),
        compiler_params=_CPARAMS,
    )(*args)
    if use_1conv:
        a1, sc, st1 = res
    else:
        a1, st1 = res
        sc = xp                      # identity shortcut read straight from xp in pass 3
    scale1, shift1 = _finalize_bn(st1, p["g1"], p["be1"], M)

    # ---- pass 2: BN1 apply + ReLU + conv2 + BN2 partial stats --------------
    a2, st2 = pl.pallas_call(
        functools.partial(_conv2_kernel, H=H, W=W, Cout=Cout),
        grid=(N,),
        out_shape=(jax.ShapeDtypeStruct((N, HW, Cout), jnp.float32),
                   jax.ShapeDtypeStruct((N, 1, 2 * Cout), jnp.float32)),
        in_specs=[act_spec, _const_spec((1, Cout)), _const_spec((1, Cout)),
                  _const_spec((9 * Cout, Cout))],
        out_specs=(act_spec, st_spec),
        scratch_shapes=[pltpu.VMEM((H + 2, PADL + W + 1, Cout), jnp.bfloat16)],
        compiler_params=_CPARAMS,
    )(a1, scale1, shift1, p["w2"].astype(jnp.bfloat16))
    scale2, shift2 = _finalize_bn(st2, p["g2"], p["be2"], M)

    # ---- pass 3: BN2 apply + shortcut add + ReLU ----------------------------
    sc_spec = act_spec if use_1conv else img_spec
    if emit_padded:
        o_shape = jax.ShapeDtypeStruct((N, Hp, Wp, Cout), jnp.bfloat16)
        o_spec = pl.BlockSpec((1, Hp, Wp, Cout), lambda b: (b, 0, 0, 0))
    else:
        o_shape = jax.ShapeDtypeStruct((N, H, W, Cout), jnp.float32)
        o_spec = pl.BlockSpec((1, H, W, Cout), lambda b: (b, 0, 0, 0))
    out = pl.pallas_call(
        functools.partial(_epilogue_kernel, H=H, W=W, Cout=Cout,
                          use_1conv=use_1conv, pad_out=emit_padded),
        grid=(N,),
        out_shape=o_shape,
        in_specs=[act_spec, sc_spec, _const_spec((1, Cout)), _const_spec((1, Cout))],
        out_specs=o_spec,
        compiler_params=_CPARAMS,
    )(a2, sc, scale2, shift2)
    return out


def resnet18_forward(x_nchw, params):
    x = jnp.transpose(x_nchw, (0, 2, 3, 1))                       # NCHW -> NHWC
    xp = jnp.pad(x, ((0, 0), (1, 1), (1, 1), (0, 0))).astype(jnp.bfloat16)
    xp = residual_block(xp, params["res1"], use_1conv=True, emit_padded=True)
    y = residual_block(xp, params["res2"], use_1conv=False, emit_padded=False)
    return jnp.transpose(y, (0, 3, 1, 2))                         # NHWC -> NCHW


# --------------------------------------------------------------- parameters --
def make_residual_params(key, cin, cout, use_1conv):
    k1, k2, k3, k4 = jax.random.split(key, 4)
    std1 = (2.0 / (cin * 9)) ** 0.5
    std2 = (2.0 / (cout * 9)) ** 0.5
    w1_oihw = std1 * jax.random.normal(k1, (cout, cin, 3, 3), jnp.float32)
    w2_oihw = std2 * jax.random.normal(k2, (cout, cout, 3, 3), jnp.float32)
    # conv1/conv2 biases omitted: exactly cancelled by the batch-mean
    # subtraction of training-mode BatchNorm (dead compute).
    p = {
        "w1": jnp.transpose(w1_oihw, (2, 3, 1, 0)).reshape(9 * cin, cout),
        "w2": jnp.transpose(w2_oihw, (2, 3, 1, 0)).reshape(9 * cout, cout),
        "g1": jnp.ones((1, cout), jnp.float32),      # BatchNorm2d default init
        "be1": jnp.zeros((1, cout), jnp.float32),
        "g2": jnp.ones((1, cout), jnp.float32),
        "be2": jnp.zeros((1, cout), jnp.float32),
    }
    if use_1conv:
        std3 = (2.0 / cin) ** 0.5
        w3_oihw = std3 * jax.random.normal(k3, (cout, cin, 1, 1), jnp.float32)
        p["w3"] = jnp.transpose(w3_oihw[:, :, 0, 0], (1, 0))      # (cin, cout)
        p["b3"] = 0.1 * jax.random.normal(k4, (1, cout), jnp.float32)
    return p


# ------------------------------------------------------- pure-JAX reference --
def _ref_block(x, p, use_1conv, dt):
    N, H, W, Cin = x.shape
    Cout = p["g1"].shape[-1]
    M = N * H * W
    xq = x.astype(dt)

    def conv3x3(xin, w, c):
        xpad = jnp.pad(xin, ((0, 0), (1, 1), (1, 1), (0, 0)))
        pat = jnp.concatenate(
            [xpad[:, ky:ky + H, kx:kx + W, :]
             for ky in range(3) for kx in range(3)],
            axis=-1).reshape(M, 9 * c)
        return jnp.dot(pat, w.astype(dt), preferred_element_type=jnp.float32)

    def bn(a, g, be):
        mean = jnp.mean(a, axis=0, keepdims=True)
        var = jnp.mean((a - mean) ** 2, axis=0, keepdims=True)
        return (a - mean) * jax.lax.rsqrt(var + EPS) * g + be

    a1 = conv3x3(xq, p["w1"], Cin)
    y1 = jnp.maximum(bn(a1, p["g1"], p["be1"]), 0.0)
    y1q = y1.astype(dt).reshape(N, H, W, Cout)
    a2 = conv3x3(y1q, p["w2"], Cout)
    y2 = bn(a2, p["g2"], p["be2"])
    xf = xq.reshape(M, Cin)
    if use_1conv:
        sc = jnp.dot(xf, p["w3"].astype(dt),
                     preferred_element_type=jnp.float32) + p["b3"]
    else:
        sc = xf.astype(jnp.float32)
    return jnp.maximum(y2 + sc, 0.0).reshape(N, H, W, Cout)


def _ref_forward(x_nchw, params, dt):
    x = jnp.transpose(x_nchw, (0, 2, 3, 1))
    x = _ref_block(x, params["res1"], True, dt)
    x = _ref_block(x, params["res2"], False, dt)
    return jnp.transpose(x, (0, 3, 1, 2))


if __name__ == "__main__":
    key = jax.random.PRNGKey(0)
    kx, kp1, kp2 = jax.random.split(key, 3)
    # ResNet18.s1 expects 64-channel input (first Residual is 64 -> 128).
    N, C, H, W = 2, 64, 8, 8
    x = jax.random.normal(kx, (N, C, H, W), jnp.float32)
    params = {
        "res1": make_residual_params(kp1, 64, 128, use_1conv=True),
        "res2": make_residual_params(kp2, 128, 128, use_1conv=False),
    }

    out = jax.jit(resnet18_forward)(x, params)
    out = jax.block_until_ready(out)
    assert out.shape == (N, 128, H, W), out.shape
    assert bool(jnp.all(jnp.isfinite(out)))

    # Same-math reference (bf16 operands / handoff, f32 accumulation): tight.
    ref_bf16 = _ref_forward(x, params, jnp.bfloat16)
    err = float(jnp.max(jnp.abs(out - ref_bf16)))
    assert err < 1e-2, f"max abs error vs bf16-matched reference: {err}"

    # Full-f32 reference: documents the bf16 quantization error only.
    ref_f32 = _ref_forward(x, params, jnp.float32)
    err32 = float(jnp.max(jnp.abs(out - ref_f32)))
    assert err32 < 0.25, f"max abs error vs f32 reference: {err32}"

    print("KERNEL_OK")
</pallas_src>

<mosaic_0001>
module attributes {stable_mosaic.version = 11 : i64} {
  func.func @_conv1_kernel(%arg0: i32, %arg1: memref<1x10x10x64xbf16, #tpu.memory_space<vmem>>, %arg2: memref<576x256xbf16, #tpu.memory_space<vmem>>, %arg3: memref<1x128xf32, #tpu.memory_space<vmem>>, %arg4: memref<1x64x128xf32, #tpu.memory_space<vmem>>, %arg5: memref<1x64x128xf32, #tpu.memory_space<vmem>>, %arg6: memref<1x1x256xf32, #tpu.memory_space<vmem>>) attributes {dimension_semantics = [#tpu.dimension_semantics<parallel>], iteration_bounds = array<i64: 2>, scalar_prefetch = 0 : i64, scratch_operands = 0 : i64, tpu.core_type = #tpu.core_type<tc>, window_params = [{transform_indices = @transform_0, window_bounds = array<i64: 1, 10, 10, 64>}, {pipeline_mode = #tpu.pipeline_mode<synchronous>, transform_indices = @transform_1, window_bounds = array<i64: 576, 256>}, {pipeline_mode = #tpu.pipeline_mode<synchronous>, transform_indices = @transform_2, window_bounds = array<i64: 1, 128>}, {transform_indices = @transform_3, window_bounds = array<i64: 1, 64, 128>}, {transform_indices = @transform_4, window_bounds = array<i64: 1, 64, 128>}, {transform_indices = @transform_5, window_bounds = array<i64: 1, 1, 256>}]} {
    %c0 = arith.constant 0 : index
    %c0_0 = arith.constant 0 : index
    %c0_1 = arith.constant 0 : index
    %c0_2 = arith.constant 0 : index
    %0 = vector.load %arg1[%c0, %c0_0, %c0_1, %c0_2] : memref<1x10x10x64xbf16, #tpu.memory_space<vmem>>, vector<1x8x8x64xbf16>
    %1 = vector.shape_cast %0 : vector<1x8x8x64xbf16> to vector<8x8x64xbf16>
    %c0_3 = arith.constant 0 : index
    %c0_4 = arith.constant 0 : index
    %c1 = arith.constant 1 : index
    %c0_5 = arith.constant 0 : index
    %2 = vector.load %arg1[%c0_3, %c0_4, %c1, %c0_5] : memref<1x10x10x64xbf16, #tpu.memory_space<vmem>>, vector<1x8x8x64xbf16>
    %3 = vector.shape_cast %2 : vector<1x8x8x64xbf16> to vector<8x8x64xbf16>
    %c0_6 = arith.constant 0 : index
    %c0_7 = arith.constant 0 : index
    %c2 = arith.constant 2 : index
    %c0_8 = arith.constant 0 : index
    %4 = vector.load %arg1[%c0_6, %c0_7, %c2, %c0_8] : memref<1x10x10x64xbf16, #tpu.memory_space<vmem>>, vector<1x8x8x64xbf16>
    %5 = vector.shape_cast %4 : vector<1x8x8x64xbf16> to vector<8x8x64xbf16>
    %c0_9 = arith.constant 0 : index
    %c1_10 = arith.constant 1 : index
    %c0_11 = arith.constant 0 : index
    %c0_12 = arith.constant 0 : index
    %6 = vector.load %arg1[%c0_9, %c1_10, %c0_11, %c0_12] : memref<1x10x10x64xbf16, #tpu.memory_space<vmem>>, vector<1x8x8x64xbf16>
    %7 = vector.shape_cast %6 : vector<1x8x8x64xbf16> to vector<8x8x64xbf16>
    %c0_13 = arith.constant 0 : index
    %c1_14 = arith.constant 1 : index
    %c1_15 = arith.constant 1 : index
    %c0_16 = arith.constant 0 : index
    %8 = vector.load %arg1[%c0_13, %c1_14, %c1_15, %c0_16] : memref<1x10x10x64xbf16, #tpu.memory_space<vmem>>, vector<1x8x8x64xbf16>
    %9 = vector.shape_cast %8 : vector<1x8x8x64xbf16> to vector<8x8x64xbf16>
    %c0_17 = arith.constant 0 : index
    %c1_18 = arith.constant 1 : index
    %c2_19 = arith.constant 2 : index
    %c0_20 = arith.constant 0 : index
    %10 = vector.load %arg1[%c0_17, %c1_18, %c2_19, %c0_20] : memref<1x10x10x64xbf16, #tpu.memory_space<vmem>>, vector<1x8x8x64xbf16>
    %11 = vector.shape_cast %10 : vector<1x8x8x64xbf16> to vector<8x8x64xbf16>
    %c0_21 = arith.constant 0 : index
    %c2_22 = arith.constant 2 : index
    %c0_23 = arith.constant 0 : index
    %c0_24 = arith.constant 0 : index
    %12 = vector.load %arg1[%c0_21, %c2_22, %c0_23, %c0_24] : memref<1x10x10x64xbf16, #tpu.memory_space<vmem>>, vector<1x8x8x64xbf16>
    %13 = vector.shape_cast %12 : vector<1x8x8x64xbf16> to vector<8x8x64xbf16>
    %c0_25 = arith.constant 0 : index
    %c2_26 = arith.constant 2 : index
    %c1_27 = arith.constant 1 : index
    %c0_28 = arith.constant 0 : index
    %14 = vector.load %arg1[%c0_25, %c2_26, %c1_27, %c0_28] : memref<1x10x10x64xbf16, #tpu.memory_space<vmem>>, vector<1x8x8x64xbf16>
    %15 = vector.shape_cast %14 : vector<1x8x8x64xbf16> to vector<8x8x64xbf16>
    %c0_29 = arith.constant 0 : index
    %c2_30 = arith.constant 2 : index
    %c2_31 = arith.constant 2 : index
    %c0_32 = arith.constant 0 : index
    %16 = vector.load %arg1[%c0_29, %c2_30, %c2_31, %c0_32] : memref<1x10x10x64xbf16, #tpu.memory_space<vmem>>, vector<1x8x8x64xbf16>
    %17 = vector.shape_cast %16 : vector<1x8x8x64xbf16> to vector<8x8x64xbf16>
    %18 = tpu.concatenate %1, %3, %5, %7, %9, %11, %13, %15, %17 in 2 : vector<8x8x64xbf16>, vector<8x8x64xbf16>, vector<8x8x64xbf16>, vector<8x8x64xbf16>, vector<8x8x64xbf16>, vector<8x8x64xbf16>, vector<8x8x64xbf16>, vector<8x8x64xbf16>, vector<8x8x64xbf16> -> vector<8x8x576xbf16>
    %19 = vector.shape_cast %18 : vector<8x8x576xbf16> to vector<64x576xbf16>
    %c0_33 = arith.constant 0 : index
    %c0_34 = arith.constant 0 : index
    %20 = vector.load %arg2[%c0_33, %c0_34] : memref<576x256xbf16, #tpu.memory_space<vmem>>, vector<576x256xbf16>
    %cst = arith.constant dense<0.000000e+00> : vector<64x256xf32>
    %21 = tpu.matmul %19, %20, %cst {dimension_numbers = #tpu.dot_dimension_numbers<[1], [0], [0], [1], [0, 0, 1, 1], [], []>} : vector<64x576xbf16>, vector<576x256xbf16>, vector<64x256xf32> -> vector<64x256xf32>
    %22 = vector.extract_strided_slice %21 {offsets = [0, 0], sizes = [64, 128], strides = [1, 1]} : vector<64x256xf32> to vector<64x128xf32>
    %23 = vector.extract_strided_slice %21 {offsets = [0, 128], sizes = [64, 128], strides = [1, 1]} : vector<64x256xf32> to vector<64x128xf32>
    %c0_35 = arith.constant 0 : index
    %c0_36 = arith.constant 0 : index
    %24 = vector.load %arg3[%c0_35, %c0_36] : memref<1x128xf32, #tpu.memory_space<vmem>>, vector<1x128xf32>
    %25 = vector.broadcast %24 : vector<1x128xf32> to vector<64x128xf32>
    %26 = arith.addf %23, %25 : vector<64x128xf32>
    %c0_37 = arith.constant 0 : index
    %c0_38 = arith.constant 0 : index
    %c0_39 = arith.constant 0 : index
    %27 = vector.load %arg4[%c0_37, %c0_38, %c0_39] : memref<1x64x128xf32, #tpu.memory_space<vmem>>, vector<1x64x128xf32>
    %28 = vector.shape_cast %27 : vector<1x64x128xf32> to vector<64x128xf32>
    %29 = vector.shape_cast %22 : vector<64x128xf32> to vector<1x64x128xf32>
    tpu.vector_store %arg4[%c0_37, %c0_38, %c0_39], %29 {strides = array<i32>} : memref<1x64x128xf32, #tpu.memory_space<vmem>>, vector<1x64x128xf32>,
    %c0_40 = arith.constant 0 : index
    %c0_41 = arith.constant 0 : index
    %c0_42 = arith.constant 0 : index
    %30 = vector.load %arg5[%c0_40, %c0_41, %c0_42] : memref<1x64x128xf32, #tpu.memory_space<vmem>>, vector<1x64x128xf32>
    %31 = vector.shape_cast %30 : vector<1x64x128xf32> to vector<64x128xf32>
    %32 = vector.shape_cast %26 : vector<64x128xf32> to vector<1x64x128xf32>
    tpu.vector_store %arg5[%c0_40, %c0_41, %c0_42], %32 {strides = array<i32>} : memref<1x64x128xf32, #tpu.memory_space<vmem>>, vector<1x64x128xf32>,
    %cst_43 = arith.constant dense<0.000000e+00> : vector<128xf32>
    %33 = vector.multi_reduction <add>, %22, %cst_43 [0] : vector<64x128xf32> to vector<128xf32>
    %34 = vector.shape_cast %33 : vector<128xf32> to vector<1x128xf32>
    %35 = arith.mulf %22, %22 : vector<64x128xf32>
    %cst_44 = arith.constant dense<0.000000e+00> : vector<128xf32>
    %36 = vector.multi_reduction <add>, %35, %cst_44 [0] : vector<64x128xf32> to vector<128xf32>
    %37 = vector.shape_cast %36 : vector<128xf32> to vector<1x128xf32>
    %38 = tpu.concatenate %34, %37 in 1 : vector<1x128xf32>, vector<1x128xf32> -> vector<1x256xf32>
    %39 = vector.shape_cast %38 : vector<1x256xf32> to vector<1x1x256xf32>
    %c0_45 = arith.constant 0 : index
    %c0_46 = arith.constant 0 : index
    %c0_47 = arith.constant 0 : index
    %40 = vector.load %arg6[%c0_45, %c0_46, %c0_47] : memref<1x1x256xf32, #tpu.memory_space<vmem>>, vector<1x1x256xf32>
    tpu.vector_store %arg6[%c0_45, %c0_46, %c0_47], %39 {strides = array<i32>} : memref<1x1x256xf32, #tpu.memory_space<vmem>>, vector<1x1x256xf32>,
    return
  }
  func.func @transform_0(%arg0: i32) -> (i32, i32, i32, i32) {
    %c0_i32 = arith.constant 0 : i32
    %c0_i32_0 = arith.constant 0 : i32
    %c0_i32_1 = arith.constant 0 : i32
    %c0_i32_2 = arith.constant 0 : i32
    return %arg0, %c0_i32, %c0_i32_0, %c0_i32_1 : i32, i32, i32, i32
  }
  func.func @transform_1(%arg0: i32) -> (i32, i32) {
    %c0_i32 = arith.constant 0 : i32
    %c0_i32_0 = arith.constant 0 : i32
    %c0_i32_1 = arith.constant 0 : i32
    return %c0_i32, %c0_i32_0 : i32, i32
  }
  func.func @transform_2(%arg0: i32) -> (i32, i32) {
    %c0_i32 = arith.constant 0 : i32
    %c0_i32_0 = arith.constant 0 : i32
    %c0_i32_1 = arith.constant 0 : i32
    return %c0_i32, %c0_i32_0 : i32, i32
  }
  func.func @transform_3(%arg0: i32) -> (i32, i32, i32) {
    %c0_i32 = arith.constant 0 : i32
    %c0_i32_0 = arith.constant 0 : i32
    %c0_i32_1 = arith.constant 0 : i32
    return %arg0, %c0_i32, %c0_i32_0 : i32, i32, i32
  }
  func.func @transform_4(%arg0: i32) -> (i32, i32, i32) {
    %c0_i32 = arith.constant 0 : i32
    %c0_i32_0 = arith.constant 0 : i32
    %c0_i32_1 = arith.constant 0 : i32
    return %arg0, %c0_i32, %c0_i32_0 : i32, i32, i32
  }
  func.func @transform_5(%arg0: i32) -> (i32, i32, i32) {
    %c0_i32 = arith.constant 0 : i32
    %c0_i32_0 = arith.constant 0 : i32
    %c0_i32_1 = arith.constant 0 : i32
    return %arg0, %c0_i32, %c0_i32_0 : i32, i32, i32
  }
}

module attributes {stable_mosaic.version = 11 : i64} {
  func.func @_conv2_kernel(%arg0: i32, %arg1: memref<1x64x128xf32, #tpu.memory_space<vmem>>, %arg2: memref<1x128xf32, #tpu.memory_space<vmem>>, %arg3: memref<1x128xf32, #tpu.memory_space<vmem>>, %arg4: memref<1152x128xbf16, #tpu.memory_space<vmem>>, %arg5: memref<1x64x128xf32, #tpu.memory_space<vmem>>, %arg6: memref<1x1x256xf32, #tpu.memory_space<vmem>>, %arg7: memref<10x25x128xbf16, #tpu.memory_space<vmem>>) attributes {dimension_semantics = [#tpu.dimension_semantics<parallel>], iteration_bounds = array<i64: 2>, scalar_prefetch = 0 : i64, scratch_operands = 1 : i64, tpu.core_type = #tpu.core_type<tc>, window_params = [{transform_indices = @transform_0, window_bounds = array<i64: 1, 64, 128>}, {pipeline_mode = #tpu.pipeline_mode<synchronous>, transform_indices = @transform_1, window_bounds = array<i64: 1, 128>}, {pipeline_mode = #tpu.pipeline_mode<synchronous>, transform_indices = @transform_2, window_bounds = array<i64: 1, 128>}, {pipeline_mode = #tpu.pipeline_mode<synchronous>, transform_indices = @transform_3, window_bounds = array<i64: 1152, 128>}, {transform_indices = @transform_4, window_bounds = array<i64: 1, 64, 128>}, {transform_indices = @transform_5, window_bounds = array<i64: 1, 1, 256>}]} {
    %c0 = arith.constant 0 : index
    %c0_0 = arith.constant 0 : index
    %c0_1 = arith.constant 0 : index
    %0 = vector.load %arg1[%c0, %c0_0, %c0_1] : memref<1x64x128xf32, #tpu.memory_space<vmem>>, vector<1x64x128xf32>
    %1 = vector.shape_cast %0 : vector<1x64x128xf32> to vector<64x128xf32>
    %c0_2 = arith.constant 0 : index
    %c0_3 = arith.constant 0 : index
    %2 = vector.load %arg2[%c0_2, %c0_3] : memref<1x128xf32, #tpu.memory_space<vmem>>, vector<1x128xf32>
    %3 = vector.broadcast %2 : vector<1x128xf32> to vector<64x128xf32>
    %4 = arith.mulf %1, %3 : vector<64x128xf32>
    %c0_4 = arith.constant 0 : index
    %c0_5 = arith.constant 0 : index
    %5 = vector.load %arg3[%c0_4, %c0_5] : memref<1x128xf32, #tpu.memory_space<vmem>>, vector<1x128xf32>
    %6 = vector.broadcast %5 : vector<1x128xf32> to vector<64x128xf32>
    %7 = arith.addf %4, %6 : vector<64x128xf32>
    %cst = arith.constant 0.000000e+00 : f32
    %8 = vector.broadcast %cst : f32 to vector<64x128xf32>
    %9 = arith.maximumf %7, %8 : vector<64x128xf32>
    %10 = vector.shape_cast %9 : vector<64x128xf32> to vector<8x8x128xf32>
    %11 = arith.truncf %10 : vector<8x8x128xf32> to vector<8x8x128xbf16>
    %cst_6 = arith.constant 0.000000e+00 : bf16
    %12 = vector.broadcast %cst_6 : bf16 to vector<10x1x128xbf16>
    %cst_7 = arith.constant 0.000000e+00 : bf16
    %13 = vector.broadcast %cst_7 : bf16 to vector<1x10x128xbf16>
    %c0_8 = arith.constant 0 : index
    %c15 = arith.constant 15 : index
    %c0_9 = arith.constant 0 : index
    %14 = vector.load %arg7[%c0_8, %c15, %c0_9] : memref<10x25x128xbf16, #tpu.memory_space<vmem>>, vector<10x1x128xbf16>
    tpu.vector_store %arg7[%c0_8, %c15, %c0_9], %12 {strides = array<i32>} : memref<10x25x128xbf16, #tpu.memory_space<vmem>>, vector<10x1x128xbf16>,
    %c0_10 = arith.constant 0 : index
    %c24 = arith.constant 24 : index
    %c0_11 = arith.constant 0 : index
    %15 = vector.load %arg7[%c0_10, %c24, %c0_11] : memref<10x25x128xbf16, #tpu.memory_space<vmem>>, vector<10x1x128xbf16>
    tpu.vector_store %arg7[%c0_10, %c24, %c0_11], %12 {strides = array<i32>} : memref<10x25x128xbf16, #tpu.memory_space<vmem>>, vector<10x1x128xbf16>,
    %c0_12 = arith.constant 0 : index
    %c15_13 = arith.constant 15 : index
    %c0_14 = arith.constant 0 : index
    %16 = vector.load %arg7[%c0_12, %c15_13, %c0_14] : memref<10x25x128xbf16, #tpu.memory_space<vmem>>, vector<1x10x128xbf16>
    tpu.vector_store %arg7[%c0_12, %c15_13, %c0_14], %13 {strides = array<i32>} : memref<10x25x128xbf16, #tpu.memory_space<vmem>>, vector<1x10x128xbf16>,
    %c9 = arith.constant 9 : index
    %c15_15 = arith.constant 15 : index
    %c0_16 = arith.constant 0 : index
    %17 = vector.load %arg7[%c9, %c15_15, %c0_16] : memref<10x25x128xbf16, #tpu.memory_space<vmem>>, vector<1x10x128xbf16>
    tpu.vector_store %arg7[%c9, %c15_15, %c0_16], %13 {strides = array<i32>} : memref<10x25x128xbf16, #tpu.memory_space<vmem>>, vector<1x10x128xbf16>,
    %c1 = arith.constant 1 : index
    %c16 = arith.constant 16 : index
    %c0_17 = arith.constant 0 : index
    %18 = vector.load %arg7[%c1, %c16, %c0_17] : memref<10x25x128xbf16, #tpu.memory_space<vmem>>, vector<8x8x128xbf16>
    tpu.vector_store %arg7[%c1, %c16, %c0_17], %11 {strides = array<i32>} : memref<10x25x128xbf16, #tpu.memory_space<vmem>>, vector<8x8x128xbf16>,
    %c0_18 = arith.constant 0 : index
    %c15_19 = arith.constant 15 : index
    %c0_20 = arith.constant 0 : index
    %19 = vector.load %arg7[%c0_18, %c15_19, %c0_20] : memref<10x25x128xbf16, #tpu.memory_space<vmem>>, vector<8x8x128xbf16>
    %c0_21 = arith.constant 0 : index
    %c16_22 = arith.constant 16 : index
    %c0_23 = arith.constant 0 : index
    %20 = vector.load %arg7[%c0_21, %c16_22, %c0_23] : memref<10x25x128xbf16, #tpu.memory_space<vmem>>, vector<8x8x128xbf16>
    %c0_24 = arith.constant 0 : index
    %c17 = arith.constant 17 : index
    %c0_25 = arith.constant 0 : index
    %21 = vector.load %arg7[%c0_24, %c17, %c0_25] : memref<10x25x128xbf16, #tpu.memory_space<vmem>>, vector<8x8x128xbf16>
    %c1_26 = arith.constant 1 : index
    %c15_27 = arith.constant 15 : index
    %c0_28 = arith.constant 0 : index
    %22 = vector.load %arg7[%c1_26, %c15_27, %c0_28] : memref<10x25x128xbf16, #tpu.memory_space<vmem>>, vector<8x8x128xbf16>
    %c1_29 = arith.constant 1 : index
    %c16_30 = arith.constant 16 : index
    %c0_31 = arith.constant 0 : index
    %23 = vector.load %arg7[%c1_29, %c16_30, %c0_31] : memref<10x25x128xbf16, #tpu.memory_space<vmem>>, vector<8x8x128xbf16>
    %c1_32 = arith.constant 1 : index
    %c17_33 = arith.constant 17 : index
    %c0_34 = arith.constant 0 : index
    %24 = vector.load %arg7[%c1_32, %c17_33, %c0_34] : memref<10x25x128xbf16, #tpu.memory_space<vmem>>, vector<8x8x128xbf16>
    %c2 = arith.constant 2 : index
    %c15_35 = arith.constant 15 : index
    %c0_36 = arith.constant 0 : index
    %25 = vector.load %arg7[%c2, %c15_35, %c0_36] : memref<10x25x128xbf16, #tpu.memory_space<vmem>>, vector<8x8x128xbf16>
    %c2_37 = arith.constant 2 : index
    %c16_38 = arith.constant 16 : index
    %c0_39 = arith.constant 0 : index
    %26 = vector.load %arg7[%c2_37, %c16_38, %c0_39] : memref<10x25x128xbf16, #tpu.memory_space<vmem>>, vector<8x8x128xbf16>
    %c2_40 = arith.constant 2 : index
    %c17_41 = arith.constant 17 : index
    %c0_42 = arith.constant 0 : index
    %27 = vector.load %arg7[%c2_40, %c17_41, %c0_42] : memref<10x25x128xbf16, #tpu.memory_space<vmem>>, vector<8x8x128xbf16>
    %28 = tpu.concatenate %19, %20, %21, %22, %23, %24, %25, %26, %27 in 2 : vector<8x8x128xbf16>, vector<8x8x128xbf16>, vector<8x8x128xbf16>, vector<8x8x128xbf16>, vector<8x8x128xbf16>, vector<8x8x128xbf16>, vector<8x8x128xbf16>, vector<8x8x128xbf16>, vector<8x8x128xbf16> -> vector<8x8x1152xbf16>
    %29 = vector.shape_cast %28 : vector<8x8x1152xbf16> to vector<64x1152xbf16>
    %c0_43 = arith.constant 0 : index
    %c0_44 = arith.constant 0 : index
    %30 = vector.load %arg4[%c0_43, %c0_44] : memref<1152x128xbf16, #tpu.memory_space<vmem>>, vector<1152x128xbf16>
    %cst_45 = arith.constant dense<0.000000e+00> : vector<64x128xf32>
    %31 = tpu.matmul %29, %30, %cst_45 {dimension_numbers = #tpu.dot_dimension_numbers<[1], [0], [0], [1], [0, 0, 1, 1], [], []>} : vector<64x1152xbf16>, vector<1152x128xbf16>, vector<64x128xf32> -> vector<64x128xf32>
    %c0_46 = arith.constant 0 : index
    %c0_47 = arith.constant 0 : index
    %c0_48 = arith.constant 0 : index
    %32 = vector.load %arg5[%c0_46, %c0_47, %c0_48] : memref<1x64x128xf32, #tpu.memory_space<vmem>>, vector<1x64x128xf32>
    %33 = vector.shape_cast %32 : vector<1x64x128xf32> to vector<64x128xf32>
    %34 = vector.shape_cast %31 : vector<64x128xf32> to vector<1x64x128xf32>
    tpu.vector_store %arg5[%c0_46, %c0_47, %c0_48], %34 {strides = array<i32>} : memref<1x64x128xf32, #tpu.memory_space<vmem>>, vector<1x64x128xf32>,
    %cst_49 = arith.constant dense<0.000000e+00> : vector<128xf32>
    %35 = vector.multi_reduction <add>, %31, %cst_49 [0] : vector<64x128xf32> to vector<128xf32>
    %36 = vector.shape_cast %35 : vector<128xf32> to vector<1x128xf32>
    %37 = arith.mulf %31, %31 : vector<64x128xf32>
    %cst_50 = arith.constant dense<0.000000e+00> : vector<128xf32>
    %38 = vector.multi_reduction <add>, %37, %cst_50 [0] : vector<64x128xf32> to vector<128xf32>
    %39 = vector.shape_cast %38 : vector<128xf32> to vector<1x128xf32>
    %40 = tpu.concatenate %36, %39 in 1 : vector<1x128xf32>, vector<1x128xf32> -> vector<1x256xf32>
    %41 = vector.shape_cast %40 : vector<1x256xf32> to vector<1x1x256xf32>
    %c0_51 = arith.constant 0 : index
    %c0_52 = arith.constant 0 : index
    %c0_53 = arith.constant 0 : index
    %42 = vector.load %arg6[%c0_51, %c0_52, %c0_53] : memref<1x1x256xf32, #tpu.memory_space<vmem>>, vector<1x1x256xf32>
    tpu.vector_store %arg6[%c0_51, %c0_52, %c0_53], %41 {strides = array<i32>} : memref<1x1x256xf32, #tpu.memory_space<vmem>>, vector<1x1x256xf32>,
    return
  }
  func.func @transform_0(%arg0: i32) -> (i32, i32, i32) {
    %c0_i32 = arith.constant 0 : i32
    %c0_i32_0 = arith.constant 0 : i32
    %c0_i32_1 = arith.constant 0 : i32
    return %arg0, %c0_i32, %c0_i32_0 : i32, i32, i32
  }
  func.func @transform_1(%arg0: i32) -> (i32, i32) {
    %c0_i32 = arith.constant 0 : i32
    %c0_i32_0 = arith.constant 0 : i32
    %c0_i32_1 = arith.constant 0 : i32
    return %c0_i32, %c0_i32_0 : i32, i32
  }
  func.func @transform_2(%arg0: i32) -> (i32, i32) {
    %c0_i32 = arith.constant 0 : i32
    %c0_i32_0 = arith.constant 0 : i32
    %c0_i32_1 = arith.constant 0 : i32
    return %c0_i32, %c0_i32_0 : i32, i32
  }
  func.func @transform_3(%arg0: i32) -> (i32, i32) {
    %c0_i32 = arith.constant 0 : i32
    %c0_i32_0 = arith.constant 0 : i32
    %c0_i32_1 = arith.constant 0 : i32
    return %c0_i32, %c0_i32_0 : i32, i32
  }
  func.func @transform_4(%arg0: i32) -> (i32, i32, i32) {
    %c0_i32 = arith.constant 0 : i32
    %c0_i32_0 = arith.constant 0 : i32
    %c0_i32_1 = arith.constant 0 : i32
    return %arg0, %c0_i32, %c0_i32_0 : i32, i32, i32
  }
  func.func @transform_5(%arg0: i32) -> (i32, i32, i32) {
    %c0_i32 = arith.constant 0 : i32
    %c0_i32_0 = arith.constant 0 : i32
    %c0_i32_1 = arith.constant 0 : i32
    return %arg0, %c0_i32, %c0_i32_0 : i32, i32, i32
  }
}

module attributes {stable_mosaic.version = 11 : i64} {
  func.func @_epilogue_kernel(%arg0: i32, %arg1: memref<1x64x128xf32, #tpu.memory_space<vmem>>, %arg2: memref<1x64x128xf32, #tpu.memory_space<vmem>>, %arg3: memref<1x128xf32, #tpu.memory_space<vmem>>, %arg4: memref<1x128xf32, #tpu.memory_space<vmem>>, %arg5: memref<1x10x10x128xbf16, #tpu.memory_space<vmem>>) attributes {dimension_semantics = [#tpu.dimension_semantics<parallel>], iteration_bounds = array<i64: 2>, scalar_prefetch = 0 : i64, scratch_operands = 0 : i64, tpu.core_type = #tpu.core_type<tc>, window_params = [{transform_indices = @transform_0, window_bounds = array<i64: 1, 64, 128>}, {transform_indices = @transform_1, window_bounds = array<i64: 1, 64, 128>}, {pipeline_mode = #tpu.pipeline_mode<synchronous>, transform_indices = @transform_2, window_bounds = array<i64: 1, 128>}, {pipeline_mode = #tpu.pipeline_mode<synchronous>, transform_indices = @transform_3, window_bounds = array<i64: 1, 128>}, {transform_indices = @transform_4, window_bounds = array<i64: 1, 10, 10, 128>}]} {
    %c0 = arith.constant 0 : index
    %c0_0 = arith.constant 0 : index
    %c0_1 = arith.constant 0 : index
    %0 = vector.load %arg1[%c0, %c0_0, %c0_1] : memref<1x64x128xf32, #tpu.memory_space<vmem>>, vector<1x64x128xf32>
    %1 = vector.shape_cast %0 : vector<1x64x128xf32> to vector<64x128xf32>
    %c0_2 = arith.constant 0 : index
    %c0_3 = arith.constant 0 : index
    %2 = vector.load %arg3[%c0_2, %c0_3] : memref<1x128xf32, #tpu.memory_space<vmem>>, vector<1x128xf32>
    %3 = vector.broadcast %2 : vector<1x128xf32> to vector<64x128xf32>
    %4 = arith.mulf %1, %3 : vector<64x128xf32>
    %c0_4 = arith.constant 0 : index
    %c0_5 = arith.constant 0 : index
    %5 = vector.load %arg4[%c0_4, %c0_5] : memref<1x128xf32, #tpu.memory_space<vmem>>, vector<1x128xf32>
    %6 = vector.broadcast %5 : vector<1x128xf32> to vector<64x128xf32>
    %7 = arith.addf %4, %6 : vector<64x128xf32>
    %c0_6 = arith.constant 0 : index
    %c0_7 = arith.constant 0 : index
    %c0_8 = arith.constant 0 : index
    %8 = vector.load %arg2[%c0_6, %c0_7, %c0_8] : memref<1x64x128xf32, #tpu.memory_space<vmem>>, vector<1x64x128xf32>
    %9 = vector.shape_cast %8 : vector<1x64x128xf32> to vector<64x128xf32>
    %10 = arith.addf %7, %9 : vector<64x128xf32>
    %cst = arith.constant 0.000000e+00 : f32
    %11 = vector.broadcast %cst : f32 to vector<64x128xf32>
    %12 = arith.maximumf %10, %11 : vector<64x128xf32>
    %13 = vector.shape_cast %12 : vector<64x128xf32> to vector<8x8x128xf32>
    %14 = arith.truncf %13 : vector<8x8x128xf32> to vector<8x8x128xbf16>
    %cst_9 = arith.constant 0.000000e+00 : bf16
    %15 = vector.broadcast %cst_9 : bf16 to vector<8x1x128xbf16>
    %cst_10 = arith.constant 0.000000e+00 : bf16
    %16 = vector.broadcast %cst_10 : bf16 to vector<1x10x128xbf16>
    %17 = tpu.concatenate %15, %14, %15 in 1 : vector<8x1x128xbf16>, vector<8x8x128xbf16>, vector<8x1x128xbf16> -> vector<8x10x128xbf16>
    %18 = tpu.concatenate %16, %17, %16 in 0 : vector<1x10x128xbf16>, vector<8x10x128xbf16>, vector<1x10x128xbf16> -> vector<10x10x128xbf16>
    %c0_11 = arith.constant 0 : index
    %c0_12 = arith.constant 0 : index
    %c0_13 = arith.constant 0 : index
    %c0_14 = arith.constant 0 : index
    %19 = vector.load %arg5[%c0_11, %c0_12, %c0_13, %c0_14] : memref<1x10x10x128xbf16, #tpu.memory_space<vmem>>, vector<1x10x10x128xbf16>
    %20 = vector.shape_cast %19 : vector<1x10x10x128xbf16> to vector<10x10x128xbf16>
    %21 = vector.shape_cast %18 : vector<10x10x128xbf16> to vector<1x10x10x128xbf16>
    tpu.vector_store %arg5[%c0_11, %c0_12, %c0_13, %c0_14], %21 {strides = array<i32>} : memref<1x10x10x128xbf16, #tpu.memory_space<vmem>>, vector<1x10x10x128xbf16>,
    return
  }
  func.func @transform_0(%arg0: i32) -> (i32, i32, i32) {
    %c0_i32 = arith.constant 0 : i32
    %c0_i32_0 = arith.constant 0 : i32
    %c0_i32_1 = arith.constant 0 : i32
    return %arg0, %c0_i32, %c0_i32_0 : i32, i32, i32
  }
  func.func @transform_1(%arg0: i32) -> (i32, i32, i32) {
    %c0_i32 = arith.constant 0 : i32
    %c0_i32_0 = arith.constant 0 : i32
    %c0_i32_1 = arith.constant 0 : i32
    return %arg0, %c0_i32, %c0_i32_0 : i32, i32, i32
  }
  func.func @transform_2(%arg0: i32) -> (i32, i32) {
    %c0_i32 = arith.constant 0 : i32
    %c0_i32_0 = arith.constant 0 : i32
    %c0_i32_1 = arith.constant 0 : i32
    return %c0_i32, %c0_i32_0 : i32, i32
  }
  func.func @transform_3(%arg0: i32) -> (i32, i32) {
    %c0_i32 = arith.constant 0 : i32
    %c0_i32_0 = arith.constant 0 : i32
    %c0_i32_1 = arith.constant 0 : i32
    return %c0_i32, %c0_i32_0 : i32, i32
  }
  func.func @transform_4(%arg0: i32) -> (i32, i32, i32, i32) {
    %c0_i32 = arith.constant 0 : i32
    %c0_i32_0 = arith.constant 0 : i32
    %c0_i32_1 = arith.constant 0 : i32
    %c0_i32_2 = arith.constant 0 : i32
    return %arg0, %c0_i32, %c0_i32_0, %c0_i32_1 : i32, i32, i32, i32
  }
}

module attributes {stable_mosaic.version = 11 : i64} {
  func.func @_conv1_kernel(%arg0: i32, %arg1: memref<1x10x10x128xbf16, #tpu.memory_space<vmem>>, %arg2: memref<1152x128xbf16, #tpu.memory_space<vmem>>, %arg3: memref<1x64x128xf32, #tpu.memory_space<vmem>>, %arg4: memref<1x1x256xf32, #tpu.memory_space<vmem>>) attributes {dimension_semantics = [#tpu.dimension_semantics<parallel>], iteration_bounds = array<i64: 2>, scalar_prefetch = 0 : i64, scratch_operands = 0 : i64, tpu.core_type = #tpu.core_type<tc>, window_params = [{transform_indices = @transform_0, window_bounds = array<i64: 1, 10, 10, 128>}, {pipeline_mode = #tpu.pipeline_mode<synchronous>, transform_indices = @transform_1, window_bounds = array<i64: 1152, 128>}, {transform_indices = @transform_2, window_bounds = array<i64: 1, 64, 128>}, {transform_indices = @transform_3, window_bounds = array<i64: 1, 1, 256>}]} {
    %c0 = arith.constant 0 : index
    %c0_0 = arith.constant 0 : index
    %c0_1 = arith.constant 0 : index
    %c0_2 = arith.constant 0 : index
    %0 = vector.load %arg1[%c0, %c0_0, %c0_1, %c0_2] : memref<1x10x10x128xbf16, #tpu.memory_space<vmem>>, vector<1x8x8x128xbf16>
    %1 = vector.shape_cast %0 : vector<1x8x8x128xbf16> to vector<8x8x128xbf16>
    %c0_3 = arith.constant 0 : index
    %c0_4 = arith.constant 0 : index
    %c1 = arith.constant 1 : index
    %c0_5 = arith.constant 0 : index
    %2 = vector.load %arg1[%c0_3, %c0_4, %c1, %c0_5] : memref<1x10x10x128xbf16, #tpu.memory_space<vmem>>, vector<1x8x8x128xbf16>
    %3 = vector.shape_cast %2 : vector<1x8x8x128xbf16> to vector<8x8x128xbf16>
    %c0_6 = arith.constant 0 : index
    %c0_7 = arith.constant 0 : index
    %c2 = arith.constant 2 : index
    %c0_8 = arith.constant 0 : index
    %4 = vector.load %arg1[%c0_6, %c0_7, %c2, %c0_8] : memref<1x10x10x128xbf16, #tpu.memory_space<vmem>>, vector<1x8x8x128xbf16>
    %5 = vector.shape_cast %4 : vector<1x8x8x128xbf16> to vector<8x8x128xbf16>
    %c0_9 = arith.constant 0 : index
    %c1_10 = arith.constant 1 : index
    %c0_11 = arith.constant 0 : index
    %c0_12 = arith.constant 0 : index
    %6 = vector.load %arg1[%c0_9, %c1_10, %c0_11, %c0_12] : memref<1x10x10x128xbf16, #tpu.memory_space<vmem>>, vector<1x8x8x128xbf16>
    %7 = vector.shape_cast %6 : vector<1x8x8x128xbf16> to vector<8x8x128xbf16>
    %c0_13 = arith.constant 0 : index
    %c1_14 = arith.constant 1 : index
    %c1_15 = arith.constant 1 : index
    %c0_16 = arith.constant 0 : index
    %8 = vector.load %arg1[%c0_13, %c1_14, %c1_15, %c0_16] : memref<1x10x10x128xbf16, #tpu.memory_space<vmem>>, vector<1x8x8x128xbf16>
    %9 = vector.shape_cast %8 : vector<1x8x8x128xbf16> to vector<8x8x128xbf16>
    %c0_17 = arith.constant 0 : index
    %c1_18 = arith.constant 1 : index
    %c2_19 = arith.constant 2 : index
    %c0_20 = arith.constant 0 : index
    %10 = vector.load %arg1[%c0_17, %c1_18, %c2_19, %c0_20] : memref<1x10x10x128xbf16, #tpu.memory_space<vmem>>, vector<1x8x8x128xbf16>
    %11 = vector.shape_cast %10 : vector<1x8x8x128xbf16> to vector<8x8x128xbf16>
    %c0_21 = arith.constant 0 : index
    %c2_22 = arith.constant 2 : index
    %c0_23 = arith.constant 0 : index
    %c0_24 = arith.constant 0 : index
    %12 = vector.load %arg1[%c0_21, %c2_22, %c0_23, %c0_24] : memref<1x10x10x128xbf16, #tpu.memory_space<vmem>>, vector<1x8x8x128xbf16>
    %13 = vector.shape_cast %12 : vector<1x8x8x128xbf16> to vector<8x8x128xbf16>
    %c0_25 = arith.constant 0 : index
    %c2_26 = arith.constant 2 : index
    %c1_27 = arith.constant 1 : index
    %c0_28 = arith.constant 0 : index
    %14 = vector.load %arg1[%c0_25, %c2_26, %c1_27, %c0_28] : memref<1x10x10x128xbf16, #tpu.memory_space<vmem>>, vector<1x8x8x128xbf16>
    %15 = vector.shape_cast %14 : vector<1x8x8x128xbf16> to vector<8x8x128xbf16>
    %c0_29 = arith.constant 0 : index
    %c2_30 = arith.constant 2 : index
    %c2_31 = arith.constant 2 : index
    %c0_32 = arith.constant 0 : index
    %16 = vector.load %arg1[%c0_29, %c2_30, %c2_31, %c0_32] : memref<1x10x10x128xbf16, #tpu.memory_space<vmem>>, vector<1x8x8x128xbf16>
    %17 = vector.shape_cast %16 : vector<1x8x8x128xbf16> to vector<8x8x128xbf16>
    %18 = tpu.concatenate %1, %3, %5, %7, %9, %11, %13, %15, %17 in 2 : vector<8x8x128xbf16>, vector<8x8x128xbf16>, vector<8x8x128xbf16>, vector<8x8x128xbf16>, vector<8x8x128xbf16>, vector<8x8x128xbf16>, vector<8x8x128xbf16>, vector<8x8x128xbf16>, vector<8x8x128xbf16> -> vector<8x8x1152xbf16>
    %19 = vector.shape_cast %18 : vector<8x8x1152xbf16> to vector<64x1152xbf16>
    %c0_33 = arith.constant 0 : index
    %c0_34 = arith.constant 0 : index
    %20 = vector.load %arg2[%c0_33, %c0_34] : memref<1152x128xbf16, #tpu.memory_space<vmem>>, vector<1152x128xbf16>
    %cst = arith.constant dense<0.000000e+00> : vector<64x128xf32>
    %21 = tpu.matmul %19, %20, %cst {dimension_numbers = #tpu.dot_dimension_numbers<[1], [0], [0], [1], [0, 0, 1, 1], [], []>} : vector<64x1152xbf16>, vector<1152x128xbf16>, vector<64x128xf32> -> vector<64x128xf32>
    %c0_35 = arith.constant 0 : index
    %c0_36 = arith.constant 0 : index
    %c0_37 = arith.constant 0 : index
    %22 = vector.load %arg3[%c0_35, %c0_36, %c0_37] : memref<1x64x128xf32, #tpu.memory_space<vmem>>, vector<1x64x128xf32>
    %23 = vector.shape_cast %22 : vector<1x64x128xf32> to vector<64x128xf32>
    %24 = vector.shape_cast %21 : vector<64x128xf32> to vector<1x64x128xf32>
    tpu.vector_store %arg3[%c0_35, %c0_36, %c0_37], %24 {strides = array<i32>} : memref<1x64x128xf32, #tpu.memory_space<vmem>>, vector<1x64x128xf32>,
    %cst_38 = arith.constant dense<0.000000e+00> : vector<128xf32>
    %25 = vector.multi_reduction <add>, %21, %cst_38 [0] : vector<64x128xf32> to vector<128xf32>
    %26 = vector.shape_cast %25 : vector<128xf32> to vector<1x128xf32>
    %27 = arith.mulf %21, %21 : vector<64x128xf32>
    %cst_39 = arith.constant dense<0.000000e+00> : vector<128xf32>
    %28 = vector.multi_reduction <add>, %27, %cst_39 [0] : vector<64x128xf32> to vector<128xf32>
    %29 = vector.shape_cast %28 : vector<128xf32> to vector<1x128xf32>
    %30 = tpu.concatenate %26, %29 in 1 : vector<1x128xf32>, vector<1x128xf32> -> vector<1x256xf32>
    %31 = vector.shape_cast %30 : vector<1x256xf32> to vector<1x1x256xf32>
    %c0_40 = arith.constant 0 : index
    %c0_41 = arith.constant 0 : index
    %c0_42 = arith.constant 0 : index
    %32 = vector.load %arg4[%c0_40, %c0_41, %c0_42] : memref<1x1x256xf32, #tpu.memory_space<vmem>>, vector<1x1x256xf32>
    tpu.vector_store %arg4[%c0_40, %c0_41, %c0_42], %31 {strides = array<i32>} : memref<1x1x256xf32, #tpu.memory_space<vmem>>, vector<1x1x256xf32>,
    return
  }
  func.func @transform_0(%arg0: i32) -> (i32, i32, i32, i32) {
    %c0_i32 = arith.constant 0 : i32
    %c0_i32_0 = arith.constant 0 : i32
    %c0_i32_1 = arith.constant 0 : i32
    %c0_i32_2 = arith.constant 0 : i32
    return %arg0, %c0_i32, %c0_i32_0, %c0_i32_1 : i32, i32, i32, i32
  }
  func.func @transform_1(%arg0: i32) -> (i32, i32) {
    %c0_i32 = arith.constant 0 : i32
    %c0_i32_0 = arith.constant 0 : i32
    %c0_i32_1 = arith.constant 0 : i32
    return %c0_i32, %c0_i32_0 : i32, i32
  }
  func.func @transform_2(%arg0: i32) -> (i32, i32, i32) {
    %c0_i32 = arith.constant 0 : i32
    %c0_i32_0 = arith.constant 0 : i32
    %c0_i32_1 = arith.constant 0 : i32
    return %arg0, %c0_i32, %c0_i32_0 : i32, i32, i32
  }
  func.func @transform_3(%arg0: i32) -> (i32, i32, i32) {
    %c0_i32 = arith.constant 0 : i32
    %c0_i32_0 = arith.constant 0 : i32
    %c0_i32_1 = arith.constant 0 : i32
    return %arg0, %c0_i32, %c0_i32_0 : i32, i32, i32
  }
}

module attributes {stable_mosaic.version = 11 : i64} {
  func.func @_epilogue_kernel(%arg0: i32, %arg1: memref<1x64x128xf32, #tpu.memory_space<vmem>>, %arg2: memref<1x10x10x128xbf16, #tpu.memory_space<vmem>>, %arg3: memref<1x128xf32, #tpu.memory_space<vmem>>, %arg4: memref<1x128xf32, #tpu.memory_space<vmem>>, %arg5: memref<1x8x8x128xf32, #tpu.memory_space<vmem>>) attributes {dimension_semantics = [#tpu.dimension_semantics<parallel>], iteration_bounds = array<i64: 2>, scalar_prefetch = 0 : i64, scratch_operands = 0 : i64, tpu.core_type = #tpu.core_type<tc>, window_params = [{transform_indices = @transform_0, window_bounds = array<i64: 1, 64, 128>}, {transform_indices = @transform_1, window_bounds = array<i64: 1, 10, 10, 128>}, {pipeline_mode = #tpu.pipeline_mode<synchronous>, transform_indices = @transform_2, window_bounds = array<i64: 1, 128>}, {pipeline_mode = #tpu.pipeline_mode<synchronous>, transform_indices = @transform_3, window_bounds = array<i64: 1, 128>}, {transform_indices = @transform_4, window_bounds = array<i64: 1, 8, 8, 128>}]} {
    %c0 = arith.constant 0 : index
    %c0_0 = arith.constant 0 : index
    %c0_1 = arith.constant 0 : index
    %0 = vector.load %arg1[%c0, %c0_0, %c0_1] : memref<1x64x128xf32, #tpu.memory_space<vmem>>, vector<1x64x128xf32>
    %1 = vector.shape_cast %0 : vector<1x64x128xf32> to vector<64x128xf32>
    %c0_2 = arith.constant 0 : index
    %c0_3 = arith.constant 0 : index
    %2 = vector.load %arg3[%c0_2, %c0_3] : memref<1x128xf32, #tpu.memory_space<vmem>>, vector<1x128xf32>
    %3 = vector.broadcast %2 : vector<1x128xf32> to vector<64x128xf32>
    %4 = arith.mulf %1, %3 : vector<64x128xf32>
    %c0_4 = arith.constant 0 : index
    %c0_5 = arith.constant 0 : index
    %5 = vector.load %arg4[%c0_4, %c0_5] : memref<1x128xf32, #tpu.memory_space<vmem>>, vector<1x128xf32>
    %6 = vector.broadcast %5 : vector<1x128xf32> to vector<64x128xf32>
    %7 = arith.addf %4, %6 : vector<64x128xf32>
    %c0_6 = arith.constant 0 : index
    %c1 = arith.constant 1 : index
    %c1_7 = arith.constant 1 : index
    %c0_8 = arith.constant 0 : index
    %8 = vector.load %arg2[%c0_6, %c1, %c1_7, %c0_8] : memref<1x10x10x128xbf16, #tpu.memory_space<vmem>>, vector<1x8x8x128xbf16>
    %9 = vector.shape_cast %8 : vector<1x8x8x128xbf16> to vector<8x8x128xbf16>
    %10 = vector.shape_cast %9 : vector<8x8x128xbf16> to vector<64x128xbf16>
    %11 = arith.extf %10 : vector<64x128xbf16> to vector<64x128xf32>
    %12 = arith.addf %7, %11 : vector<64x128xf32>
    %cst = arith.constant 0.000000e+00 : f32
    %13 = vector.broadcast %cst : f32 to vector<64x128xf32>
    %14 = arith.maximumf %12, %13 : vector<64x128xf32>
    %15 = vector.shape_cast %14 : vector<64x128xf32> to vector<8x8x128xf32>
    %c0_9 = arith.constant 0 : index
    %c0_10 = arith.constant 0 : index
    %c0_11 = arith.constant 0 : index
    %c0_12 = arith.constant 0 : index
    %16 = vector.load %arg5[%c0_9, %c0_10, %c0_11, %c0_12] : memref<1x8x8x128xf32, #tpu.memory_space<vmem>>, vector<1x8x8x128xf32>
    %17 = vector.shape_cast %16 : vector<1x8x8x128xf32> to vector<8x8x128xf32>
    %18 = vector.shape_cast %15 : vector<8x8x128xf32> to vector<1x8x8x128xf32>
    tpu.vector_store %arg5[%c0_9, %c0_10, %c0_11, %c0_12], %18 {strides = array<i32>} : memref<1x8x8x128xf32, #tpu.memory_space<vmem>>, vector<1x8x8x128xf32>,
    return
  }
  func.func @transform_0(%arg0: i32) -> (i32, i32, i32) {
    %c0_i32 = arith.constant 0 : i32
    %c0_i32_0 = arith.constant 0 : i32
    %c0_i32_1 = arith.constant 0 : i32
    return %arg0, %c0_i32, %c0_i32_0 : i32, i32, i32
  }
  func.func @transform_1(%arg0: i32) -> (i32, i32, i32, i32) {
    %c0_i32 = arith.constant 0 : i32
    %c0_i32_0 = arith.constant 0 : i32
    %c0_i32_1 = arith.constant 0 : i32
    %c0_i32_2 = arith.constant 0 : i32
    return %arg0, %c0_i32, %c0_i32_0, %c0_i32_1 : i32, i32, i32, i32
  }
  func.func @transform_2(%arg0: i32) -> (i32, i32) {
    %c0_i32 = arith.constant 0 : i32
    %c0_i32_0 = arith.constant 0 : i32
    %c0_i32_1 = arith.constant 0 : i32
    return %c0_i32, %c0_i32_0 : i32, i32
  }
  func.func @transform_3(%arg0: i32) -> (i32, i32) {
    %c0_i32 = arith.constant 0 : i32
    %c0_i32_0 = arith.constant 0 : i32
    %c0_i32_1 = arith.constant 0 : i32
    return %c0_i32, %c0_i32_0 : i32, i32
  }
  func.func @transform_4(%arg0: i32) -> (i32, i32, i32, i32) {
    %c0_i32 = arith.constant 0 : i32
    %c0_i32_0 = arith.constant 0 : i32
    %c0_i32_1 = arith.constant 0 : i32
    %c0_i32_2 = arith.constant 0 : i32
    return %arg0, %c0_i32, %c0_i32_0, %c0_i32_1 : i32, i32, i32, i32
  }
}

</mosaic_0001>

<bundles_post_ra>
// kernel: resnet18_forward.8
= control target key start
LH: loop header
LB: loop body
LE: loop exit
PB: predicated region body
PF: predicated region fallthrough
CT: control target
= control target key end

     0   :  { %s603_s15 = smov 0   ;;  %s718_s0 = inlined_call_operand.vmem [shape: f32[2,64,128], index: 0, kind: input, shape index: {}]   ;;  %s719_s1 = inlined_call_operand.vmem [shape: f32[2,64,128], index: 1, kind: input, shape index: {}]   ;;  %s720_s2 = inlined_call_operand.vmem [shape: f32[1,128], index: 2, kind: input, shape index: {}]   ;;  %s721_s3 = inlined_call_operand.vmem [shape: f32[1,128], index: 3, kind: input, shape index: {}]   ;;  %s722_s4 = inlined_call_operand.vmem [shape: bf16[2,10,10,128], index: 4, kind: output, shape index: {}]  }
   0x1 LB: > { %s525_s16 = sadd.s32 4294967295, %s575_s15   ;;  %p529_p0 = scmp.ge.s32.totalorder %s575_s15, 1  ;;  %s575_s15 = sphi %s603_s15, %s14_s15  }
   0x2   : > { %p172_p1 = scmp.lt.s32.totalorder %s575_s15, 3 }
   0x4   : > { %p173_p2 = pnand %p529_p0, %p172_p1 }
   0x5   : > { %p203_p3 = scmp.lt.s32.totalorder (!%p173_p2), %s525_s16, 1 }
   0x6   : > { %176 = sbr.rel (%p173_p2) target bundleno = 54 (0x36), region = 36 }
   0xb   : > { %s728_s16 = smov (!%p203_p3, %s525_s16), 1  ;;  %v577_v0 = vmov 0   ;;  %v535_v3 = vld [vmem:[%s720_s2] ss:$0 sm:$0xff]  ;;  %vm353_vm0 = vcmask 1040384   ;;  %vm364_vm2 = vcmask 1044480  }
   0xc   : > { %v537_v1 = vcombine.low %v577_v0, %v577_v0  ;;  %v538_v2 = vcombine.high %v577_v0, %v577_v0  ;;  %s559_s17 = smul.u32 80, %s728_s16  ;;  %s557_s18 = sshll.u32 %s728_s16, 6  ;;  %v536_v5 = vld [vmem:[%s721_s3] ss:$0 sm:$0xff]  ;;  %vm354_vm1 = vsmask.f32 256 }
   0xd   : > { %s617_s23 = scalar_lea.vmem %s718_s0, %s557_s18  ;;  %s622_s26 = scalar_lea.vmem %s719_s1, %s557_s18  ;;  %vm365_vm3 = vsmask.f32 4352  ;;  %vm656_vm4 = vmand %vm353_vm0, %vm354_vm1 }
   0xe   : > { %s627_s29 = scalar_lea.vmem %s722_s4, %s559_s17  ;;  %v219_v4 = vld [vmem:[%s617_s23] sm:$0xff]  ;;  %v220_v6 = vld [vmem:[%s617_s23 + $0x8] sm:$0xff]  ;;  %v221_v10 = vld [vmem:[%s617_s23 + $0x10] sm:$0xff] }
   0xf   : > { %438 = vst [vmem:[%s627_s29] sm:$0xf] %v537_v1  ;;  %456 = vst [vmem:[%s627_s29 + $0x48] sm:$0xf] %v537_v1  ;;  %v234_v7 = vmul.f32 %v535_v3, %v219_v4  ;;  %v257_v8 = vld [vmem:[%s622_s26] sm:$0xff]  ;;  %v235_v9 = vmul.f32 %v535_v3, %v220_v6  ;;  %v258_v11 = vld [vmem:[%s622_s26 + $0x8] sm:$0xff]  ;;  %v236_v12 = vmul.f32 %v535_v3, %v221_v10 }
  0x10   : > { %439 = vst [vmem:[%s627_s29 + $0x4] sm:$0x1] %v538_v2  ;;  %457 = vst [vmem:[%s627_s29 + $0x4c] sm:$0x1] %v538_v2  ;;  %v222_v13 = vld [vmem:[%s617_s23 + $0x18] sm:$0xff]  ;;  %v223_v14 = vld [vmem:[%s617_s23 + $0x20] sm:$0xff] }
  0x11   : > { %v249_v15 = vadd.f32 %v536_v5, %v234_v7  ;;  %v250_v16 = vadd.f32 %v536_v5, %v235_v9  ;;  %v259_v17 = vld [vmem:[%s622_s26 + $0x10] sm:$0xff]  ;;  %v237_v18 = vmul.f32 %v535_v3, %v222_v13  ;;  %v260_v19 = vld [vmem:[%s622_s26 + $0x18] sm:$0xff]  ;;  %v238_v20 = vmul.f32 %v535_v3, %v223_v14  ;;  %v224_v21 = vld [vmem:[%s617_s23 + $0x28] sm:$0xff] }
  0x12   : > { %v251_v22 = vadd.f32 %v536_v5, %v236_v12  ;;  %v261_v23 = vld [vmem:[%s622_s26 + $0x20] sm:$0xff]  ;;  %v239_v24 = vmul.f32 %v535_v3, %v224_v21  ;;  %v225_v25 = vld [vmem:[%s617_s23 + $0x30] sm:$0xff]  ;;  %v226_v26 = vld [vmem:[%s617_s23 + $0x38] sm:$0xff] }
  0x13   : > { %v265_v27 = vadd.f32 %v257_v8, %v249_v15  ;;  %v266_v28 = vadd.f32 %v258_v11, %v250_v16  ;;  %v252_v29 = vadd.f32 %v536_v5, %v237_v18  ;;  %v253_v30 = vadd.f32 %v536_v5, %v238_v20  ;;  %v262_v31 = vld [vmem:[%s622_s26 + $0x28] sm:$0xff]  ;;  %v263_v40 = vld [vmem:[%s622_s26 + $0x30] sm:$0xff]  ;;  %v264_v41 = vld [vmem:[%s622_s26 + $0x38] sm:$0xff] }
  0x14   : > { %v267_v32 = vadd.f32 %v259_v17, %v251_v22  ;;  %v254_v33 = vadd.f32 %v536_v5, %v239_v24  ;;  %v240_v34 = vmul.f32 %v535_v3, %v225_v25  ;;  %v241_v35 = vmul.f32 %v535_v3, %v226_v26  ;;  %vm662_vm5 = vmand %vm364_vm2, %vm365_vm3 }
  0x15   : > { %v273_v36 = vmax.f32 %v265_v27, 0.0  ;;  %v274_v37 = vmax.f32 %v266_v28, 0.0  ;;  %v268_v38 = vadd.f32 %v260_v19, %v252_v29  ;;  %v269_v39 = vadd.f32 %v261_v23, %v253_v30 }
  0x16   : > { %v275_v42 = vmax.f32 %v267_v32, 0.0  ;;  %v270_v43 = vadd.f32 %v262_v31, %v254_v33  ;;  %v255_v44 = vadd.f32 %v536_v5, %v240_v34  ;;  %v256_v45 = vadd.f32 %v536_v5, %v241_v35 }
  0x17   : > { %v281_v46 = vpack.c.bf16 %v273_v36, %v273_v36  ;;  %v282_v47 = vpack.c.bf16 %v274_v37, %v274_v37  ;;  %v276_v48 = vmax.f32 %v268_v38, 0.0  ;;  %v277_v49 = vmax.f32 %v269_v39, 0.0 }
  0x18   : > { %v283_v50 = vpack.c.bf16 %v275_v42, %v275_v42  ;;  %v278_v51 = vmax.f32 %v270_v43, 0.0  ;;  %v271_v52 = vadd.f32 %v263_v40, %v255_v44  ;;  %v652_v53 = vadd.f32 %v264_v41, %v256_v45 }
  0x19   : > { %v290_v54 = vshrl.u32 %v281_v46, 16  ;;  %v293_v55 = vshll.u32 %v281_v46, 16  ;;  %v297_v56 = vshrl.u32 %v282_v47, 16  ;;  %v300_v57 = vshll.u32 %v282_v47, 16 }
  0x1a   : > { %v304_v58 = vshrl.u32 %v283_v50, 16  ;;  %v307_v59 = vshll.u32 %v283_v50, 16  ;;  %v284_v60 = vpack.c.bf16 %v276_v48, %v276_v48  ;;  %v285_v61 = vpack.c.bf16 %v277_v49, %v277_v49 }
  0x1b   : > { %v292_v62 = vrot.slane %v290_v54, 7  ;;  %v299_v63 = vrot.slane %v297_v56, 7  ;;  %v286_v0 = vpack.c.bf16 %v278_v51, %v278_v51  ;;  %v279_v1 = vmax.f32 %v271_v52, 0.0 }
  0x1c   : > { %v306_v3 = vrot.slane %v304_v58, 7  ;;  %v311_v4 = vshrl.u32 %v284_v60, 16  ;;  %v314_v5 = vshll.u32 %v284_v60, 16  ;;  %v318_v6 = vshrl.u32 %v285_v61, 16 }
  0x1d   : > { %v295_v7 = vor.u32 %v293_v55, %v292_v62  ;;  %v302_v9 = vor.u32 %v300_v57, %v299_v63  ;;  %v321_v10 = vshll.u32 %v285_v61, 16  ;;  %v325_v11 = vshrl.u32 %v286_v0, 16 }
  0x1e   : > { %v309_v12 = vor.u32 %v307_v59, %v306_v3  ;;  %v313_v13 = vrot.slane %v311_v4, 7  ;;  %v320_v14 = vrot.slane %v318_v6, 7  ;;  %v328_v15 = vshll.u32 %v286_v0, 16 }
  0x1f   : > { %v356_v16 = vsel %vm656_vm4, 0, %v295_v7  ;;  %v357_v17 = vsel %vm656_vm4, 0, %v302_v9  ;;  %v327_v18 = vrot.slane %v325_v11, 7  ;;  %v287_v19 = vpack.c.bf16 %v279_v1, %v279_v1 }
  0x20   : > { %v367_v20 = vsel %vm662_vm5, %v356_v16, 0  ;;  %v368_v21 = vsel %vm662_vm5, %v357_v17, 0  ;;  %v358_v22 = vsel %vm656_vm4, 0, %v309_v12  ;;  %v316_v23 = vor.u32 %v314_v5, %v313_v13 }
  0x21   : > { %v539_v24 = vcombine.low %v367_v20, %v367_v20  ;;  %v540_v25 = vcombine.high %v367_v20, %v367_v20  ;;  %v541_v26 = vcombine.low %v368_v21, %v368_v21  ;;  %v542_v27 = vcombine.high %v368_v21, %v368_v21 }
  0x22   : > { %v369_v28 = vsel %vm662_vm5, %v358_v22, 0  ;;  %v359_v29 = vsel %vm656_vm4, 0, %v316_v23  ;;  %v323_v30 = vor.u32 %v321_v10, %v320_v14  ;;  %v330_v31 = vor.u32 %v328_v15, %v327_v18 }
  0x23   : > { %440 = vst [vmem:[%s627_s29 + $0x8] sm:$0xf] %v539_v24  ;;  %441 = vst [vmem:[%s627_s29 + $0xc] sm:$0x1] %v540_v25  ;;  %v543_v32 = vcombine.low %v369_v28, %v369_v28  ;;  %v544_v33 = vcombine.high %v369_v28, %v369_v28  ;;  %v370_v34 = vsel %vm662_vm5, %v359_v29, 0  ;;  %v332_v35 = vshrl.u32 %v287_v19, 16 }
  0x24   : > { %442 = vst [vmem:[%s627_s29 + $0x10] sm:$0xf] %v541_v26  ;;  %443 = vst [vmem:[%s627_s29 + $0x14] sm:$0x1] %v542_v27  ;;  %v545_v36 = vcombine.low %v370_v34, %v370_v34  ;;  %v546_v37 = vcombine.high %v370_v34, %v370_v34  ;;  %v360_v38 = vsel %vm656_vm4, 0, %v323_v30  ;;  %v361_v39 = vsel %vm656_vm4, 0, %v330_v31 }
  0x25   : > { %444 = vst [vmem:[%s627_s29 + $0x18] sm:$0xf] %v543_v32  ;;  %445 = vst [vmem:[%s627_s29 + $0x1c] sm:$0x1] %v544_v33  ;;  %v371_v40 = vsel %vm662_vm5, %v360_v38, 0  ;;  %v372_v41 = vsel %vm662_vm5, %v361_v39, 0 }
  0x26   : > { %v334_v42 = vrot.slane %v332_v35, 7  ;;  %v335_v43 = vshll.u32 %v287_v19, 16  ;;  %446 = vst [vmem:[%s627_s29 + $0x20] sm:$0xf] %v545_v36  ;;  %447 = vst [vmem:[%s627_s29 + $0x24] sm:$0x1] %v546_v37  ;;  %v547_v44 = vcombine.low %v371_v40, %v371_v40  ;;  %v548_v45 = vcombine.high %v371_v40, %v371_v40 }
  0x27   : > { %v549_v46 = vcombine.low %v372_v41, %v372_v41  ;;  %v550_v47 = vcombine.high %v372_v41, %v372_v41  ;;  %v280_v49 = vmax.f32 %v652_v53, 0.0 }
  0x28   : > { %v337_v48 = vor.u32 %v335_v43, %v334_v42  ;;  %448 = vst [vmem:[%s627_s29 + $0x28] sm:$0xf] %v547_v44  ;;  %449 = vst [vmem:[%s627_s29 + $0x2c] sm:$0x1] %v548_v45 }
  0x29   : > { %450 = vst [vmem:[%s627_s29 + $0x30] sm:$0xf] %v549_v46  ;;  %451 = vst [vmem:[%s627_s29 + $0x34] sm:$0x1] %v550_v47  ;;  %v288_v51 = vpack.c.bf16 %v280_v49, %v280_v49 }
  0x2a   : > { %v362_v50 = vsel %vm656_vm4, 0, %v337_v48 }
  0x2b   : > { %v373_v52 = vsel %vm662_vm5, %v362_v50, 0  ;;  %v339_v56 = vshrl.u32 %v288_v51, 16  ;;  %v342_v57 = vshll.u32 %v288_v51, 16 }
  0x2c   : > { %v551_v54 = vcombine.low %v373_v52, %v373_v52  ;;  %v552_v55 = vcombine.high %v373_v52, %v373_v52 }
  0x2d   : > { %v341_v53 = vrot.slane %v339_v56, 7 }
  0x2e   : > { %452 = vst [vmem:[%s627_s29 + $0x38] sm:$0xf] %v551_v54  ;;  %453 = vst [vmem:[%s627_s29 + $0x3c] sm:$0x1] %v552_v55 }
  0x2f   : > { %v344_v58 = vor.u32 %v342_v57, %v341_v53 }
  0x31   : > { %v363_v59 = vsel %vm656_vm4, 0, %v344_v58 }
  0x32   : > { %v374_v60 = vsel %vm662_vm5, %v363_v59, 0 }
  0x33   : > { %v553_v61 = vcombine.low %v374_v60, %v374_v60  ;;  %v554_v62 = vcombine.high %v374_v60, %v374_v60 }
  0x35   : > { %454 = vst [vmem:[%s627_s29 + $0x40] sm:$0xf] %v553_v61  ;;  %455 = vst [vmem:[%s627_s29 + $0x44] sm:$0x1] %v554_v62 }
  0x36 PF: > { %s14_s15 = sadd.s32 1, %s575_s15  }
  0x37   : > { %p11_p4 = scmp.ge.s32.totalorder %s14_s15, 4  }
  0x39   :  { %13 = sbr.rel (!%p11_p4) target bundleno = 1 (0x1), region = 69 }

// kernel: resnet18_forward.6
= control target key start
LH: loop header
LB: loop body
LE: loop exit
PB: predicated region body
PF: predicated region fallthrough
CT: control target
= control target key end

     0   :  { %s2295_s18 = smov 0   ;;  %s2955_s0 = inlined_call_operand.vmem [shape: bf16[2,10,10,64], index: 0, kind: input, shape index: {}]   ;;  %s2956_s1 = inlined_call_operand.vmem [shape: bf16[576,256], index: 1, kind: input, shape index: {}]   ;;  %s2957_s2 = inlined_call_operand.vmem [shape: f32[1,128], index: 2, kind: input, shape index: {}]   ;;  %s2958_s3 = inlined_call_operand.vmem [shape: f32[2,64,128], index: 3, kind: output, shape index: {0}]   ;;  %s2959_s4 = inlined_call_operand.vmem [shape: f32[2,64,128], index: 4, kind: output, shape index: {1}]   ;;  %s2960_s5 = inlined_call_operand.vmem [shape: f32[2,1,256], index: 5, kind: output, shape index: {2}]  }
   0x1 LB: > { %s1854_s19 = sadd.s32 4294967295, %s2260_s18   ;;  %p1858_p0 = scmp.ge.s32.totalorder %s2260_s18, 1  ;;  %s2260_s18 = sphi %s2295_s18, %s16_s18  }
   0x2   : > { %p192_p1 = scmp.lt.s32.totalorder %s2260_s18, 3 }
   0x4   : > { %p193_p2 = pnand %p1858_p0, %p192_p1 }
   0x6   : > { %196 = sbr.rel (%p193_p2) target bundleno = 440 (0x1b8), region = 32 }
   0xb   : > { %p229_p3 = scmp.lt.s32.totalorder %s1854_s19, 1  ;;  %v2134_v0 = vld [vmem:[%s2956_s1 + $0x74] ss:$8 sps:$4 sm:$0xff]   ;;  %v2136_v1 = vld [vmem:[%s2956_s1 + $0x70] ss:$8 sps:$4 sm:$0xff]   ;;  %s2262_s17 = smov 64  }
   0xc   : > { %1428 = vmatprep.subr.bf16.mxu0 %v2134_v0  ;;  %v2137_v2 = vld [vmem:[%s2956_s1 + $0x64] ss:$8 sps:$4 sm:$0xff]   ;;  %v2139_v3 = vld [vmem:[%s2956_s1 + $0x60] ss:$8 sps:$4 sm:$0xff]   ;;  %v2140_v4 = vld [vmem:[%s2956_s1 + $0x54] ss:$8 sps:$4 sm:$0xff]  }
   0xd   : > { %s2973_s19 = smov (!%p229_p3, %s1854_s19), 1  ;;  %1429 = vmatpush1.bf16.msra.mxu0 %v2136_v1  ;;  %v2142_v5 = vld [vmem:[%s2956_s1 + $0x50] ss:$8 sps:$4 sm:$0xff]   ;;  %v2145_v6 = vld [vmem:[%s2956_s1 + $0x174] ss:$8 sps:$4 sm:$0xff]   ;;  %vm779_vm0 = vcmask 523264  }
   0xe   : > { %s2078_s28 = smul.u32 80, %s2973_s19  ;;  %1430 = vmatprep.subr.bf16.mxu0 %v2137_v2  ;;  %v2143_v7 = vld [vmem:[%s2956_s1 + $0x44] ss:$8 sps:$4 sm:$0xff]   ;;  %v2148_v8 = vld [vmem:[%s2956_s1 + $0x170] ss:$8 sps:$4 sm:$0xff]   ;;  %1501 = vmatprep.subr.bf16.mxu1 %v2145_v6  ;;  %s1864_s25 = sshll.u32 %s2973_s19, 1 }
   0xf   : > { %1502 = vmatpush1.bf16.msra.mxu1 %v2148_v8  ;;  %v2147_v29 = vld [vmem:[%s2956_s1 + $0x40] ss:$8 sps:$4 sm:$0xff]  }
  0x10   : > { %s2330_s12 = scalar_lea.vmem %s2955_s0, %s2078_s28  ;;  %s247_s28 = scalar_lea.vmem %s2960_s5, %s1864_s25 }
  0x11   : > { %v1865_v9 = vld [vmem:[%s2330_s12 + $0x8] sm:$0xf]  ;;  %v2340_v10 = vld [vmem:[%s2330_s12 + $0xc] sm:$0x1]  ;;  %v1868_v11 = vld [vmem:[%s2330_s12 + $0x20] sm:$0xf]  ;;  %1431 = vmatpush1.bf16.msra.mxu0 %v2139_v3 }
  0x12   : > { %v1929_v12 = vcombine.low %v1865_v9, %v1865_v9  ;;  %v2344_v13 = vcombine.low %v1865_v9, %v2340_v10  ;;  %v2347_v14 = vld [vmem:[%s2330_s12 + $0x24] sm:$0x1]  ;;  %v1932_v15 = vcombine.low %v1868_v11, %v1868_v11  ;;  %v1866_v16 = vld [vmem:[%s2330_s12 + $0x10] sm:$0xf]  ;;  %v2351_v17 = vld [vmem:[%s2330_s12] sm:$0xf]  ;;  %1432 = vmatprep.subr.bf16.mxu0 %v2140_v4 }
  0x13   : > { %v2354_v18 = vcombine.low %v1868_v11, %v2347_v14  ;;  %v2357_v19 = vld [vmem:[%s2330_s12 + $0x4] sm:$0x1]  ;;  %v2360_v20 = vld [vmem:[%s2330_s12 + $0x18] sm:$0xf]  ;;  %v2363_v21 = vld [vmem:[%s2330_s12 + $0x8] sm:$0xf]  ;;  %v1930_v22 = vcombine.low %v1866_v16, %v1866_v16 }
  0x14   : > { %491 = vrot.lane.b32.xlu0 %v1929_v12, %s2262_s17  ;;  %497 = vrot.lane.b32.xlu1 %v1932_v15, %s2262_s17  ;;  %v1913_v23 = vcombine.low %v2351_v17, %v2357_v19  ;;  %v2370_v24 = vld [vmem:[%s2330_s12 + $0xc] sm:$0x1]  ;;  %v2373_v25 = vld [vmem:[%s2330_s12 + $0x10] sm:$0xf]  ;;  %v1931_v34 = vcombine.low %v2360_v20, %v2360_v20 }
  0x15   : > { %v1914_v26 = vcombine.low %v2363_v21, %v2370_v24  ;;  %v1897_v27 = vld [vmem:[%s2330_s12 + $0x14] sm:$0x1]  ;;  %v1905_v28 = vld [vmem:[%s2330_s12 + $0x10] sm:$0xe]  ;;  %1433 = vmatpush1.bf16.msra.mxu0 %v2142_v5  ;;  %v2384_v33 = vld [vmem:[%s2330_s12 + $0x18] sm:$0xf] }
  0x16   : > { %v364_v30 = vshrl.u32 %v1913_v23, 16  ;;  %v366_v31 = vshll.u32 %v1913_v23, 16  ;;  %v1953_v32 = vcombine.low %v2373_v25, %v1897_v27  ;;  %1434 = vmatprep.subr.bf16.mxu0 %v2143_v7  ;;  %v1961_v37 = vcombine.low %v1905_v28, %v1897_v27  ;;  %v1898_v38 = vld [vmem:[%s2330_s12 + $0x1c] sm:$0x1]  ;;  %v1906_v42 = vld [vmem:[%s2330_s12 + $0x18] sm:$0xe] }
  0x17   : > { %v371_v35 = vshrl.u32 %v1914_v26, 16  ;;  %v373_v36 = vshll.u32 %v1914_v26, 16  ;;  %v1954_v43 = vcombine.low %v2384_v33, %v1898_v38  ;;  %v1962_v46 = vcombine.low %v1906_v42, %v1898_v38  ;;  %v2395_v47 = vld [vmem:[%s2330_s12 + $0x10] sm:$0xf]  ;;  %v2398_v48 = vld [vmem:[%s2330_s12 + $0x14] sm:$0x1] }
  0x18   : > { %493 = vrot.lane.b32.xlu0 %v1930_v22, %s2262_s17  ;;  %v368_v39 = vrot.slane %v366_v31, 1  ;;  %v676_v40 = vshrl.u32 %v1953_v32, 16  ;;  %v678_v41 = vshll.u32 %v1953_v32, 16  ;;  %v2392_v45 = vrot.slane %v1961_v37, 1  ;;  %v2401_v52 = vld [vmem:[%s2330_s12 + $0x18] sm:$0xf] }
  0x19   : > { %v375_v44 = vrot.slane %v373_v36, 1  ;;  %1435 = vmatpush1.bf16.msra.mxu0 %v2147_v29  ;;  %v685_v51 = vshll.u32 %v1954_v43, 16  ;;  %v683_v53 = vshrl.u32 %v1954_v43, 16  ;;  %v2403_v54 = vrot.slane %v1962_v46, 1  ;;  %v2408_v56 = vld [vmem:[%s2330_s12 + $0x1c] sm:$0x1] }
  0x1a   : > { %v369_v49 = vor.u32 %v368_v39, %v364_v30  ;;  %v680_v50 = vrot.slane %v678_v41, 1  ;;  %v1915_v55 = vcombine.low %v2395_v47, %v2398_v48  ;;  %v1916_v60 = vcombine.low %v2401_v52, %v2408_v56  ;;  %v1881_v61 = vld [vmem:[%s2330_s12 + $0x8] sm:$0xe]  ;;  %v1874_v62 = vld [vmem:[%s2330_s12 + $0x14] sm:$0x1] }
  0x1b   : > { %2964 = vst [vmem:[#allocation2_spill] sm:$0xff] %v2403_v54  ;;  %v376_v57 = vor.u32 %v375_v44, %v371_v35  ;;  %v687_v59 = vrot.slane %v685_v51, 1  ;;  %v2418_v2 = vcombine.low %v1866_v16, %v1874_v62  ;;  %v2421_v4 = vld [vmem:[%s2330_s12 + $0x20] sm:$0xf]  ;;  %v1945_v6 = vcombine.low %v1881_v61, %v2340_v10  ;;  %v1882_v7 = vld [vmem:[%s2330_s12 + $0x10] sm:$0xe] }
  0x1c   : > { %419 = vrot.lane.b32.xlu1 %v369_v49, %s2262_s17  ;;  %495 = vrot.lane.b32.xlu0 %v1931_v34, %s2262_s17  ;;  %v681_v58 = vor.u32 %v680_v50, %v676_v40  ;;  %v378_v0 = vshrl.u32 %v1915_v55, 16  ;;  %v380_v1 = vshll.u32 %v1915_v55, 16  ;;  %v387_v3 = vshll.u32 %v1916_v60, 16  ;;  %v2426_v8 = vld [vmem:[%s2330_s12 + $0x24] sm:$0x1] }
  0x1d   : > { %v688_v9 = vor.u32 %v687_v59, %v683_v53  ;;  %v385_v11 = vshrl.u32 %v1916_v60, 16  ;;  %v1955_v15 = vcombine.low %v2421_v4, %v2426_v8  ;;  %v2433_v16 = vld [vmem:[%s2330_s12 + $0x28] sm:$0xf]  ;;  %v2436_v22 = vld [vmem:[%s2330_s12 + $0x2c] sm:$0x1]  ;;  %v1946_v27 = vcombine.low %v1882_v7, %v1874_v62 }
  0x1e   : > { %v382_v5 = vrot.slane %v380_v1, 1  ;;  %v389_v12 = vrot.slane %v387_v3, 1  ;;  %v2439_v23 = vld [vmem:[%s2330_s12 + $0x20] sm:$0xf]  ;;  %v2442_v26 = vld [vmem:[%s2330_s12 + $0x24] sm:$0x1]  ;;  %v1956_v29 = vcombine.low %v2433_v16, %v2436_v22 }
  0x1f   : > { %v2445_v28 = vld [vmem:[%s2330_s12 + $0x1c] sm:$0x1]  ;;  %v611_v32 = vrot.slane %v1945_v6, 1  ;;  %v1869_v34 = vld [vmem:[%s2330_s12 + $0x28] sm:$0xf]  ;;  %v692_v35 = vshll.u32 %v1955_v15, 16  ;;  %v1917_v36 = vcombine.low %v2439_v23, %v2442_v26 }
  0x20   : > { %421 = vrot.lane.b32.xlu1 %v376_v57, %s2262_s17  ;;  %731 = vrot.lane.b32.xlu0 %v681_v58, %s2262_s17  ;;  %v383_v10 = vor.u32 %v382_v5, %v378_v0  ;;  %v2451_v30 = vcombine.low %v2360_v20, %v2445_v28  ;;  %v390_v31 = vor.u32 %v389_v12, %v385_v11  ;;  %v2459_v37 = vld [vmem:[%s2330_s12 + $0x28] sm:$0xf]  ;;  %v2462_v38 = vld [vmem:[%s2330_s12 + $0x2c] sm:$0x1]  ;;  %v612_v20 = vrot.slane %v1946_v27, 1 }
  0x21   : > { %v1870_v39 = vld [vmem:[%s2330_s12 + $0x30] sm:$0xf]  ;;  %v690_v40 = vshrl.u32 %v1955_v15, 16  ;;  %v1933_v41 = vcombine.low %v1869_v34, %v1869_v34  ;;  %v699_v42 = vshll.u32 %v1956_v29, 16  ;;  %v1901_v43 = vld [vmem:[%s2330_s12 + $0x34] sm:$0x1]  ;;  %v1918_v50 = vcombine.low %v2459_v37, %v2462_v38 }
  0x22   : > { %v1909_v44 = vld [vmem:[%s2330_s12 + $0x30] sm:$0xe]  ;;  %v694_v46 = vrot.slane %v692_v35, 1  ;;  %v394_v49 = vshll.u32 %v1917_v36, 16  ;;  %v1902_v53 = vld [vmem:[%s2330_s12 + $0x3c] sm:$0x1]  ;;  %v1934_v60 = vcombine.low %v1870_v39, %v1870_v39 }
  0x23   : > { %v1965_v51 = vcombine.low %v1909_v44, %v1901_v43  ;;  %v1910_v55 = vld [vmem:[%s2330_s12 + $0x38] sm:$0xe]  ;;  %v697_v58 = vshrl.u32 %v1956_v29, 16  ;;  %v701_v61 = vrot.slane %v699_v42, 1  ;;  %v392_v62 = vshrl.u32 %v1917_v36, 16 }
  0x24   : > { %733 = vrot.lane.b32.xlu1 %v688_v9, %s2262_s17  ;;  %423 = vrot.lane.b32.xlu0 %v383_v10, %s2262_s17  ;;  %v1966_v57 = vcombine.low %v1910_v55, %v1902_v53  ;;  %v2478_v1 = vld [vmem:[%s2330_s12 + $0x2c] sm:$0x1]  ;;  %v695_v3 = vor.u32 %v694_v46, %v690_v40  ;;  %v396_v5 = vrot.slane %v394_v49, 1  ;;  %v401_v6 = vshll.u32 %v1918_v50, 16  ;;  %v1883_v7 = vld [vmem:[%s2330_s12 + $0x18] sm:$0xe] }
  0x25   : > { %v2473_v59 = vrot.slane %v1965_v51, 1  ;;  %v2484_v9 = vcombine.low %v1869_v34, %v2478_v1  ;;  %v2487_v11 = vld [vmem:[%s2330_s12 + $0x30] sm:$0xf]  ;;  %v2492_v15 = vld [vmem:[%s2330_s12 + $0x34] sm:$0x1]  ;;  %v399_v10 = vshrl.u32 %v1918_v50, 16  ;;  %v1947_v27 = vcombine.low %v1883_v7, %v2445_v28 }
  0x26   : > { %v2475_v0 = vrot.slane %v1966_v57, 1  ;;  %v1884_v29 = vld [vmem:[%s2330_s12 + $0x20] sm:$0xe]  ;;  %v397_v34 = vor.u32 %v396_v5, %v392_v62  ;;  %v403_v35 = vrot.slane %v401_v6, 1  ;;  %v1871_v36 = vld [vmem:[%s2330_s12 + $0x38] sm:$0xf] }
  0x27   : > { %2965 = vst [vmem:[#allocation3_spill] sm:$0xff] %v2473_v59  ;;  %v2506_v40 = vld [vmem:[%s2330_s12 + $0x38] sm:$0xf]  ;;  %v2509_v28 = vld [vmem:[%s2330_s12 + $0x30] sm:$0xf]  ;;  %v1948_v49 = vcombine.low %v1884_v29, %v2347_v14  ;;  %v1935_v29 = vcombine.low %v1871_v36, %v1871_v36 }
  0x28   : > { %425 = vrot.lane.b32.xlu1 %v390_v31, %s2262_s17  ;;  %619 = vrot.lane.b32.xlu0 %v611_v32, %s2262_s17  ;;  %2966 = vst [vmem:[#allocation4_spill] sm:$0xff] %v2475_v0  ;;  %v2497_v31 = vcombine.low %v1870_v39, %v2492_v15  ;;  %v702_v32 = vor.u32 %v701_v61, %v697_v58  ;;  %v2515_v39 = vld [vmem:[%s2330_s12 + $0x3c] sm:$0x1]  ;;  %v2518_v42 = vld [vmem:[%s2330_s12 + $0x40] sm:$0xf] }
  0x29   : > { %v2521_v44 = vcombine.low %v1871_v36, %v2515_v39  ;;  %v2524_v46 = vld [vmem:[%s2330_s12 + $0x44] sm:$0x1]  ;;  %v2531_v50 = vcombine.low %v2506_v40, %v1902_v53  ;;  %v2534_v51 = vld [vmem:[%s2330_s12 + $0x38] sm:$0xf]  ;;  %v404_v14 = vor.u32 %v403_v35, %v399_v10  ;;  %v613_v53 = vrot.slane %v1947_v27, 1 }
  0x2a   : > { %v2538_v55 = vcombine.low %v2518_v42, %v2524_v46  ;;  %v2151_v57 = vld [vmem:[%s2956_s1 + $0x164] ss:$8 sps:$4 sm:$0xff]   ;;  %v2153_v58 = vld [vmem:[%s2956_s1 + $0x30] ss:$8 sps:$4 sm:$0xff]   ;;  %v2154_v62 = vld [vmem:[%s2956_s1 + $0x160] ss:$8 sps:$4 sm:$0xff]  }
  0x2b   : > { %1503 = vmatprep.subr.bf16.mxu1 %v2151_v57  ;;  %v2155_v5 = vld [vmem:[%s2956_s1 + $0x24] ss:$8 sps:$4 sm:$0xff]   ;;  %v2157_v6 = vld [vmem:[%s2956_s1 + $0x154] ss:$8 sps:$4 sm:$0xff]   ;;  %v2159_v7 = vld [vmem:[%s2956_s1 + $0x20] ss:$8 sps:$4 sm:$0xff]  }
  0x2c   : > { %621 = vrot.lane.b32.xlu1 %v612_v20, %s2262_s17  ;;  %499 = vrot.lane.b32.xlu0 %v1933_v41, %s2262_s17  ;;  %v2503_v20 = vcombine.low %v2487_v11, %v1901_v43  ;;  %v2512_v41 = vld [vmem:[%s2330_s12 + $0x34] sm:$0x1]  ;;  %v2160_v10 = vld [vmem:[%s2956_s1 + $0x150] ss:$8 sps:$4 sm:$0xff]   ;;  %v614_v27 = vrot.slane %v1948_v49, 1 }
  0x2d   : > { %v2149_v43 = vld [vmem:[%s2956_s1 + $0x34] ss:$8 sps:$4 sm:$0xff]   ;;  %v1919_v61 = vcombine.low %v2509_v28, %v2512_v41  ;;  %1504 = vmatpush1.bf16.msra.mxu1 %v2154_v62  ;;  %v2163_v35 = vld [vmem:[%s2956_s1 + $0x144] ss:$8 sps:$4 sm:$0xff]   ;;  %v1885_v12 = vld [vmem:[%s2330_s12 + $0x28] sm:$0xe] }
  0x2e   : > { %1436 = vmatprep.subr.bf16.mxu0 %v2149_v43  ;;  %v704_v43 = vshrl.u32 %v2503_v20, 16  ;;  %v2585_v62 = vld [vmem:[%s2330_s12 + $0x44] sm:$0x1]  ;;  %1505 = vmatprep.subr.bf16.mxu1 %v2157_v6  ;;  %v2598_v6 = vld [vmem:[%s2330_s12 + $0x48] sm:$0xf] }
  0x2f   : > { %1437 = vmatpush1.bf16.msra.mxu0 %v2153_v58  ;;  %v408_v49 = vshll.u32 %v1919_v61, 16  ;;  %v2582_v58 = vld [vmem:[%s2330_s12 + $0x40] sm:$0xf]  ;;  %v2175_v0 = vld [vmem:[%s2956_s1 + $0x124] ss:$8 sps:$4 sm:$0xff]  }
  0x30   : > { %501 = vrot.lane.b32.xlu1 %v1934_v60, %s2262_s17  ;;  %735 = vrot.lane.b32.xlu0 %v695_v3, %s2262_s17  ;;  %v706_v60 = vshll.u32 %v2503_v20, 16  ;;  %v2555_v3 = vld [vmem:[%s2330_s12 + $0x3c] sm:$0x1]  ;;  %v2166_v20 = vld [vmem:[%s2956_s1 + $0x140] ss:$8 sps:$4 sm:$0xff]  }
  0x31   : > { %1438 = vmatprep.subr.bf16.mxu0 %v2155_v5  ;;  %v1920_v57 = vcombine.low %v2534_v51, %v2555_v3  ;;  %v2165_v5 = vld [vmem:[%s2956_s1 + $0x10] ss:$8 sps:$4 sm:$0xff]   ;;  %1506 = vmatpush1.bf16.msra.mxu1 %v2160_v10  ;;  %v410_v10 = vrot.slane %v408_v49, 1  ;;  %v1949_v49 = vcombine.low %v1885_v12, %v2478_v1  ;;  %v2178_v12 = vld [vmem:[%s2956_s1 + $0x120] ss:$8 sps:$4 sm:$0xff]  }
  0x32   : > { %v708_v36 = vrot.slane %v706_v60, 1  ;;  %v1936_v60 = vcombine.low %v2518_v42, %v2518_v42  ;;  %1507 = vmatprep.subr.bf16.mxu1 %v2163_v35  ;;  %v2171_v35 = vld [vmem:[%s2956_s1] ss:$8 sps:$4 sm:$0xff]   ;;  %v1886_v59 = vld [vmem:[%s2330_s12 + $0x30] sm:$0xe] }
  0x33   : > { %1439 = vmatpush1.bf16.msra.mxu0 %v2159_v7  ;;  %v415_v42 = vshll.u32 %v1920_v57, 16  ;;  %v2177_v1 = vld [vmem:[%s2956_s1 + $0xf0] ss:$8 sps:$4 sm:$0xff]  }
  0x34   : > { %737 = vrot.lane.b32.xlu1 %v702_v32, %s2262_s17  ;;  %427 = vrot.lane.b32.xlu0 %v397_v34, %s2262_s17  ;;  %v713_v32 = vshll.u32 %v2531_v50, 16  ;;  %v2161_v34 = vld [vmem:[%s2956_s1 + $0x14] ss:$8 sps:$4 sm:$0xff]   ;;  %v709_v7 = vor.u32 %v708_v36, %v704_v43  ;;  %v413_v36 = vshrl.u32 %v1920_v57, 16  ;;  %v2179_v57 = vld [vmem:[%s2956_s1 + $0xe4] ss:$8 sps:$4 sm:$0xff]  }
  0x35   : > { %1440 = vmatprep.subr.bf16.mxu0 %v2161_v34  ;;  %v2611_v34 = vld [vmem:[%s2330_s12 + $0x4c] sm:$0x1]  ;;  %1508 = vmatpush1.bf16.msra.mxu1 %v2166_v20  ;;  %v417_v20 = vrot.slane %v415_v42, 1  ;;  %v1887_v42 = vld [vmem:[%s2330_s12 + $0x38] sm:$0xe] }
  0x36   : > { %v715_v63 = vrot.slane %v713_v32, 1  ;;  %v1959_v32 = vcombine.low %v2582_v58, %v2585_v62 }
  0x37   : > { %1441 = vmatpush1.bf16.msra.mxu0 %v2165_v5 }
  0x38   : > { %429 = vrot.lane.b32.xlu1 %v404_v14, %s2262_s17  ;;  %623 = vrot.lane.b32.xlu0 %v613_v53, %s2262_s17  ;;  %v711_v14 = vshrl.u32 %v2531_v50, 16  ;;  %v406_v53 = vshrl.u32 %v1919_v61, 16  ;;  %v2167_v50 = vld [vmem:[%s2956_s1 + $0x4] ss:$8 sps:$4 sm:$0xff]   ;;  %v2169_v61 = vld [vmem:[%s2956_s1 + $0x134] ss:$8 sps:$4 sm:$0xff]  }
  0x39   : > { %1442 = vmatprep.subr.bf16.mxu0 %v2167_v50  ;;  %1509 = vmatprep.subr.bf16.mxu1 %v2169_v61  ;;  %v720_v54 = vshll.u32 %v1959_v32, 16  ;;  %v418_v50 = vor.u32 %v417_v20, %v413_v36  ;;  %v718_v61 = vshrl.u32 %v1959_v32, 16  ;;  %v2187_v32 = vld [vmem:[%s2956_s1 + $0x104] ss:$8 sps:$4 sm:$0xff]   ;;  %v1888_v36 = vld [vmem:[%s2330_s12 + $0x40] sm:$0xe] }
  0x3a   : > { %v716_v43 = vor.u32 %v715_v63, %v711_v14  ;;  %v411_v5 = vor.u32 %v410_v10, %v406_v53  ;;  %v1960_v63 = vcombine.low %v2598_v6, %v2611_v34  ;;  %v615_v14 = vrot.slane %v1949_v49, 1  ;;  %v2189_v49 = vld [vmem:[%s2956_s1 + $0xd0] ss:$8 sps:$4 sm:$0xff]   ;;  %v2191_v20 = vld [vmem:[%s2956_s1 + $0xc4] ss:$8 sps:$4 sm:$0xff]  }
  0x3b   : > { %1443 = vmatpush1.bf16.msra.mxu0 %v2171_v35  ;;  %v1950_v53 = vcombine.low %v1886_v59, %v2492_v15  ;;  %v2183_v59 = vld [vmem:[%s2956_s1 + $0xe0] ss:$8 sps:$4 sm:$0xff]  }
  0x3c   : > { %625 = vrot.lane.b32.xlu1 %v614_v27, %s2262_s17  ;;  %503 = vrot.lane.b32.xlu0 %v1935_v29, %s2262_s17  ;;  %v2172_v27 = vld [vmem:[%s2956_s1 + $0x130] ss:$8 sps:$4 sm:$0xff]   ;;  %v2173_v29 = vld [vmem:[%s2956_s1 + $0xf4] ss:$8 sps:$4 sm:$0xff]   ;;  %v727_v10 = vshll.u32 %v1960_v63, 16 }
  0x3d   : > { %1510 = vmatpush1.bf16.msra.mxu1 %v2172_v27  ;;  %1444 = vmatprep.subr.bf16.mxu0 %v2173_v29  ;;  %v616_v15 = vrot.slane %v1950_v53, 1  ;;  %v725_v27 = vshrl.u32 %v1960_v63, 16  ;;  %v2197_v53 = vld [vmem:[%s2956_s1 + $0xb4] ss:$8 sps:$4 sm:$0xff]  }
  0x3e   : > { %1511 = vmatprep.subr.bf16.mxu1 %v2175_v0  ;;  %v2184_v0 = vld [vmem:[%s2956_s1 + $0x110] ss:$8 sps:$4 sm:$0xff]   ;;  %v729_v29 = vrot.slane %v727_v10, 1  ;;  %v2205_v10 = vld [vmem:[%s2956_s1 + $0x1d4] ss:$8 sps:$4 sm:$0xff]  }
  0x3f   : > { %1445 = vmatpush2.bf16.msra.mxu0 %v2177_v1 }
  0x40   : > { %505 = vrot.lane.b32.xlu1 %v1936_v60, %s2262_s17  ;;  %739 = vrot.lane.b32.xlu0 %v709_v7, %s2262_s17  ;;  %v2181_v60 = vld [vmem:[%s2956_s1 + $0x114] ss:$8 sps:$4 sm:$0xff]   ;;  %v722_v7 = vrot.slane %v720_v54, 1  ;;  %v730_v63 = vor.u32 %v729_v29, %v725_v27  ;;  %v2223_v29 = vld [vmem:[%s2956_s1 + $0x80] ss:$8 sps:$4 sm:$0xff]  }
  0x41   : > { %1512 = vmatpush1.bf16.msra.mxu1 %v2178_v12  ;;  %1446 = vmatprep.subr.bf16.mxu0 %v2179_v57  ;;  %v2185_v54 = vld [vmem:[%s2956_s1 + $0xd4] ss:$8 sps:$4 sm:$0xff]   ;;  %v1952_v12 = vcombine.low %v1888_v36, %v2524_v46  ;;  %v2195_v57 = vld [vmem:[%s2956_s1 + $0xc0] ss:$8 sps:$4 sm:$0xff]   ;;  %v2199_v46 = vld [vmem:[%s2956_s1 + $0x1e4] ss:$8 sps:$4 sm:$0xff]  }
  0x42   : > { %1513 = vmatprep.subr.bf16.mxu1 %v2181_v60  ;;  %v723_v35 = vor.u32 %v722_v7, %v718_v61  ;;  %v2202_v61 = vld [vmem:[%s2956_s1 + $0x1e0] ss:$8 sps:$4 sm:$0xff]   ;;  %v2203_v7 = vld [vmem:[%s2956_s1 + $0xa4] ss:$8 sps:$4 sm:$0xff]   ;;  %v2221_v27 = vld [vmem:[%s2956_s1 + $0x1b4] ss:$8 sps:$4 sm:$0xff]  }
  0x43   : > { %1447 = vmatpush2.bf16.msra.mxu0 %v2183_v59  ;;  %v618_v60 = vrot.slane %v1952_v12, 1  ;;  %v2209_v59 = vld [vmem:[%s2956_s1 + $0x1d0] ss:$8 sps:$4 sm:$0xff]   ;;  %v1907_v36 = vld [vmem:[%s2330_s12 + $0x20] sm:$0xe] }
  0x44   : > { %741 = vrot.lane.b32.xlu1 %v716_v43, %s2262_s17  ;;  %431 = vrot.lane.b32.xlu0 %v411_v5, %s2262_s17  ;;  %v1951_v43 = vcombine.low %v1887_v42, %v2515_v39  ;;  %v2190_v5 = vld [vmem:[%s2956_s1 + $0x100] ss:$8 sps:$4 sm:$0xff]   ;;  %v2193_v39 = vld [vmem:[%s2956_s1 + $0x1f4] ss:$8 sps:$4 sm:$0xff]  }
  0x45   : > { %1514 = vmatpush1.bf16.msra.mxu1 %v2184_v0  ;;  %1448 = vmatprep.subr.bf16.mxu0 %v2185_v54  ;;  %v2208_v42 = vld [vmem:[%s2956_s1 + $0xa0] ss:$8 sps:$4 sm:$0xff]   ;;  %v2210_v0 = vld [vmem:[%s2956_s1 + $0x94] ss:$8 sps:$4 sm:$0xff]   ;;  %v2214_v54 = vld [vmem:[%s2956_s1 + $0x90] ss:$8 sps:$4 sm:$0xff]  }
  0x46   : > { %1515 = vmatprep.subr.bf16.mxu1 %v2187_v32  ;;  %v617_v1 = vrot.slane %v1951_v43, 1  ;;  %v2215_v32 = vld [vmem:[%s2956_s1 + $0x1c0] ss:$8 sps:$4 sm:$0xff]   ;;  %v2224_v43 = vld [vmem:[%s2956_s1 + $0x1b0] ss:$8 sps:$4 sm:$0xff]  }
  0x47   : > { %1449 = vmatpush2.bf16.msra.mxu0 %v2189_v49  ;;  %v1908_v49 = vld [vmem:[%s2330_s12 + $0x28] sm:$0xe] }
  0x48   : > { %433 = vrot.lane.b32.xlu1 %v418_v50, %s2262_s17  ;;  %627 = vrot.lane.b32.xlu0 %v615_v14, %s2262_s17  ;;  %v2196_v14 = vld [vmem:[%s2956_s1 + $0x1f0] ss:$8 sps:$4 sm:$0xff]   ;;  %v1964_v12 = vcombine.low %v1908_v49, %v2436_v22  ;;  %v2228_v22 = vld [vmem:[%s2956_s1 + $0x194] ss:$8 sps:$4 sm:$0xff]  }
  0x49   : > { %1516 = vmatpush1.bf16.msra.mxu1 %v2190_v5  ;;  %1450 = vmatprep.subr.bf16.mxu0 %v2191_v20  ;;  %v2201_v50 = vld [vmem:[%s2956_s1 + $0xb0] ss:$8 sps:$4 sm:$0xff]   ;;  %v1963_v5 = vcombine.low %v1907_v36, %v2426_v8  ;;  %v1911_v20 = vld [vmem:[%s2330_s12 + $0x40] sm:$0xe] }
  0x4a   : > { %1517 = vmatprep.subr.bf16.mxu1 %v2193_v39  ;;  %v1912_v39 = vld [vmem:[%s2330_s12 + $0x48] sm:$0xe]  ;;  %v2751_v8 = vrot.slane %v1964_v12, 1 }
  0x4b   : > { %1451 = vmatpush2.bf16.msra.mxu0 %v2195_v57  ;;  %v1967_v57 = vcombine.low %v1911_v20, %v2585_v62 }
  0x4c   : > { %629 = vrot.lane.b32.xlu1 %v616_v15, %s2262_s17  ;;  %743 = vrot.lane.b32.xlu0 %v723_v35, %s2262_s17  ;;  %v2212_v15 = vld [vmem:[%s2956_s1 + $0x1c4] ss:$8 sps:$4 sm:$0xff]  }
  0x4d   : > { %1518 = vmatpush2.bf16.msra.mxu1 %v2196_v14  ;;  %1452 = vmatprep.subr.bf16.mxu0 %v2197_v53  ;;  %v2219_v35 = vld [vmem:[%s2956_s1 + $0x84] ss:$8 sps:$4 sm:$0xff]   ;;  %v1968_v14 = vcombine.low %v1912_v39, %v2611_v34  ;;  %v2749_v53 = vrot.slane %v1963_v5, 1 }
  0x4e   : > { %1519 = vmatprep.subr.bf16.mxu1 %v2199_v46  ;;  %v2753_v46 = vrot.slane %v1967_v57, 1 }
  0x4f   : > { %1453 = vmatpush2.bf16.msra.mxu0 %v2201_v50  ;;  %v2227_v50 = vld [vmem:[%s2956_s1 + $0x1a0] ss:$8 sps:$4 sm:$0xff]   ;;  %v1978_v62 = vcombine.low %v2749_v53, %v2751_v8 }
  0x50   : > { %745 = vrot.lane.b32.xlu1 %v730_v63, %s2262_s17  ;;  %631 = vrot.lane.b32.xlu0 %v617_v1, %s2262_s17  ;;  %v2225_v63 = vld [vmem:[%s2956_s1 + $0x1a4] ss:$8 sps:$4 sm:$0xff]   ;;  %v2238_v1 = vld [vmem:[%s2956_s1 + $0x234] ss:$8 sps:$4 sm:$0xff]  }
  0x51   : > { %1520 = vmatpush2.bf16.msra.mxu1 %v2202_v61  ;;  %1454 = vmatprep.subr.bf16.mxu0 %v2203_v7  ;;  %v2230_v61 = vld [vmem:[%s2956_s1 + $0x190] ss:$8 sps:$4 sm:$0xff]   ;;  %v2231_v7 = vld [vmem:[%s2956_s1 + $0x184] ss:$8 sps:$4 sm:$0xff]  }
  0x52   : > { %1521 = vmatprep.subr.bf16.mxu1 %v2205_v10  ;;  %v2233_v10 = vld [vmem:[%s2956_s1 + $0x180] ss:$8 sps:$4 sm:$0xff]  }
  0x53   : > { %1455 = vmatpush2.bf16.msra.mxu0 %v2208_v42  ;;  %v265_v42 = vld [vmem:[%s2330_s12] sm:$0xe] }
  0x54   : > { %633 = vrot.lane.b32.xlu1 %v618_v60, %s2262_s17  ;;  %1456 = vmatprep.subr.bf16.mxu0 %v2210_v0  ;;  %v2755_v60 = vrot.slane %v1968_v14, 1  ;;  %v1921_v0 = vcombine.low %v265_v42, %v2357_v19  ;;  %v534_v14 = vshll.u32 %v2344_v13, 16  ;;  %v2236_v42 = vld [vmem:[%s2956_s1 + $0x230] ss:$8 sps:$4 sm:$0xff]  }
  0x55   : > { %1522 = vmatpush2.bf16.msra.mxu1 %v2209_v59  ;;  %v266_v59 = vld [vmem:[%s2330_s12 + $0x8] sm:$0xe] }
  0x56   : > { %1523 = vmatprep.subr.bf16.mxu1 %v2212_v15  ;;  %v1988_v34 = vcombine.low %v2753_v46, %v2755_v60  ;;  %v1922_v15 = vcombine.low %v266_v59, %v2370_v24 }
  0x57   : > { %1457 = vmatpush2.bf16.msra.mxu0 %v2214_v54  ;;  %v268_v54 = vld [vmem:[%s2330_s12 + $0x18] sm:$0xe] }
  0x58   : > { %1458 = vmatprep.subr.bf16.mxu0 %v2219_v35  ;;  %v460_v36 = vrot.slane %v1922_v15, 1  ;;  %v532_v15 = vshrl.u32 %v2344_v13, 16  ;;  %v2239_v13 = vld [vmem:[%s2956_s1 + $0x220] ss:$8 sps:$4 sm:$0xff]  }
  0x59   : > { %1524 = vmatpush2.bf16.msra.mxu1 %v2215_v32  ;;  %v267_v32 = vld [vmem:[%s2330_s12 + $0x10] sm:$0xe] }
  0x5a   : > { %1525 = vmatprep.subr.bf16.mxu1 %v2221_v27  ;;  %v1924_v27 = vcombine.low %v268_v54, %v2408_v56  ;;  %v536_v54 = vrot.slane %v534_v14, 1  ;;  %v2247_v14 = vld [vmem:[%s2956_s1 + $0x200] ss:$8 sps:$4 sm:$0xff]  }
  0x5b   : > { %1459 = vmatpush2.bf16.msra.mxu0 %v2223_v29  ;;  %v1923_v29 = vcombine.low %v267_v32, %v2398_v48 }
  0x5c   : > { %1582 = vmatprep.subr.bf16.mxu0 %v2238_v1  ;;  %v462_v20 = vrot.slane %v1924_v27, 1 }
  0x5d   : > { %1526 = vmatpush2.bf16.msra.mxu1 %v2224_v43  ;;  %v459_v43 = vrot.slane %v1921_v0, 1  ;;  %v461_v39 = vrot.slane %v1923_v29, 1  ;;  %v2241_v0 = vld [vmem:[%s2956_s1 + $0x224] ss:$8 sps:$4 sm:$0xff]   ;;  %v539_v29 = vshrl.u32 %v2418_v2, 16 }
  0x5e   : > { %1527 = vmatprep.subr.bf16.mxu1 %v2225_v63 }
  0x61   : > { %1528 = vmatpush2.bf16.msra.mxu1 %v2227_v50 }
  0x62   : > { %1529 = vmatprep.subr.bf16.mxu1 %v2228_v22 }
  0x65   : > { %1530 = vmatpush2.bf16.msra.mxu1 %v2230_v61  ;;  %v541_v61 = vshll.u32 %v2418_v2, 16 }
  0x66   : > { %1531 = vmatprep.subr.bf16.mxu1 %v2231_v7 }
  0x69   : > { %1532 = vmatpush2.bf16.msra.mxu1 %v2233_v10 }
  0x6a   : > { %2070 = vmatprep.subr.bf16.mxu1 %v2238_v1 }
  0x86   : > { %v492_v35 = vpop.permute.xlu0 %491  ;;  %v498_v49 = vpop.permute.xlu1 %497 }
  0x87   : > { %v806_v63 = vsel %vm779_vm0, %v459_v43, %v492_v35  ;;  %v815_v57 = vsel %vm779_vm0, %v462_v20, %v498_v49  ;;  %v543_v43 = vrot.slane %v541_v61, 1  ;;  %v270_v49 = vld [vmem:[%s2330_s12 + $0x28] sm:$0xe]  ;;  %v537_v20 = vor.u32 %v536_v54, %v532_v15 }
  0x8a   : > { %v494_v5 = vpop.permute.xlu0 %493 }
  0x8b   : > { %v809_v19 = vsel %vm779_vm0, %v460_v36, %v494_v5 }
  0x8c   : > { %v1970_v1 = vcombine.low %v806_v63, %v809_v19  ;;  %v544_v19 = vor.u32 %v543_v43, %v539_v29  ;;  %v271_v29 = vld [vmem:[%s2330_s12 + $0x30] sm:$0xe]  ;;  %v553_v43 = vshrl.u32 %v2354_v18, 16 }
  0x8e   : > { %v420_v24 = vpop.permute.xlu1 %419  ;;  %v496_v12 = vpop.permute.xlu0 %495  ;;  %1460 = vmatprep.mubr.bf16.mxu0 %v1970_v1  ;;  %v1926_v1 = vcombine.low %v270_v49, %v2462_v38 }
  0x8f   : > { %v812_v56 = vsel %vm779_vm0, %v461_v39, %v496_v12  ;;  %v782_v7 = vsel %vm779_vm0, %v2351_v17, %v420_v24  ;;  %v2244_v24 = vld [vmem:[%s2956_s1 + $0x210] ss:$8 sps:$4 sm:$0xff]  }
  0x90   : > { %v1975_v48 = vcombine.low %v812_v56, %v815_v57  ;;  %v464_v38 = vrot.slane %v1926_v1, 1 }
  0x92   : > { %v422_v50 = vpop.permute.xlu1 %421  ;;  %v732_v22 = vpop.permute.xlu0 %731 }
  0x93   : > { %v785_v10 = vsel %vm779_vm0, %v2363_v21, %v422_v50  ;;  %v854_v32 = vsel %vm779_vm0, %v2373_v25, %v732_v22  ;;  %v269_v21 = vld [vmem:[%s2330_s12 + $0x20] sm:$0xe]  ;;  %v2246_v25 = vld [vmem:[%s2956_s1 + $0x214] ss:$8 sps:$4 sm:$0xff]   ;;  %v548_v22 = vshll.u32 %v2451_v30, 16 }
  0x94   : > { %v1969_v59 = vcombine.low %v782_v7, %v785_v10 }
  0x96   : > { %1461 = vmatmul.mubr.bf16.vlgmr.msra.gmra.mxu0 %v1969_v59  ;;  %v734_v17 = vpop.permute.xlu1 %733  ;;  %v424_v35 = vpop.permute.xlu0 %423  ;;  %v555_v59 = vshll.u32 %v2354_v18, 16 }
  0x97   : > { %1470 = vmatprep.mubr.bf16.mxu0 %v1975_v48  ;;  %v857_v27 = vsel %vm779_vm0, %v2384_v33, %v734_v17  ;;  %1583 = vmatpush1.bf16.msra.mxu0 %v2236_v42  ;;  %v788_v5 = vsel %vm779_vm0, %v2395_v47, %v424_v35  ;;  %v1925_v33 = vcombine.low %v269_v21, %v2442_v26  ;;  %v2249_v47 = vld [vmem:[%s2956_s1 + $0x204] ss:$8 sps:$4 sm:$0xff]   ;;  %v546_v17 = vshrl.u32 %v2451_v30, 16 }
  0x98   : > { %v1972_v36 = vcombine.low %v854_v32, %v857_v27  ;;  %1584 = vmatprep.subr.bf16.mxu0 %v2241_v0  ;;  %v550_v35 = vrot.slane %v548_v22, 1  ;;  %v1927_v30 = vcombine.low %v271_v29, %v2512_v41  ;;  %v567_v22 = vshrl.u32 %v2497_v31, 16 }
  0x99   : > { %v463_v57 = vrot.slane %v1925_v33, 1 }
  0x9a   : > { %1533 = vmatprep.mubr.bf16.mxu1 %v1972_v36  ;;  %v426_v2 = vpop.permute.xlu1 %425  ;;  %v620_v39 = vpop.permute.xlu0 %619  ;;  %v557_v36 = vrot.slane %v555_v59, 1 }
  0x9b   : > { %v791_v63 = vsel %vm779_vm0, %v2401_v52, %v426_v2  ;;  %1585 = vmatpush1.bf16.msra.mxu0 %v2239_v13  ;;  %v830_v26 = vsel %vm779_vm0, %v537_v20, %v620_v39 }
  0x9c   : > { %v1974_v12 = vcombine.low %v788_v5, %v791_v63  ;;  %1586 = vmatprep.subr.bf16.mxu0 %v2246_v25  ;;  %v272_v5 = vld [vmem:[%s2330_s12 + $0x38] sm:$0xe]  ;;  %v558_v2 = vor.u32 %v557_v36, %v553_v43  ;;  %v2263_v43 = vmov 0   ;;  %v581_v36 = vshrl.u32 %v2538_v55, 16  ;;  %s2068_s12 = sshll.u32 %s2973_s19, 6 }
  0x9d   : > { %v1928_v39 = vcombine.low %v272_v5, %v2555_v3  ;;  %s2907_s20 = scalar_lea.vmem %s2958_s3, %s2068_s12  ;;  %s2918_s24 = scalar_lea.vmem %s2959_s4, %s2068_s12 }
  0x9e   : > { %1471 = vmatmul.mubr.bf16.gmra.mxu0 %v1974_v12  ;;  %v622_v56 = vpop.permute.xlu1 %621  ;;  %v500_v52 = vpop.permute.xlu0 %499  ;;  %v562_v12 = vshll.u32 %v2484_v9, 16 }
  0x9f   : > { %v833_v48 = vsel %vm779_vm0, %v544_v19, %v622_v56  ;;  %1587 = vmatpush1.bf16.msra.mxu0 %v2244_v24  ;;  %v818_v61 = vsel %vm779_vm0, %v463_v57, %v500_v52  ;;  %v466_v19 = vrot.slane %v1928_v39, 1  ;;  %v560_v52 = vshrl.u32 %v2484_v9, 16 }
  0xa0   : > { %v1971_v50 = vcombine.low %v830_v26, %v833_v48  ;;  %1588 = vmatprep.subr.bf16.mxu0 %v2249_v47  ;;  %v564_v48 = vrot.slane %v562_v12, 1 }
  0xa2   : > { %1534 = vmatmul.mubr.bf16.vlgmr.msra.gmra.mxu1 %v1971_v50  ;;  %v502_v7 = vpop.permute.xlu1 %501  ;;  %v736_v10 = vpop.permute.xlu0 %735 }
  0xa3   : > { %v821_v15 = vsel %vm779_vm0, %v464_v38, %v502_v7  ;;  %2074 = vmatpush1.bf16.msra.mxu1 %v2236_v42  ;;  %1589 = vmatpush1.bf16.msra.mxu0 %v2247_v14  ;;  %v860_v32 = vsel %vm779_vm0, %v2421_v4, %v736_v10  ;;  %v576_v10 = vshll.u32 %v2521_v44, 16 }
  0xa4   : > { %v1980_v54 = vcombine.low %v818_v61, %v821_v15  ;;  %2071 = vmatprep.subr.bf16.mxu1 %v2241_v0  ;;  %v551_v0 = vor.u32 %v550_v35, %v546_v17  ;;  %v565_v15 = vor.u32 %v564_v48, %v560_v52  ;;  %v574_v35 = vshrl.u32 %v2521_v44, 16 }
  0xa6   : > { %1480 = vmatprep.mubr.bf16.mxu0 %v1980_v54  ;;  %v738_v21 = vpop.permute.xlu1 %737  ;;  %v428_v27 = vpop.permute.xlu0 %427  ;;  %v583_v54 = vshll.u32 %v2538_v55, 16 }
  0xa7   : > { %v863_v42 = vsel %vm779_vm0, %v2433_v16, %v738_v21  ;;  %2075 = vmatpush1.bf16.msra.mxu1 %v2239_v13  ;;  %v794_v4 = vsel %vm779_vm0, %v2439_v23, %v428_v27  ;;  %v578_v21 = vrot.slane %v576_v10, 1 }
  0xa8   : > { %v1977_v49 = vcombine.low %v860_v32, %v863_v42  ;;  %2072 = vmatprep.subr.bf16.mxu1 %v2246_v25  ;;  %v465_v25 = vrot.slane %v1927_v30, 1  ;;  %v585_v42 = vrot.slane %v583_v54, 1 }
  0xa9   : > { %v579_v5 = vor.u32 %v578_v21, %v574_v35 }
  0xaa   : > { %1543 = vmatprep.mubr.bf16.mxu1 %v1977_v49  ;;  %v430_v20 = vpop.permute.xlu1 %429  ;;  %v624_v33 = vpop.permute.xlu0 %623  ;;  %v586_v30 = vor.u32 %v585_v42, %v581_v36 }
  0xab   : > { %v797_v18 = vsel %vm779_vm0, %v2459_v37, %v430_v20  ;;  %2076 = vmatpush1.bf16.msra.mxu1 %v2244_v24  ;;  %v836_v13 = vsel %vm779_vm0, %v551_v0, %v624_v33 }
  0xac   : > { %v1979_v16 = vcombine.low %v794_v4, %v797_v18  ;;  %2073 = vmatprep.subr.bf16.mxu1 %v2249_v47  ;;  %v569_v47 = vshll.u32 %v2497_v31, 16  ;;  %v2967_v18 = vld [vmem:[#allocation2_spill] sm:$0xff] }
  0xad   : > { %v2968_v55 = vcombine.low %v2392_v45, %v2967_v18 }
  0xae   : > { %1481 = vmatmul.mubr.bf16.gmra.mxu0 %v1979_v16  ;;  %v626_v23 = vpop.permute.xlu1 %625  ;;  %v504_v63 = vpop.permute.xlu0 %503  ;;  %v571_v61 = vrot.slane %v569_v47, 1  ;;  %v2970_v16 = vld [vmem:[#allocation4_spill] sm:$0xff] }
  0xaf   : > { %v839_v41 = vsel %vm779_vm0, %v558_v2, %v626_v23  ;;  %2077 = vmatpush1.bf16.msra.mxu1 %v2247_v14  ;;  %v824_v37 = vsel %vm779_vm0, %v465_v25, %v504_v63 }
  0xb0   : > { %v1976_v1 = vcombine.low %v836_v13, %v839_v41  ;;  %v572_v17 = vor.u32 %v571_v61, %v567_v22 }
  0xb2   : > { %1544 = vmatmul.mubr.bf16.gmra.mxu1 %v1976_v1  ;;  %v506_v3 = vpop.permute.xlu1 %505  ;;  %v740_v24 = vpop.permute.xlu0 %739 }
  0xb3   : > { %v827_v26 = vsel %vm779_vm0, %v466_v19, %v506_v3  ;;  %v866_v56 = vsel %vm779_vm0, %v2487_v11, %v740_v24 }
  0xb4   : > { %v1985_v57 = vcombine.low %v824_v37, %v827_v26 }
  0xb6   : > { %1490 = vmatprep.mubr.bf16.mxu0 %v1985_v57  ;;  %v742_v38 = vpop.permute.xlu1 %741  ;;  %v432_v14 = vpop.permute.xlu0 %431 }
  0xb7   : > { %v869_v50 = vsel %vm779_vm0, %v2506_v40, %v742_v38  ;;  %v800_v59 = vsel %vm779_vm0, %v2509_v28, %v432_v14 }
  0xb8   : > { %v1982_v7 = vcombine.low %v866_v56, %v869_v50 }
  0xba   : > { %1553 = vmatprep.mubr.bf16.mxu1 %v1982_v7  ;;  %v434_v11 = vpop.permute.xlu1 %433  ;;  %v628_v9 = vpop.permute.xlu0 %627 }
  0xbb   : > { %v803_v32 = vsel %vm779_vm0, %v2534_v51, %v434_v11  ;;  %v842_v31 = vsel %vm779_vm0, %v565_v15, %v628_v9  ;;  %v2912_v9 = vld [vmem:[%s2957_s2] ss:$0 sm:$0xff] }
  0xbc   : > { %v1984_v40 = vcombine.low %v800_v59, %v803_v32 }
  0xbe   : > { %1491 = vmatmul.mubr.bf16.gmra.mxu0 %v1984_v40  ;;  %v630_v27 = vpop.permute.xlu1 %629  ;;  %v744_v29 = vpop.permute.xlu0 %743 }
  0xbf   : > { %v845_v28 = vsel %vm779_vm0, %v572_v17, %v630_v27  ;;  %1606 = vmatprep.mubr.bf16.mxu0 %v2263_v43  ;;  %v872_v51 = vsel %vm779_vm0, %v2582_v58, %v744_v29 }
  0xc0   : > { %v1981_v49 = vcombine.low %v842_v31, %v845_v28 }
  0xc2   : > { %1554 = vmatmul.mubr.bf16.gmra.mxu1 %v1981_v49  ;;  %v746_v4 = vpop.permute.xlu1 %745  ;;  %v632_v0 = vpop.permute.xlu0 %631 }
  0xc3   : > { %v875_v44 = vsel %vm779_vm0, %v2598_v6, %v746_v4  ;;  %v848_v33 = vsel %vm779_vm0, %v579_v5, %v632_v0  ;;  %v2969_v6 = vld [vmem:[#allocation3_spill] sm:$0xff] }
  0xc4   : > { %v1987_v20 = vcombine.low %v872_v51, %v875_v44  ;;  %v2971_v13 = vcombine.low %v2969_v6, %v2970_v16 }
  0xc6   : > { %1563 = vmatprep.mubr.bf16.mxu1 %v1987_v20  ;;  %2061 = vmatmul.mubr.msk.bf16.vlgmr.msra.gmra.mxu0 %vm779_vm0, %v2968_v55  ;;  %v634_v2 = vpop.permute.xlu1 %633 }
  0xc7   : > { %v851_v58 = vsel %vm779_vm0, %v586_v30, %v634_v2  ;;  %1616 = vmatprep.mubr.bf16.mxu0 %v2263_v43 }
  0xc8   : > { %v1986_v39 = vcombine.low %v848_v33, %v851_v58 }
  0xca   : > { %1564 = vmatmul.mubr.bf16.gmra.mxu1 %v1986_v39 }
  0xcb   : > { %1626 = vmatprep.mubr.bf16.mxu1 %v2263_v43 }
  0xce   : > { %2062 = vmatmul.mubr.msk.bf16.gmra.mxu0 %vm779_vm0, %v1978_v62 }
  0xd2   : > { %2063 = vmatmul.mubr.msk.bf16.vlgmr.msra.gmra.mxu1 %vm779_vm0, %v2971_v13 }
  0xd3   : > { %1636 = vmatprep.mubr.bf16.mxu1 %v2263_v43 }
  0xda   : > { %2064 = vmatmul.mubr.msk.bf16.gmra.mxu1 %vm779_vm0, %v1988_v34 }
 0x156   : > { %v1462_v45 = vpop.f32.mrf.mxu0 }
 0x158   : > { %v1464_v25 = vpop.f32.mrf.mxu0 }
 0x15a   : > { %v1466_v23 = vpop.f32.mrf.mxu0 }
 0x15c   : > { %v1468_v63 = vpop.f32.mrf.mxu0 }
 0x15e   : > { %v1472_v41 = vpop.f32.mrf.mxu0 }
 0x160   : > { %v1474_v19 = vpop.f32.mrf.mxu0 }
 0x162   : > { %v1535_v53 = vpop.f32.mrf.mxu1  ;;  %v1476_v8 = vpop.f32.mrf.mxu0 }
 0x163   : > { %v1536_v22 = vadd.f32 %v1535_v53, %v1462_v45 }
 0x164   : > { %v1537_v62 = vpop.f32.mrf.mxu1  ;;  %v1478_v1 = vpop.f32.mrf.mxu0 }
 0x165   : > { %v1538_v10 = vadd.f32 %v1537_v62, %v1464_v25 }
 0x166   : > { %v1539_v12 = vpop.f32.mrf.mxu1 }
 0x167   : > { %v1540_v54 = vadd.f32 %v1539_v12, %v1466_v23 }
 0x168   : > { %v1541_v3 = vpop.f32.mrf.mxu1 }
 0x169   : > { %v1542_v31 = vadd.f32 %v1541_v3, %v1468_v63 }
 0x16e   : > { %v1482_v37 = vpop.f32.mrf.mxu0 }
 0x170   : > { %v1484_v24 = vpop.f32.mrf.mxu0 }
 0x172   : > { %v1545_v47 = vpop.f32.mrf.mxu1  ;;  %v1486_v26 = vpop.f32.mrf.mxu0 }
 0x173   : > { %v1546_v28 = vadd.f32 %v1545_v47, %v1472_v41 }
 0x174   : > { %v1547_v46 = vpop.f32.mrf.mxu1  ;;  %v2893_v60 = vpop.f32.mrf.mxu0 }
 0x175   : > { %v1548_v51 = vadd.f32 %v1547_v46, %v1474_v19 }
 0x176   : > { %v1549_v34 = vpop.f32.mrf.mxu1 }
 0x177   : > { %v1550_v0 = vadd.f32 %v1549_v34, %v1476_v8 }
 0x178   : > { %v1551_v56 = vpop.f32.mrf.mxu1 }
 0x179   : > { %v1552_v58 = vadd.f32 %v1551_v56, %v1478_v1 }
 0x17e   : > { %v2895_v57 = vpop.f32.mrf.mxu0 }
 0x180   : > { %v2897_v52 = vpop.f32.mrf.mxu0 }
 0x182   : > { %v2899_v48 = vpop.f32.mrf.mxu0  ;;  %v1555_v38 = vpop.f32.mrf.mxu1 }
 0x183   : > { %v1556_v33 = vadd.f32 %v1555_v38, %v1482_v37 }
 0x184   : > { %v2902_v14 = vpop.f32.mrf.mxu0  ;;  %v1557_v50 = vpop.f32.mrf.mxu1 }
 0x185   : > { %v1558_v63 = vadd.f32 %v1557_v50, %v1484_v24 }
 0x186   : > { %v1559_v61 = vpop.f32.mrf.mxu1  ;;  %v1608_v7 = vpop.f32.mrf.mxu0 }
 0x187   : > { %v1609_v59 = vadd.f32 %v1608_v7, %v1536_v22  ;;  %v1560_v41 = vadd.f32 %v1559_v61, %v1486_v26 }
 0x188   : > { %v1561_v15 = vpop.f32.mrf.mxu1  ;;  %v1610_v11 = vpop.f32.mrf.mxu0 }
 0x189   : > { %1662 = vst [vmem:[%s2907_s20] sm:$0xff] %v1609_v59  ;;  %v1611_v32 = vadd.f32 %v1610_v11, %v1538_v10  ;;  %v1691_v44 = vmul.f32 %v1609_v59, %v1609_v59  ;;  %v1562_v47 = vadd.f32 %v1561_v15, %v2893_v60 }
 0x18a   : > { %v1565_v17 = vpop.f32.mrf.mxu1  ;;  %v1612_v40 = vpop.f32.mrf.mxu0 }
 0x18b   : > { %v1654_v35 = vadd.f32 %v2912_v9, %v1611_v32  ;;  %v1613_v21 = vadd.f32 %v1612_v40, %v1540_v54  ;;  %v1566_v38 = vadd.f32 %v1565_v17, %v2895_v57 }
 0x18c   : > { %v1567_v27 = vpop.f32.mrf.mxu1  ;;  %v1614_v29 = vpop.f32.mrf.mxu0 }
 0x18d   : > { %1670 = vst [vmem:[%s2918_s24] sm:$0xff] %v1654_v35  ;;  %1663 = vst [vmem:[%s2907_s20 + $0x8] sm:$0xff] %v1613_v21  ;;  %v1615_v43 = vadd.f32 %v1614_v29, %v1542_v31  ;;  %v1692_v36 = vmul.f32 %v1613_v21, %v1613_v21  ;;  %v1678_v18 = vadd.f32 %v1613_v21, %v1609_v59 }
 0x18e   : > { %v1569_v42 = vpop.f32.mrf.mxu1  ;;  %v1618_v49 = vpop.f32.mrf.mxu0  ;;  %v1568_v7 = vadd.f32 %v1567_v27, %v2897_v52 }
 0x18f   : > { %v1655_v5 = vadd.f32 %v2912_v9, %v1615_v43  ;;  %v1619_v4 = vadd.f32 %v1618_v49, %v1546_v28  ;;  %v1699_v39 = vadd.f32 %v1692_v36, %v1691_v44  ;;  %v1570_v57 = vadd.f32 %v1569_v42, %v2899_v48 }
 0x190   : > { %v1571_v30 = vpop.f32.mrf.mxu1  ;;  %v1620_v20 = vpop.f32.mrf.mxu0 }
 0x191   : > { %1671 = vst [vmem:[%s2918_s24 + $0x8] sm:$0xff] %v1655_v5  ;;  %1664 = vst [vmem:[%s2907_s20 + $0x10] sm:$0xff] %v1619_v4  ;;  %v1693_v55 = vmul.f32 %v1619_v4, %v1619_v4  ;;  %v1621_v2 = vadd.f32 %v1620_v20, %v1548_v51  ;;  %v1679_v13 = vadd.f32 %v1678_v18, %v1619_v4 }
 0x192   : > { %v1622_v6 = vpop.f32.mrf.mxu0  ;;  %v1628_v16 = vpop.f32.mrf.mxu1  ;;  %v1572_v31 = vadd.f32 %v1571_v30, %v2902_v14  ;;  %v2264_v30 = vmov 1966171168  }
 0x193   : > { %v1656_v45 = vadd.f32 %v2912_v9, %v1621_v2  ;;  %v1623_v25 = vadd.f32 %v1622_v6, %v1550_v0  ;;  %v1629_v23 = vadd.f32 %v1628_v16, %v1556_v33  ;;  %v1700_v8 = vadd.f32 %v1699_v39, %v1693_v55 }
 0x194   : > { %v1624_v19 = vpop.f32.mrf.mxu0  ;;  %v1630_v53 = vpop.f32.mrf.mxu1  ;;  %v1716_v20 = vunpack.c.l.s4 %v2264_v30  ;;  %v1718_v33 = vlaneseq }
 0x195   : > { %1672 = vst [vmem:[%s2918_s24 + $0x10] sm:$0xff] %v1656_v45  ;;  %1665 = vst [vmem:[%s2907_s20 + $0x18] sm:$0xff] %v1623_v25  ;;  %v1680_v62 = vadd.f32 %v1679_v13, %v1623_v25  ;;  %v1694_v1 = vmul.f32 %v1623_v25, %v1623_v25  ;;  %v1625_v12 = vadd.f32 %v1624_v19, %v1552_v58 }
 0x196   : > { %1666 = vst [vmem:[%s2907_s20 + $0x20] sm:$0xff] %v1629_v23  ;;  %v1631_v37 = vadd.f32 %v1630_v53, %v1558_v63  ;;  %v1632_v3 = vpop.f32.mrf.mxu1  ;;  %v1695_v22 = vmul.f32 %v1629_v23, %v1629_v23  ;;  %v1717_v39 = vunpack.c.0.s8 %v1716_v20  ;;  %v1719_v6 = vshrl.u32 %v1718_v33, 7 }
 0x197   : > { %v1701_v46 = vadd.f32 %v1700_v8, %v1694_v1  ;;  %v1657_v24 = vadd.f32 %v2912_v9, %v1625_v12  ;;  %v1633_v26 = vadd.f32 %v1632_v3, %v1560_v41  ;;  %v1681_v50 = vadd.f32 %v1680_v62, %v1629_v23 }
 0x198   : > { %v1658_v34 = vadd.f32 %v2912_v9, %v1631_v37  ;;  %v1634_v56 = vpop.f32.mrf.mxu1  ;;  %v1720_v25 = vsub.s32 %v1717_v39, %v1719_v6  ;;  %vm1732_vm1 = vcmp.lt.s32.totalorder %v1718_v33, 256 }
 0x199   : > { %1673 = vst [vmem:[%s2918_s24 + $0x18] sm:$0xff] %v1657_v24  ;;  %1667 = vst [vmem:[%s2907_s20 + $0x28] sm:$0xff] %v1633_v26  ;;  %v1635_v61 = vadd.f32 %v1634_v56, %v1562_v47  ;;  %v1702_v10 = vadd.f32 %v1701_v46, %v1695_v22  ;;  %v1696_v59 = vmul.f32 %v1633_v26, %v1633_v26 }
 0x19a   : > { %1674 = vst [vmem:[%s2918_s24 + $0x20] sm:$0xff] %v1658_v34  ;;  %v1638_v60 = vpop.f32.mrf.mxu1  ;;  %v1682_v32 = vadd.f32 %v1681_v50, %v1633_v26 }
 0x19b   : > { %v1659_v15 = vadd.f32 %v2912_v9, %v1635_v61  ;;  %v1639_v11 = vadd.f32 %v1638_v60, %v1566_v38  ;;  %v1703_v35 = vadd.f32 %v1702_v10, %v1696_v59 }
 0x19c   : > { %v1640_v54 = vpop.f32.mrf.mxu1 }
 0x19d   : > { %1675 = vst [vmem:[%s2918_s24 + $0x28] sm:$0xff] %v1659_v15  ;;  %1668 = vst [vmem:[%s2907_s20 + $0x30] sm:$0xff] %v1639_v11  ;;  %v1697_v17 = vmul.f32 %v1639_v11, %v1639_v11  ;;  %v1641_v40 = vadd.f32 %v1640_v54, %v1568_v7  ;;  %v1683_v21 = vadd.f32 %v1682_v32, %v1639_v11 }
 0x19e   : > { %v1642_v52 = vpop.f32.mrf.mxu1 }
 0x19f   : > { %v1660_v27 = vadd.f32 %v2912_v9, %v1641_v40  ;;  %v1643_v29 = vadd.f32 %v1642_v52, %v1570_v57  ;;  %v1704_v43 = vadd.f32 %v1703_v35, %v1697_v17 }
 0x1a0   : > { %v1644_v28 = vpop.f32.mrf.mxu1 }
 0x1a1   : > { %1676 = vst [vmem:[%s2918_s24 + $0x30] sm:$0xff] %v1660_v27  ;;  %1669 = vst [vmem:[%s2907_s20 + $0x38] sm:$0xff] %v1643_v29  ;;  %v1684_v36 = vadd.f32 %v1683_v21, %v1643_v29  ;;  %v1698_v48 = vmul.f32 %v1643_v29, %v1643_v29  ;;  %v1645_v42 = vadd.f32 %v1644_v28, %v1572_v31 }
 0x1a3   : > { %v1685_v49 = vrot.slane %v1684_v36, 4  ;;  %v1705_v51 = vadd.f32 %v1704_v43, %v1698_v48  ;;  %v1661_v5 = vadd.f32 %v2912_v9, %v1645_v42 }
 0x1a5   : > { %v1686_v4 = vadd.f32 %v1685_v49, %v1684_v36  ;;  %v1706_v14 = vrot.slane %v1705_v51, 4  ;;  %1677 = vst [vmem:[%s2918_s24 + $0x38] sm:$0xff] %v1661_v5 }
 0x1a7   : > { %v1687_v0 = vrot.slane %v1686_v4, 2  ;;  %v1707_v44 = vadd.f32 %v1706_v14, %v1705_v51 }
 0x1a9   : > { %v1688_v18 = vadd.f32 %v1687_v0, %v1686_v4  ;;  %v1708_v55 = vrot.slane %v1707_v44, 2 }
 0x1ab   : > { %v1689_v2 = vrot.slane %v1688_v18, 1  ;;  %v1709_v58 = vadd.f32 %v1708_v55, %v1707_v44 }
 0x1ad   : > { %v1710_v16 = vrot.slane %v1709_v58, 1  ;;  %v1690_v13 = vadd.f32 %v1689_v2, %v1688_v18 }
 0x1af   : > { %v1711_v45 = vadd.f32 %v1710_v16, %v1709_v58 }
 0x1b1   : > { %v1714_v9 = vcombine.low %v1690_v13, %v1711_v45 }
 0x1b3   : > { %v1721_v23 = vrot.slane %v1714_v9, %v1720_v25 }
 0x1b5   : > { %v1728_v63 = vrot.slane %v1721_v23, %v1720_v25 }
 0x1b7   : > { %1734 = vst.msk [vmem:[%s247_s28] sm:$0x3] %vm1732_vm1, %v1728_v63 }
 0x1b8 PF: > { %s16_s18 = sadd.s32 1, %s2260_s18  }
 0x1b9   : > { %p13_p4 = scmp.ge.s32.totalorder %s16_s18, 4  }
 0x1bb   :  { %15 = sbr.rel (!%p13_p4) target bundleno = 1 (0x1), region = 88 }

// kernel: resnet18_forward.11
= control target key start
LH: loop header
LB: loop body
LE: loop exit
PB: predicated region body
PF: predicated region fallthrough
CT: control target
= control target key end

     0   :  { %9 = vsyncpa [#allocation3], 0  ;;  %s875_s0 = inlined_call_operand.vmem [shape: f32[2,64,128], index: 0, kind: input, shape index: {}]   ;;  %s876_s1 = inlined_call_operand.vmem [shape: bf16[2,10,10,128], index: 1, kind: input, shape index: {}]   ;;  %s877_s2 = inlined_call_operand.vmem [shape: f32[1,128], index: 2, kind: input, shape index: {}]   ;;  %s878_s3 = inlined_call_operand.vmem [shape: f32[1,128], index: 3, kind: input, shape index: {}]   ;;  %s879_s4 = inlined_call_operand.hbm [shape: f32[2,8,8,128], index: 4, kind: output, shape index: {}]  }
   0x1   :  { %11 = vsyncpa [#allocation3 + $0x1], 0  ;;  %s679_s15 = smov 0   ;;  %s681_s16 = smov 0  }
   0x2   :  { %s683_s17 = smov 0   ;;  %s685_s18 = smov 0  }
   0x3 LB: > { %s700_s19 = sadd.s32 4294967295, %s649_s18   ;;  %s514_s20 = sadd.s32 4294967294, %s649_s18   ;;  %s649_s18 = sphi %s685_s18, %s887_s18   ;;  %s645_s17 = sphi %s683_s17, %s886_s17   ;;  %s641_s16 = sphi %s681_s16, %s885_s16   ;;  %s637_s15 = sphi %s679_s15, %s884_s15  }
   0x4   : > { %s704_s21 = sadd.s32 1, %s649_s18   ;;  %s118_s22 = sadd.s32 1, %s645_s17 }
   0x5   : > { %s115_s23 = ssub.s32 %s649_s18, %s704_s21  ;;  %p128_p0 = scmp.ne.s32.totalorder %s645_s17, %s641_s16 }
   0x6   : > { %p116_p1 = scmp.eq.s32.totalorder %s115_s23, 0  ;;  %p129_p2 = scmp.eq.s32.totalorder %s700_s19, 1 }
   0x7   : > { %p134_p3 = scmp.ne.s32.totalorder %s641_s16, %s637_s15  ;;  %p135_p4 = scmp.eq.s32.totalorder %s514_s20, 1 }
   0x8   : > { %s715_s24 = scalar_select %p116_p1, %s645_s17, %s118_s22  }
   0x9   : > { %p717_p5 = por %p129_p2, %p128_p0  ;;  %p721_p6 = por %p135_p4, %p134_p3 }
   0xa   : > { %p517_p7 = scmp.ge.s32.totalorder %s649_s18, 1  ;;  %p175_p8 = scmp.lt.s32.totalorder %s649_s18, 3 }
   0xc   : > { %p176_p9 = pnand %p517_p7, %p175_p8 }
   0xd   : > { %p206_p10 = scmp.lt.s32.totalorder (!%p176_p9), %s700_s19, 1  ;;  %s203_s14 = sand.u32 (!%p176_p9), 1, %s641_s16  }
   0xe   : > { %179 = sbr.rel (%p176_p9) target bundleno = 73 (0x49), region = 36  ;;  %s518_s20 = sshll.u32 (!%p176_p9), %s203_s14, 6 }
   0xf   : > { %s795_s22 = scalar_lea.vmem (!%p176_p9), [#allocation2], %s518_s20  ;;  %s835_s5 = scalar_lea.sflag (!%p176_p9), [#allocation3], %s203_s14 }
  0x10   : > { %s440_s23 = sshll.u32 (!%p176_p9), %s795_s22, 4  ;;  %s651_s6 = smov (!%p176_p9), [#allocation2]   ;;  %s824_s23 = int_to_ptr.vmem [resolvable:$true] %s440_s23 }
  0x11   : > { %s593_s7 = sshll.u32 (!%p176_p9), %s651_s6, 4  ;;  %s594_s7 = int_to_ptr.vmem [resolvable:$false] %s593_s7 }
  0x12   : > { %p596_p0 = scmp.lt.s32.totalorder (!%p176_p9), %s824_s23, %s594_s7 }
  0x13   : > { %s207_s27 = scalar_select %p206_p10, %s700_s19, 1  ;;  %v732_v0 = vld [vmem:[%s877_s2] ss:$0 sm:$0xff]  ;;  %vm271_vm0 = vsmask.f32 3328 }
  0x14   : > { %v742_v1 = vld [vmem:[%s878_s3] ss:$0 sm:$0xff]  ;;  %vm272_vm1 = vsmask.f32 7440 }
  0x15   : > { %s545_s28 = sshll.u32 %s207_s27, 6  ;;  %s547_s29 = smul.u32 80, %s207_s27  ;;  %vm768_vm2 = vmor %vm271_vm0, %vm272_vm1 }
  0x16   : > { %s737_s8 = scalar_lea.vmem %s875_s0, %s545_s28  ;;  %s546_s27 = sshll.u32 %s700_s19, 10 }
  0x17   : > { %s747_s13 = scalar_lea.vmem %s876_s1, %s547_s29  ;;  %v216_v2 = vld [vmem:[%s737_s8] sm:$0xff]  ;;  %v217_v3 = vld [vmem:[%s737_s8 + $0x8] sm:$0xff]  ;;  %v218_v4 = vld [vmem:[%s737_s8 + $0x10] sm:$0xff]  ;;  %s830_s30 = scalar_lea.hbm %s879_s4, %s546_s27 }
  0x18   : > { %v231_v5 = vmul.f32 %v732_v0, %v216_v2  ;;  %v524_v6 = vld [vmem:[%s747_s13 + $0x8] sm:$0xf]  ;;  %v525_v7 = vld [vmem:[%s747_s13 + $0xc] sm:$0x1]  ;;  %v232_v8 = vmul.f32 %v732_v0, %v217_v3  ;;  %v526_v9 = vld [vmem:[%s747_s13 + $0x10] sm:$0xf]  ;;  %v233_v17 = vmul.f32 %v732_v0, %v218_v4 }
  0x19   : > { %v275_v10 = vshrl.u32 %v524_v6, 16  ;;  %v278_v11 = vshll.u32 %v524_v6, 16  ;;  %v284_v12 = vshll.u32 %v525_v7, 16  ;;  %v527_v13 = vld [vmem:[%s747_s13 + $0x14] sm:$0x1]  ;;  %v289_v14 = vshrl.u32 %v526_v9, 16 }
  0x1a   : > { %v292_v15 = vshll.u32 %v526_v9, 16  ;;  %v298_v16 = vshll.u32 %v527_v13, 16  ;;  %v528_v18 = vld [vmem:[%s747_s13 + $0x18] sm:$0xf]  ;;  %v529_v19 = vld [vmem:[%s747_s13 + $0x1c] sm:$0x1]  ;;  %v246_v20 = vadd.f32 %v742_v1, %v231_v5  ;;  %v247_v25 = vadd.f32 %v742_v1, %v232_v8 }
  0x1b   : > { %v277_v21 = vrot.slane %v275_v10, 4  ;;  %v280_v22 = vrot.slane %v278_v11, 5  ;;  %v291_v23 = vrot.slane %v289_v14, 4  ;;  %v286_v24 = vrot.slane %v284_v12, 5  ;;  %v219_v28 = vld [vmem:[%s737_s8 + $0x18] sm:$0xff]  ;;  %v220_v49 = vld [vmem:[%s737_s8 + $0x20] sm:$0xff] }
  0x1c   : > { %v294_v26 = vrot.slane %v292_v15, 5  ;;  %v303_v27 = vshrl.u32 %v528_v18, 16  ;;  %v530_v29 = vld [vmem:[%s747_s13 + $0x20] sm:$0xf]  ;;  %v300_v31 = vrot.slane %v298_v16, 5  ;;  %v306_v32 = vshll.u32 %v528_v18, 16 }
  0x1d   : > { %v281_v30 = vor.u32 %v280_v22, %v277_v21  ;;  %v312_v33 = vshll.u32 %v529_v19, 16  ;;  %v531_v34 = vld [vmem:[%s747_s13 + $0x24] sm:$0x1]  ;;  %v317_v38 = vshrl.u32 %v530_v29, 16  ;;  %v320_v39 = vshll.u32 %v530_v29, 16  ;;  %v221_v9 = vld [vmem:[%s737_s8 + $0x28] sm:$0xff] }
  0x1e   : > { %v295_v36 = vor.u32 %v294_v26, %v291_v23  ;;  %v305_v37 = vrot.slane %v303_v27, 4  ;;  %v532_v40 = vld [vmem:[%s747_s13 + $0x28] sm:$0xf]  ;;  %v248_v42 = vadd.f32 %v742_v1, %v233_v17  ;;  %v308_v43 = vrot.slane %v306_v32, 5  ;;  %v533_v53 = vld [vmem:[%s747_s13 + $0x2c] sm:$0x1] }
  0x1f   : > { %v282_v41 = vrot.slane %v281_v30, 4  ;;  %v234_v44 = vmul.f32 %v732_v0, %v219_v28  ;;  %v319_v46 = vrot.slane %v317_v38, 4  ;;  %v322_v47 = vrot.slane %v320_v39, 5  ;;  %v534_v59 = vld [vmem:[%s747_s13 + $0x30] sm:$0xf]  ;;  %s589_s19 = scalar_lea.vmem %s824_s23, 1024 }
  0x20   : > { %v296_v45 = vrot.slane %v295_v36, 4  ;;  %v326_v48 = vshll.u32 %v531_v34, 16  ;;  %v309_v51 = vor.u32 %v308_v43, %v305_v37  ;;  %v314_v52 = vrot.slane %v312_v33, 5  ;;  %v535_v15 = vld [vmem:[%s747_s13 + $0x34] sm:$0x1]  ;;  %p590_p11 = scmp.ne.s32.totalorder %s824_s23, %s589_s19 }
  0x21   : > { %v287_v50 = vsel %vm768_vm2, %v282_v41, %v286_v24  ;;  %v331_v54 = vshrl.u32 %v532_v40, 16  ;;  %v323_v57 = vor.u32 %v322_v47, %v319_v46  ;;  %v235_v62 = vmul.f32 %v732_v0, %v220_v49  ;;  %v536_v16 = vld [vmem:[%s747_s13 + $0x38] sm:$0xf]  ;;  %v537_v29 = vld [vmem:[%s747_s13 + $0x3c] sm:$0x1] }
  0x22   : > { %v394_v55 = vunpack.c.l.bf16 %v287_v50  ;;  %v301_v56 = vsel %vm768_vm2, %v296_v45, %v300_v31  ;;  %v328_v58 = vrot.slane %v326_v48, 5  ;;  %v310_v61 = vrot.slane %v309_v51, 4  ;;  %v538_v36 = vld [vmem:[%s747_s13 + $0x40] sm:$0xf]  ;;  %v539_v41 = vld [vmem:[%s747_s13 + $0x44] sm:$0x1]  ;;  %p591_p12 = pnand %p590_p11, %p717_p5 }
  0x23   : > { %v395_v60 = vunpack.c.l.bf16 %v301_v56  ;;  %v333_v63 = vrot.slane %v331_v54, 4  ;;  %v324_v3 = vrot.slane %v323_v57, 4  ;;  %v334_v4 = vshll.u32 %v532_v40, 16  ;;  %v223_v47 = vld [vmem:[%s737_s8 + $0x38] sm:$0xff] }
  0x24   : > { %v402_v2 = vadd.f32 %v394_v55, %v246_v20  ;;  %v340_v5 = vshll.u32 %v533_v53, 16  ;;  %v315_v7 = vsel %vm768_vm2, %v310_v61, %v314_v52  ;;  %v249_v8 = vadd.f32 %v742_v1, %v234_v44  ;;  %p592_p13 = pneg %p591_p12 }
  0x25   : > { %v403_v6 = vadd.f32 %v395_v60, %v247_v25  ;;  %v345_v10 = vshrl.u32 %v534_v59, 16  ;;  %v396_v12 = vunpack.c.l.bf16 %v315_v7  ;;  %v329_v13 = vsel %vm768_vm2, %v324_v3, %v328_v58  ;;  %v222_v25 = vld [vmem:[%s737_s8 + $0x30] sm:$0xff]  ;;  %s595_s8 = scalar_lea.vmem %s594_s7, 2048 }
  0x26   : > { %v410_v11 = vmax.f32 %v402_v2, 0.0  ;;  %v336_v14 = vrot.slane %v334_v4, 5  ;;  %v397_v18 = vunpack.c.l.bf16 %v329_v13  ;;  %v250_v19 = vadd.f32 %v742_v1, %v235_v62  ;;  %p597_p1 = scmp.lt.s32.totalorder %s595_s8, %s589_s19 }
  0x27   : > { %v411_v17 = vmax.f32 %v403_v6, 0.0  ;;  %v342_v20 = vrot.slane %v340_v5, 5  ;;  %v404_v21 = vadd.f32 %v396_v12, %v248_v42  ;;  %v347_v23 = vrot.slane %v345_v10, 4 }
  0x28   : > { %418 = vst [vmem:[%s795_s22] sm:$0xff] %v410_v11  ;;  %v337_v22 = vor.u32 %v336_v14, %v333_v63  ;;  %v348_v24 = vshll.u32 %v534_v59, 16  ;;  %v405_v26 = vadd.f32 %v397_v18, %v249_v8  ;;  %v236_v27 = vmul.f32 %v732_v0, %v221_v9  ;;  %p598_p2 = por %p597_p1, %p596_p0 }
  0x29   : > { %419 = vst [vmem:[%s795_s22 + $0x8] sm:$0xff] %v411_v17  ;;  %v354_v28 = vshll.u32 %v535_v15, 16  ;;  %v359_v30 = vshrl.u32 %v536_v16, 16  ;;  %v412_v31 = vmax.f32 %v404_v21, 0.0  ;;  %v362_v34 = vshll.u32 %v536_v16, 16 }
  0x2a   : > { %v338_v32 = vrot.slane %v337_v22, 4  ;;  %v350_v33 = vrot.slane %v348_v24, 5  ;;  %v413_v37 = vmax.f32 %v405_v26, 0.0  ;;  %v237_v39 = vmul.f32 %v732_v0, %v222_v25  ;;  %p599_p3 = pnand %p598_p2, %p592_p13 }
  0x2b   : > { %v356_v38 = vrot.slane %v354_v28, 5  ;;  %v361_v40 = vrot.slane %v359_v30, 4  ;;  %420 = vst [vmem:[%s795_s22 + $0x10] sm:$0xff] %v412_v31  ;;  %v364_v44 = vrot.slane %v362_v34, 5  ;;  %v368_v45 = vshll.u32 %v537_v29, 16 }
  0x2c   : > { %v343_v42 = vsel %vm768_vm2, %v338_v32, %v342_v20  ;;  %v351_v43 = vor.u32 %v350_v33, %v347_v23  ;;  %421 = vst [vmem:[%s795_s22 + $0x18] sm:$0xff] %v413_v37  ;;  %v373_v48 = vshrl.u32 %v538_v36, 16  ;;  %v376_v49 = vshll.u32 %v538_v36, 16 }
  0x2d   : > { %v398_v46 = vunpack.c.l.bf16 %v343_v42  ;;  %v365_v51 = vor.u32 %v364_v44, %v361_v40  ;;  %v370_v52 = vrot.slane %v368_v45, 5  ;;  %v382_v53 = vshll.u32 %v539_v41, 16 }
  0x2e   : > { %v352_v50 = vrot.slane %v351_v43, 4  ;;  %v251_v55 = vadd.f32 %v742_v1, %v236_v27  ;;  %v375_v56 = vrot.slane %v373_v48, 4  ;;  %v378_v57 = vrot.slane %v376_v49, 5 }
  0x2f   : > { %v406_v54 = vadd.f32 %v398_v46, %v250_v19  ;;  %v252_v59 = vadd.f32 %v742_v1, %v237_v39  ;;  %v366_v60 = vrot.slane %v365_v51, 4  ;;  %v238_v61 = vmul.f32 %v732_v0, %v223_v47 }
  0x30   : > { %v357_v58 = vsel %vm768_vm2, %v352_v50, %v356_v38  ;;  %v379_v2 = vor.u32 %v378_v57, %v375_v56  ;;  %v384_v3 = vrot.slane %v382_v53, 5 }
  0x31   : > { %v414_v62 = vmax.f32 %v406_v54, 0.0  ;;  %v399_v63 = vunpack.c.l.bf16 %v357_v58  ;;  %v371_v4 = vsel %vm768_vm2, %v366_v60, %v370_v52  ;;  %v253_v8 = vadd.f32 %v742_v1, %v238_v61 }
  0x32   : > { %v400_v6 = vunpack.c.l.bf16 %v371_v4  ;;  %v380_v7 = vrot.slane %v379_v2, 4 }
  0x33   : > { %422 = vst [vmem:[%s795_s22 + $0x20] sm:$0xff] %v414_v62  ;;  %v407_v5 = vadd.f32 %v399_v63, %v251_v55 }
  0x34   : > { %v408_v0 = vadd.f32 %v400_v6, %v252_v59  ;;  %v385_v10 = vsel %vm768_vm2, %v380_v7, %v384_v3 }
  0x35   : > { %v415_v9 = vmax.f32 %v407_v5, 0.0  ;;  %v401_v11 = vunpack.c.l.bf16 %v385_v10 }
  0x36   : > { %v416_v12 = vmax.f32 %v408_v0, 0.0 }
  0x37   : > { %423 = vst [vmem:[%s795_s22 + $0x28] sm:$0xff] %v415_v9  ;;  %v409_v13 = vadd.f32 %v401_v11, %v253_v8 }
  0x38   : > { %424 = vst [vmem:[%s795_s22 + $0x30] sm:$0xff] %v416_v12 }
  0x39   : > { %v417_v1 = vmax.f32 %v409_v13, 0.0 }
  0x3b   : > { %425 = vst [vmem:[%s795_s22 + $0x38] sm:$0xff] %v417_v1 }
  0x3c   : > { %602 = shalt.err (!%p599_p3)
}
  0x3d   : > { %s603_s9 = scalar_lea.hbm %s830_s30, 1024  ;;  %s607_s12 = scalar_lea.hbm %s879_s4, 2048 }
  0x3e   : > { %p604_p4 = scmp.ne.s32.totalorder %s830_s30, %s603_s9  ;;  %p608_p9 = scmp.lt.s32.totalorder %s830_s30, %s879_s4 }
  0x3f   : > { %p609_p10 = scmp.lt.s32.totalorder %s607_s12, %s603_s9 }
  0x40   : > { %p605_p7 = pnand %p604_p4, %p717_p5 }
  0x41   : > { %p610_p11 = por %p609_p10, %p608_p9 }
  0x42   : > { %p606_p8 = pneg %p605_p7 }
  0x44   : > { %p611_p12 = pnand %p610_p11, %p606_p8 }
  0x46   : > { %614 = shalt.err (!%p611_p12)
}
  0x47   : > { %s652_s20 = smov 128   ;;  %s653_s22 = smov 8  }
  0x48   : > { %548 = dma.vmem_to_hbm [thread:$0]  (%p717_p5), %s824_s23, 1024, %s830_s30, %s835_s5, %s652_s20, %s652_s20, %s653_s22  }
  0x49 PF: > { %p554_p13 = scmp.ge.s32.totalorder %s649_s18, 2  ;;  %s455_s27 = sand.u32 1, %s637_s15  }
  0x4a   : > { %s456_s28 = scalar_lea.sflag [#allocation3], %s455_s27 }
  0x4b   : > { %p551_p0 = pnand %p554_p13, %p721_p6 }
  0x4d   : > { %p552_p1 = pneg %p551_p0 }
  0x4f   : > { %632 = dma.done.wait (%p552_p1), %s456_s28, 1024  }
  0x50   : > { %634 = vsyncadd (%p552_p1), %s456_s28, 4294966272  ;;  %p14_p2 = scmp.ge.s32.totalorder %s704_s21, 4   ;;  %s884_s15 = smov %s641_s16 }
  0x51   : > { %s885_s16 = smov %s645_s17  ;;  %s886_s17 = smov %s715_s24 }
  0x52   : > { %s887_s18 = smov %s704_s21  ;;  %16 = sbr.rel (!%p14_p2) target bundleno = 3 (0x3), region = 75 }
  0x57   :  { %461 = vsyncpa [#allocation3], 1 }
  0x58   :  { %463 = vsyncpa [#allocation3 + $0x1], 1 }

// kernel: resnet18_forward.9
= control target key start
LH: loop header
LB: loop body
LE: loop exit
PB: predicated region body
PF: predicated region fallthrough
CT: control target
= control target key end

     0   :  { %s2412_s12 = smov 0   ;;  %s2977_s0 = inlined_call_operand.vmem [shape: bf16[2,10,10,128], index: 0, kind: input, shape index: {}]   ;;  %s2978_s1 = inlined_call_operand.vmem [shape: bf16[1152,128], index: 1, kind: input, shape index: {}]   ;;  %s2979_s2 = inlined_call_operand.vmem [shape: f32[2,64,128], index: 2, kind: output, shape index: {0}]   ;;  %s2980_s3 = inlined_call_operand.vmem [shape: f32[2,1,256], index: 3, kind: output, shape index: {1}]  }
   0x1 LB: > { %s1813_s13 = sadd.s32 4294967295, %s2389_s12   ;;  %p1817_p0 = scmp.ge.s32.totalorder %s2389_s12, 1  ;;  %s2389_s12 = sphi %s2412_s12, %s14_s12  }
   0x2   : > { %p140_p1 = scmp.lt.s32.totalorder %s2389_s12, 3 }
   0x4   : > { %p141_p2 = pnand %p1817_p0, %p140_p1 }
   0x6   : > { %144 = sbr.rel (%p141_p2) target bundleno = 345 (0x159), region = 28 }
   0xb   : > { %v2251_v0 = vld [vmem:[%s2978_s1 + $0x78] sm:$0xff]   ;;  %v2255_v4 = vld [vmem:[%s2978_s1 + $0x70] sm:$0xff]   ;;  %v2259_v8 = vld [vmem:[%s2978_s1 + $0x68] sm:$0xff]   ;;  %p168_p3 = scmp.lt.s32.totalorder %s1813_s13, 1 }
   0xc   : > { %v2252_v1 = vld [vmem:[%s2978_s1 + $0xf8] sm:$0xff]   ;;  %2029 = vmatprep.subr.bf16.mxu0 %v2251_v0  ;;  %v2256_v5 = vld [vmem:[%s2978_s1 + $0xf0] sm:$0xff]   ;;  %v2260_v9 = vld [vmem:[%s2978_s1 + $0xe8] sm:$0xff]  }
   0xd   : > { %v2253_v2 = vld [vmem:[%s2978_s1 + $0x38] sm:$0xff]   ;;  %2069 = vmatprep.subr.bf16.mxu1 %v2252_v1  ;;  %v2257_v6 = vld [vmem:[%s2978_s1 + $0x30] sm:$0xff]   ;;  %v2261_v10 = vld [vmem:[%s2978_s1 + $0x28] sm:$0xff]   ;;  %s2994_s13 = smov (!%p168_p3, %s1813_s13), 1 }
   0xe   : > { %v2254_v3 = vld [vmem:[%s2978_s1 + $0xb8] sm:$0xff]   ;;  %2030 = vmatpush3.bf16.msra.mxu0 %v2253_v2  ;;  %v2258_v7 = vld [vmem:[%s2978_s1 + $0xb0] sm:$0xff]   ;;  %v2262_v11 = vld [vmem:[%s2978_s1 + $0xa8] sm:$0xff]   ;;  %s2241_s16 = smul.u32 80, %s2994_s13  ;;  %s1821_s18 = sshll.u32 %s2994_s13, 1 }
   0xf   : > { %2070 = vmatpush3.bf16.msra.mxu1 %v2254_v3  ;;  %2031 = vmatprep.subr.bf16.mxu0 %v2255_v4  ;;  %v2263_v12 = vld [vmem:[%s2978_s1 + $0x60] sm:$0xff]   ;;  %v2267_v16 = vld [vmem:[%s2978_s1 + $0x58] sm:$0xff]   ;;  %v2271_v20 = vld [vmem:[%s2978_s1 + $0x50] sm:$0xff]   ;;  %s181_s21 = scalar_lea.vmem %s2980_s3, %s1821_s18 }
  0x10   : > { %2071 = vmatprep.subr.bf16.mxu1 %v2256_v5  ;;  %v2264_v13 = vld [vmem:[%s2978_s1 + $0xe0] sm:$0xff]   ;;  %v2268_v17 = vld [vmem:[%s2978_s1 + $0xd8] sm:$0xff]   ;;  %v2272_v21 = vld [vmem:[%s2978_s1 + $0xd0] sm:$0xff]   ;;  %s2520_s27 = scalar_lea.vmem %s2977_s0, %s2241_s16 }
  0x11   : > { %v2265_v14 = vld [vmem:[%s2978_s1 + $0x20] sm:$0xff]   ;;  %v2269_v18 = vld [vmem:[%s2978_s1 + $0x18] sm:$0xff]   ;;  %v2273_v22 = vld [vmem:[%s2978_s1 + $0x10] sm:$0xff]  }
  0x12   : > { %2032 = vmatpush3.bf16.msra.mxu0 %v2257_v6  ;;  %v2266_v15 = vld [vmem:[%s2978_s1 + $0xa0] sm:$0xff]   ;;  %v2270_v19 = vld [vmem:[%s2978_s1 + $0x98] sm:$0xff]   ;;  %v2274_v23 = vld [vmem:[%s2978_s1 + $0x90] sm:$0xff]  }
  0x13   : > { %2072 = vmatpush3.bf16.msra.mxu1 %v2258_v7  ;;  %2033 = vmatprep.subr.bf16.mxu0 %v2259_v8  ;;  %v2275_v24 = vld [vmem:[%s2978_s1 + $0x48] sm:$0xff]   ;;  %v2279_v28 = vld [vmem:[%s2978_s1 + $0x40] sm:$0xff]   ;;  %v2536_v38 = vld [vmem:[%s2520_s27 + $0x10] sm:$0xf] }
  0x14   : > { %2073 = vmatprep.subr.bf16.mxu1 %v2260_v9  ;;  %v2276_v25 = vld [vmem:[%s2978_s1 + $0xc8] sm:$0xff]   ;;  %v2280_v29 = vld [vmem:[%s2978_s1 + $0xc0] sm:$0xff]   ;;  %v2293_v49 = vld [vmem:[%s2978_s1 + $0x178] sm:$0xff]  }
  0x15   : > { %v2277_v26 = vld [vmem:[%s2978_s1 + $0x8] sm:$0xff]   ;;  %v2281_v30 = vld [vmem:[%s2978_s1] sm:$0xff]   ;;  %v2294_v50 = vld [vmem:[%s2978_s1 + $0x1f8] sm:$0xff]  }
  0x16   : > { %2034 = vmatpush3.bf16.msra.mxu0 %v2261_v10  ;;  %v2278_v27 = vld [vmem:[%s2978_s1 + $0x88] sm:$0xff]   ;;  %v2282_v31 = vld [vmem:[%s2978_s1 + $0x80] sm:$0xff]   ;;  %v2295_v55 = vld [vmem:[%s2978_s1 + $0x138] sm:$0xff]  }
  0x17   : > { %2074 = vmatpush3.bf16.msra.mxu1 %v2262_v11  ;;  %2035 = vmatprep.subr.bf16.mxu0 %v2263_v12  ;;  %v183_v32 = vld [vmem:[%s2520_s27] sm:$0xf]  ;;  %v184_v33 = vld [vmem:[%s2520_s27 + $0x8] sm:$0xf]  ;;  %v191_v34 = vld [vmem:[%s2520_s27 + $0x4] sm:$0x1] }
  0x18   : > { %2075 = vmatprep.subr.bf16.mxu1 %v2264_v13  ;;  %v192_v35 = vld [vmem:[%s2520_s27 + $0xc] sm:$0x1]  ;;  %v1870_v36 = vcombine.low %v183_v32, %v191_v34  ;;  %v2533_v37 = vld [vmem:[%s2520_s27 + $0x8] sm:$0xf]  ;;  %v199_v43 = vld [vmem:[%s2520_s27] sm:$0xe]  ;;  %v1918_v57 = vcombine.low %v183_v32, %v184_v33 }
  0x19   : > { %v1871_v39 = vcombine.low %v184_v33, %v192_v35  ;;  %v1921_v40 = vcombine.low %v2533_v37, %v2536_v38  ;;  %v200_v46 = vld [vmem:[%s2520_s27 + $0x8] sm:$0xe]  ;;  %v1878_v52 = vcombine.low %v199_v43, %v191_v34  ;;  %v2296_v56 = vld [vmem:[%s2978_s1 + $0x1b8] sm:$0xff]   ;;  %v2297_v61 = vld [vmem:[%s2978_s1 + $0x170] sm:$0xff]  }
  0x1a   : > { %2036 = vmatpush3.bf16.msra.mxu0 %v2265_v14  ;;  %v298_v41 = vshrl.u32 %v1870_v36, 16  ;;  %v300_v42 = vshll.u32 %v1870_v36, 16  ;;  %v1879_v53 = vcombine.low %v200_v46, %v192_v35  ;;  %v2298_v63 = vld [vmem:[%s2978_s1 + $0x1f0] sm:$0xff]   ;;  %v186_v3 = vld [vmem:[%s2520_s27 + $0x18] sm:$0xf]  ;;  %v2313_v36 = vld [vmem:[%s2978_s1 + $0x160] sm:$0xff]  }
  0x1b   : > { %2076 = vmatpush3.bf16.msra.mxu1 %v2266_v15  ;;  %2037 = vmatprep.subr.bf16.mxu0 %v2267_v16  ;;  %v305_v44 = vshrl.u32 %v1871_v39, 16  ;;  %v307_v45 = vshll.u32 %v1871_v39, 16  ;;  %v377_v58 = vrot.slane %v1878_v52, 1  ;;  %v2299_v0 = vld [vmem:[%s2978_s1 + $0x130] sm:$0xff]   ;;  %v194_v5 = vld [vmem:[%s2520_s27 + $0x1c] sm:$0x1] }
  0x1c   : > { %2077 = vmatprep.subr.bf16.mxu1 %v2268_v17  ;;  %1434 = vmatprep.mubr.bf16.mxu1 %v1921_v40  ;;  %v302_v47 = vrot.slane %v300_v42, 1  ;;  %v378_v59 = vrot.slane %v1879_v53, 1  ;;  %v2300_v1 = vld [vmem:[%s2978_s1 + $0x1b0] sm:$0xff]   ;;  %v2571_v7 = vld [vmem:[%s2520_s27 + $0x18] sm:$0xf]  ;;  %v1873_v9 = vcombine.low %v186_v3, %v194_v5  ;;  %v2315_v42 = vld [vmem:[%s2978_s1 + $0x120] sm:$0xff]  }
  0x1d   : > { %v309_v48 = vrot.slane %v307_v45, 1  ;;  %v185_v2 = vld [vmem:[%s2520_s27 + $0x10] sm:$0xf]  ;;  %v193_v4 = vld [vmem:[%s2520_s27 + $0x14] sm:$0x1]  ;;  %v2316_v43 = vld [vmem:[%s2978_s1 + $0x1a0] sm:$0xff]  }
  0x1e   : > { %2038 = vmatpush3.bf16.msra.mxu0 %v2269_v18  ;;  %v303_v51 = vor.u32 %v302_v47, %v298_v41  ;;  %v1920_v62 = vcombine.low %v377_v58, %v378_v59  ;;  %v1872_v6 = vcombine.low %v185_v2, %v193_v4  ;;  %v2574_v8 = vld [vmem:[%s2520_s27 + $0x20] sm:$0xf]  ;;  %v201_v11 = vld [vmem:[%s2520_s27 + $0x10] sm:$0xe]  ;;  %v2580_v12 = vld [vmem:[%s2520_s27 + $0xc] sm:$0x1]  ;;  %v1927_v35 = vcombine.low %v185_v2, %v186_v3 }
  0x1f   : > { %2078 = vmatpush3.bf16.msra.mxu1 %v2270_v19  ;;  %2039 = vmatprep.subr.bf16.mxu0 %v2271_v20  ;;  %v310_v54 = vor.u32 %v309_v48, %v305_v44  ;;  %v1930_v10 = vcombine.low %v2571_v7, %v2574_v8  ;;  %v202_v15 = vld [vmem:[%s2520_s27 + $0x18] sm:$0xe]  ;;  %v319_v16 = vshrl.u32 %v1873_v9, 16  ;;  %v321_v17 = vshll.u32 %v1873_v9, 16  ;;  %v2309_v20 = vld [vmem:[%s2978_s1 + $0x168] sm:$0xff]  }
  0x20   : > { %2079 = vmatprep.subr.bf16.mxu1 %v2272_v21  ;;  %v312_v13 = vshrl.u32 %v1872_v6, 16  ;;  %v314_v14 = vshll.u32 %v1872_v6, 16  ;;  %v1880_v18 = vcombine.low %v201_v11, %v193_v4  ;;  %v1881_v19 = vcombine.low %v202_v15, %v194_v5  ;;  %v2310_v21 = vld [vmem:[%s2978_s1 + $0x1e8] sm:$0xff]   ;;  %v187_v44 = vld [vmem:[%s2520_s27 + $0x20] sm:$0xf]  ;;  %v2325_v5 = vld [vmem:[%s2978_s1 + $0x158] sm:$0xff]  }
  0x21   : > { %v1919_v60 = vcombine.low %v303_v51, %v310_v54  ;;  %v2600_v32 = vcombine.low %v2533_v37, %v2580_v12  ;;  %v2314_v37 = vld [vmem:[%s2978_s1 + $0x1e0] sm:$0xff]   ;;  %v188_v45 = vld [vmem:[%s2520_s27 + $0x28] sm:$0xf]  ;;  %v2630_v53 = vld [vmem:[%s2520_s27 + $0x1c] sm:$0x1] }
  0x22   : > { %2040 = vmatpush3.bf16.msra.mxu0 %v2273_v22  ;;  %v1831_v22 = vld [vmem:[%s2520_s27 + $0x14] sm:$0x1]  ;;  %v195_v48 = vld [vmem:[%s2520_s27 + $0x24] sm:$0x1]  ;;  %v203_v59 = vld [vmem:[%s2520_s27 + $0x20] sm:$0xe]  ;;  %v2654_v9 = vcombine.low %v2571_v7, %v2630_v53 }
  0x23   : > { %2080 = vmatpush3.bf16.msra.mxu1 %v2274_v23  ;;  %2041 = vmatprep.subr.bf16.mxu0 %v2275_v24  ;;  %v316_v23 = vrot.slane %v314_v14, 1  ;;  %v2311_v24 = vld [vmem:[%s2978_s1 + $0x128] sm:$0xff]   ;;  %v2606_v39 = vcombine.low %v2536_v38, %v1831_v22  ;;  %v426_v41 = vshrl.u32 %v2600_v32, 16  ;;  %v428_v38 = vshll.u32 %v2600_v32, 16  ;;  %v2326_v6 = vld [vmem:[%s2978_s1 + $0x1d8] sm:$0xff]  }
  0x24   : > { %2081 = vmatprep.subr.bf16.mxu1 %v2276_v25  ;;  %1369 = vmatprep.mubr.bf16.mxu0 %v1919_v60  ;;  %v323_v25 = vrot.slane %v321_v17, 1  ;;  %v1874_v54 = vcombine.low %v187_v44, %v195_v48  ;;  %v204_v60 = vld [vmem:[%s2520_s27 + $0x28] sm:$0xe]  ;;  %v1882_v3 = vcombine.low %v203_v59, %v195_v48  ;;  %v2327_v14 = vld [vmem:[%s2978_s1 + $0x118] sm:$0xff]  }
  0x25   : > { %v433_v51 = vshrl.u32 %v2606_v39, 16  ;;  %v435_v52 = vshll.u32 %v2606_v39, 16  ;;  %v2328_v15 = vld [vmem:[%s2978_s1 + $0x198] sm:$0xff]  }
  0x26   : > { %2042 = vmatpush3.bf16.msra.mxu0 %v2277_v26  ;;  %v379_v26 = vrot.slane %v1880_v18, 1  ;;  %v324_v33 = vor.u32 %v323_v25, %v319_v16  ;;  %v2666_v18 = vrot.slane %v428_v38, 1  ;;  %v2700_v38 = vld [vmem:[%s2520_s27 + $0x34] sm:$0x1]  ;;  %v2773_v32 = vld [vmem:[%s2520_s27 + $0x1c] sm:$0x1] }
  0x27   : > { %2082 = vmatpush3.bf16.msra.mxu1 %v2278_v27  ;;  %2043 = vmatprep.subr.bf16.mxu0 %v2279_v28  ;;  %v380_v27 = vrot.slane %v1881_v19, 1  ;;  %v2312_v28 = vld [vmem:[%s2978_s1 + $0x1a8] sm:$0xff]   ;;  %v1936_v19 = vcombine.low %v187_v44, %v188_v45  ;;  %v2678_v25 = vrot.slane %v435_v52, 1 }
  0x28   : > { %2083 = vmatprep.subr.bf16.mxu1 %v2280_v29  ;;  %v317_v29 = vor.u32 %v316_v23, %v312_v13  ;;  %v2673_v23 = vld [vmem:[%s2520_s27 + $0x2c] sm:$0x1] }
  0x29   : > { %v1929_v34 = vcombine.low %v379_v26, %v380_v27  ;;  %v2331_v26 = vld [vmem:[%s2978_s1 + $0x110] sm:$0xff]  }
  0x2a   : > { %2044 = vmatpush3.bf16.msra.mxu0 %v2281_v30  ;;  %v1838_v30 = vld [vmem:[%s2520_s27 + $0x8] sm:$0xe]  ;;  %v1928_v40 = vcombine.low %v317_v29, %v324_v33  ;;  %v2688_v29 = vld [vmem:[%s2520_s27 + $0x30] sm:$0xf]  ;;  %v198_v33 = vld [vmem:[%s2520_s27 + $0x3c] sm:$0x1] }
  0x2b   : > { %2084 = vmatpush3.bf16.msra.mxu1 %v2282_v31  ;;  %2109 = vmatprep.subr.bf16.mxu0 %v2293_v49  ;;  %v1839_v31 = vld [vmem:[%s2520_s27 + $0x10] sm:$0xe]  ;;  %v1894_v46 = vcombine.low %v1838_v30, %v2580_v12  ;;  %v196_v49 = vld [vmem:[%s2520_s27 + $0x2c] sm:$0x1]  ;;  %v381_v12 = vrot.slane %v1882_v3, 1 }
  0x2c   : > { %2149 = vmatprep.subr.bf16.mxu1 %v2294_v50  ;;  %v1895_v47 = vcombine.low %v1839_v31, %v1831_v22  ;;  %v2625_v50 = vld [vmem:[%s2520_s27 + $0x28] sm:$0xf]  ;;  %v1883_v4 = vcombine.low %v204_v60, %v196_v49  ;;  %v442_v22 = vshll.u32 %v2654_v9, 16  ;;  %v190_v30 = vld [vmem:[%s2520_s27 + $0x38] sm:$0xf] }
  0x2d   : > { %1370 = vmatmul.mubr.bf16.vlgmr.msra.gmra.mxu0 %v1918_v57  ;;  %v2636_v57 = vld [vmem:[%s2520_s27 + $0x24] sm:$0x1]  ;;  %v197_v31 = vld [vmem:[%s2520_s27 + $0x34] sm:$0x1]  ;;  %v2724_v3 = vld [vmem:[%s2520_s27 + $0x3c] sm:$0x1] }
  0x2e   : > { %1435 = vmatmul.mubr.bf16.vlgmr.msra.gmra.mxu1 %v1920_v62  ;;  %2110 = vmatpush3.bf16.msra.mxu0 %v2295_v55  ;;  %v1875_v55 = vcombine.low %v188_v45, %v196_v49  ;;  %v328_v62 = vshll.u32 %v1874_v54, 16  ;;  %v2644_v2 = vrot.slane %v1895_v47, 1  ;;  %v382_v13 = vrot.slane %v1883_v4, 1  ;;  %v205_v45 = vld [vmem:[%s2520_s27 + $0x30] sm:$0xe] }
  0x2f   : > { %2150 = vmatpush3.bf16.msra.mxu1 %v2296_v56  ;;  %2111 = vmatprep.subr.bf16.mxu0 %v2297_v61  ;;  %v2633_v56 = vld [vmem:[%s2520_s27 + $0x30] sm:$0xf]  ;;  %v326_v61 = vshrl.u32 %v1874_v54, 16  ;;  %v2664_v16 = vcombine.low %v2574_v8, %v2636_v57  ;;  %v1884_v54 = vcombine.low %v205_v45, %v197_v31  ;;  %v1841_v45 = vld [vmem:[%s2520_s27 + $0x20] sm:$0xe] }
  0x30   : > { %2151 = vmatprep.subr.bf16.mxu1 %v2298_v63  ;;  %1442 = vmatprep.mubr.bf16.mxu1 %v1930_v10  ;;  %v1939_v58 = vcombine.low %v2625_v50, %v2633_v56  ;;  %v333_v63 = vshrl.u32 %v1875_v55, 16  ;;  %v330_v10 = vrot.slane %v328_v62, 1  ;;  %v2342_v62 = vld [vmem:[%s2978_s1 + $0x1c8] sm:$0xff]  }
  0x31   : > { %1377 = vmatprep.mubr.bf16.mxu0 %v1928_v40  ;;  %v449_v27 = vshll.u32 %v2664_v16, 16  ;;  %v1829_v40 = vld [vmem:[%s2520_s27 + $0x40] sm:$0xf]  ;;  %v447_v59 = vshrl.u32 %v2664_v16, 16  ;;  %v383_v4 = vrot.slane %v1884_v54, 1  ;;  %v2831_v16 = vld [vmem:[%s2978_s1 + $0x228] sm:$0xff]  }
  0x32   : > { %2112 = vmatpush3.bf16.msra.mxu0 %v2299_v0  ;;  %v335_v0 = vshll.u32 %v1875_v55, 16  ;;  %v331_v7 = vor.u32 %v330_v10, %v326_v61  ;;  %v2799_v54 = vld [vmem:[%s2520_s27 + $0x28] sm:$0xf] }
  0x33   : > { %2152 = vmatpush3.bf16.msra.mxu1 %v2300_v1  ;;  %2113 = vmatprep.subr.bf16.mxu0 %v2309_v20  ;;  %v2642_v1 = vrot.slane %v1894_v46, 1  ;;  %v1938_v20 = vcombine.low %v381_v12, %v382_v13  ;;  %v206_v46 = vld [vmem:[%s2520_s27 + $0x38] sm:$0xe]  ;;  %v1945_v12 = vcombine.low %v2688_v29, %v190_v30 }
  0x34   : > { %2153 = vmatprep.subr.bf16.mxu1 %v2310_v21  ;;  %v337_v11 = vrot.slane %v335_v0, 1  ;;  %v2329_v21 = vld [vmem:[%s2978_s1 + $0x150] sm:$0xff]   ;;  %v1885_v55 = vcombine.low %v206_v46, %v198_v33 }
  0x35   : > { %1378 = vmatmul.mubr.bf16.gmra.mxu0 %v1927_v35  ;;  %v1877_v35 = vcombine.low %v190_v30, %v198_v33 }
  0x36   : > { %2114 = vmatpush3.bf16.msra.mxu0 %v2311_v24  ;;  %1443 = vmatmul.mubr.bf16.gmra.mxu1 %v1929_v34  ;;  %v338_v17 = vor.u32 %v337_v11, %v333_v63  ;;  %v2330_v24 = vld [vmem:[%s2978_s1 + $0x1d0] sm:$0xff]   ;;  %v1876_v34 = vcombine.low %v2688_v29, %v197_v31  ;;  %v2343_v63 = vld [vmem:[%s2978_s1 + $0x108] sm:$0xff]   ;;  %v2730_v11 = vld [vmem:[%s2520_s27 + $0x44] sm:$0x1] }
  0x37   : > { %2154 = vmatpush3.bf16.msra.mxu1 %v2312_v28  ;;  %2115 = vmatprep.subr.bf16.mxu0 %v2313_v36  ;;  %v2332_v28 = vld [vmem:[%s2978_s1 + $0x190] sm:$0xff]   ;;  %v1828_v36 = vld [vmem:[%s2520_s27 + $0x38] sm:$0xf]  ;;  %v347_v49 = vshrl.u32 %v1877_v35, 16  ;;  %v349_v52 = vshll.u32 %v1877_v35, 16  ;;  %v2770_v30 = vcombine.low %v1829_v40, %v2730_v11 }
  0x38   : > { %2155 = vmatprep.subr.bf16.mxu1 %v2314_v37  ;;  %1450 = vmatprep.mubr.bf16.mxu1 %v1939_v58  ;;  %v1937_v8 = vcombine.low %v331_v7, %v338_v17  ;;  %v440_v37 = vshrl.u32 %v2654_v9, 16  ;;  %v1948_v44 = vcombine.low %v1828_v36, %v1829_v40  ;;  %v340_v47 = vshrl.u32 %v1876_v34, 16  ;;  %v2341_v58 = vld [vmem:[%s2978_s1 + $0x148] sm:$0xff]   ;;  %v2767_v29 = vld [vmem:[%s2520_s27 + $0x14] sm:$0x1] }
  0x39   : > { %v342_v48 = vshll.u32 %v1876_v34, 16  ;;  %v351_v61 = vrot.slane %v349_v52, 1  ;;  %v1840_v34 = vld [vmem:[%s2520_s27 + $0x18] sm:$0xe]  ;;  %v1897_v52 = vcombine.low %v1841_v45, %v2636_v57  ;;  %v1845_v45 = vld [vmem:[%s2520_s27 + $0x40] sm:$0xe] }
  0x3a   : > { %2116 = vmatpush3.bf16.msra.mxu0 %v2315_v42  ;;  %1385 = vmatprep.mubr.bf16.mxu0 %v1937_v8  ;;  %v2697_v42 = vrot.slane %v442_v22, 1  ;;  %v2747_v8 = vcombine.low %v1828_v36, %v2724_v3  ;;  %v1896_v46 = vcombine.low %v1840_v34, %v2630_v53  ;;  %v2810_v53 = vld [vmem:[%s2978_s1 + $0x230] sm:$0xff]  }
  0x3b   : > { %2156 = vmatpush3.bf16.msra.mxu1 %v2316_v43  ;;  %2117 = vmatprep.subr.bf16.mxu0 %v2325_v5  ;;  %v2704_v43 = vcombine.low %v2625_v50, %v2673_v23  ;;  %v2714_v50 = vcombine.low %v2633_v56, %v2700_v38  ;;  %v344_v60 = vrot.slane %v342_v48, 1  ;;  %v384_v5 = vrot.slane %v1885_v55, 1  ;;  %v2344_v56 = vld [vmem:[%s2978_s1 + $0x188] sm:$0xff]   ;;  %v2802_v55 = vld [vmem:[%s2520_s27 + $0x24] sm:$0x1] }
  0x3c   : > { %2157 = vmatprep.subr.bf16.mxu1 %v2326_v6  ;;  %v352_v10 = vor.u32 %v351_v61, %v347_v49  ;;  %v477_v48 = vshll.u32 %v2770_v30, 16  ;;  %v507_v61 = vrot.slane %v1896_v46, 1 }
  0x3d   : > { %1386 = vmatmul.mubr.bf16.gmra.mxu0 %v1936_v19  ;;  %v456_v0 = vshll.u32 %v2704_v43, 16  ;;  %v345_v6 = vor.u32 %v344_v60, %v340_v47  ;;  %v1947_v13 = vcombine.low %v383_v4, %v384_v5  ;;  %v463_v7 = vshll.u32 %v2714_v50, 16  ;;  %v2346_v19 = vld [vmem:[%s2978_s1 + $0x1c0] sm:$0xff]  }
  0x3e   : > { %2118 = vmatpush3.bf16.msra.mxu0 %v2327_v14  ;;  %1451 = vmatmul.mubr.bf16.gmra.mxu1 %v1938_v20  ;;  %v2345_v14 = vld [vmem:[%s2978_s1 + $0x140] sm:$0xff]   ;;  %v454_v22 = vshrl.u32 %v2704_v43, 16  ;;  %v508_v4 = vrot.slane %v1897_v52, 1 }
  0x3f   : > { %2158 = vmatpush3.bf16.msra.mxu1 %v2328_v15  ;;  %2119 = vmatprep.subr.bf16.mxu0 %v2329_v21  ;;  %v451_v15 = vrot.slane %v449_v27, 1  ;;  %v1946_v17 = vcombine.low %v345_v6, %v352_v10  ;;  %v2347_v20 = vld [vmem:[%s2978_s1 + $0x100] sm:$0xff]   ;;  %v1923_v21 = vcombine.low %v2642_v1, %v2644_v2  ;;  %v431_v27 = vor.u32 %v2666_v18, %v426_v41  ;;  %v2761_v2 = vld [vmem:[%s2520_s27 + $0x10] sm:$0xf] }
  0x40   : > { %2159 = vmatprep.subr.bf16.mxu1 %v2330_v24  ;;  %1458 = vmatprep.mubr.bf16.mxu1 %v1948_v44  ;;  %v2348_v24 = vld [vmem:[%s2978_s1 + $0x180] sm:$0xff]   ;;  %v438_v1 = vor.u32 %v2678_v25, %v433_v51  ;;  %v1902_v39 = vcombine.low %v2761_v2, %v2767_v29  ;;  %v2782_v51 = vld [vmem:[%s2978_s1 + $0x238] sm:$0xff]   ;;  %v461_v18 = vshrl.u32 %v2714_v50, 16  ;;  %v470_v25 = vshll.u32 %v2747_v8, 16 }
  0x41   : > { %1393 = vmatprep.mubr.bf16.mxu0 %v1946_v17  ;;  %v2787_v35 = vrot.slane %v463_v7, 1  ;;  %v2794_v47 = vld [vmem:[%s2520_s27 + $0x20] sm:$0xf]  ;;  %v452_v6 = vor.u32 %v451_v15, %v447_v59  ;;  %v1842_v59 = vld [vmem:[%s2520_s27 + $0x28] sm:$0xe] }
  0x42   : > { %2120 = vmatpush3.bf16.msra.mxu0 %v2331_v26  ;;  %v2752_v26 = vrot.slane %v456_v0, 1  ;;  %v554_v31 = vshrl.u32 %v1902_v39, 16  ;;  %v556_v33 = vshll.u32 %v1902_v39, 16  ;;  %v1922_v36 = vcombine.low %v431_v27, %v438_v1  ;;  %v1843_v15 = vld [vmem:[%s2520_s27 + $0x30] sm:$0xe]  ;;  %v2847_v39 = vld [vmem:[%s2978_s1 + $0x220] sm:$0xff]  }
  0x43   : > { %2160 = vmatpush3.bf16.msra.mxu1 %v2332_v28  ;;  %2121 = vmatprep.subr.bf16.mxu0 %v2341_v58  ;;  %v2764_v28 = vld [vmem:[%s2520_s27 + $0x18] sm:$0xf]  ;;  %v445_v58 = vor.u32 %v2697_v42, %v440_v37  ;;  %v1904_v57 = vcombine.low %v2794_v47, %v2802_v55  ;;  %v2820_v37 = vrot.slane %v470_v25, 1  ;;  %v475_v1 = vshrl.u32 %v2770_v30, 16 }
  0x44   : > { %2161 = vmatprep.subr.bf16.mxu1 %v2342_v62  ;;  %v1903_v41 = vcombine.low %v2764_v28, %v2773_v32  ;;  %v558_v49 = vrot.slane %v556_v33, 1  ;;  %v2813_v62 = vld [vmem:[%s2520_s27 + $0x2c] sm:$0x1]  ;;  %v1924_v10 = vcombine.low %v2761_v2, %v2764_v28  ;;  %v2841_v27 = vld [vmem:[%s2520_s27 + $0x38] sm:$0xf] }
  0x45   : > { %1394 = vmatmul.mubr.bf16.gmra.mxu0 %v1945_v12  ;;  %v1905_v9 = vcombine.low %v2799_v54, %v2813_v62  ;;  %v568_v5 = vshrl.u32 %v1904_v57, 16  ;;  %v1932_v12 = vcombine.low %v507_v61, %v508_v4  ;;  %v1931_v28 = vcombine.low %v445_v58, %v452_v6  ;;  %v2872_v58 = vld [vmem:[%s2520_s27 + $0x40] sm:$0xf] }
  0x46   : > { %2122 = vmatpush3.bf16.msra.mxu0 %v2343_v63  ;;  %1459 = vmatmul.mubr.bf16.gmra.mxu1 %v1947_v13  ;;  %v561_v40 = vshrl.u32 %v1903_v41, 16  ;;  %v563_v44 = vshll.u32 %v1903_v41, 16  ;;  %v468_v63 = vshrl.u32 %v2747_v8, 16  ;;  %v559_v0 = vor.u32 %v558_v49, %v554_v31  ;;  %v2850_v41 = vld [vmem:[%s2520_s27 + $0x34] sm:$0x1] }
  0x47   : > { %2162 = vmatpush3.bf16.msra.mxu1 %v2344_v56  ;;  %2123 = vmatprep.subr.bf16.mxu0 %v2345_v14  ;;  %v570_v56 = vshll.u32 %v1904_v57, 16  ;;  %v575_v13 = vshrl.u32 %v1905_v9, 16  ;;  %v577_v14 = vshll.u32 %v1905_v9, 16  ;;  %v1933_v61 = vcombine.low %v2794_v47, %v2799_v54 }
  0x48   : > { %2163 = vmatprep.subr.bf16.mxu1 %v2346_v19  ;;  %1499 = vmatprep.mubr.bf16.mxu0 %v1923_v21  ;;  %v565_v60 = vrot.slane %v563_v44, 1  ;;  %v1899_v21 = vcombine.low %v1843_v15, %v2700_v38  ;;  %v1844_v44 = vld [vmem:[%s2520_s27 + $0x38] sm:$0xe] }
  0x49   : > { %v572_v17 = vrot.slane %v570_v56, 1  ;;  %v579_v19 = vrot.slane %v577_v14, 1  ;;  %v1900_v50 = vcombine.low %v1844_v44, %v2724_v3 }
  0x4a   : > { %2124 = vmatpush3.bf16.msra.mxu0 %v2347_v20  ;;  %v566_v42 = vor.u32 %v565_v60, %v561_v40  ;;  %v1898_v20 = vcombine.low %v1842_v59, %v2673_v23  ;;  %v2853_v23 = vld [vmem:[%s2520_s27 + $0x3c] sm:$0x1]  ;;  %v510_v31 = vrot.slane %v1899_v21, 1  ;;  %v466_v40 = vor.u32 %v2787_v35, %v461_v18  ;;  %v2875_v60 = vld [vmem:[%s2520_s27 + $0x48] sm:$0xf] }
  0x4b   : > { %2164 = vmatpush3.bf16.msra.mxu1 %v2348_v24  ;;  %2201 = vmatprep.subr.bf16.mxu0 %v2782_v51  ;;  %v2838_v24 = vld [vmem:[%s2520_s27 + $0x30] sm:$0xf]  ;;  %v573_v2 = vor.u32 %v572_v17, %v568_v5  ;;  %v580_v38 = vor.u32 %v579_v19, %v575_v13  ;;  %v1907_v34 = vcombine.low %v2841_v27, %v2853_v23  ;;  %v2880_v18 = vld [vmem:[%s2520_s27 + $0x44] sm:$0x1]  ;;  %v2883_v35 = vld [vmem:[%s2520_s27 + $0x4c] sm:$0x1] }
  0x4c   : > { %2225 = vmatprep.subr.bf16.mxu1 %v2782_v51  ;;  %v1925_v7 = vcombine.low %v559_v0, %v566_v42  ;;  %v509_v25 = vrot.slane %v1898_v20, 1  ;;  %v1906_v33 = vcombine.low %v2838_v24, %v2850_v41  ;;  %v1908_v0 = vcombine.low %v2872_v58, %v2880_v18  ;;  %v1863_v17 = vld [vmem:[%s2520_s27 + $0x18] sm:$0xe] }
  0x4d   : > { %1500 = vmatmul.mubr.bf16.vlgmr.msra.gmra.mxu0 %v1922_v36  ;;  %v459_v36 = vor.u32 %v2752_v26, %v454_v22  ;;  %v589_v43 = vshrl.u32 %v1907_v34, 16  ;;  %v591_v22 = vshll.u32 %v1907_v34, 16  ;;  %v1901_v26 = vcombine.low %v1845_v45, %v2730_v11  ;;  %v2368_v11 = vld [vmem:[%s2978_s1 + $0x218] sm:$0xff]  }
  0x4e   : > { %2202 = vmatpush3.bf16.msra.mxu0 %v2782_v51  ;;  %1507 = vmatprep.mubr.bf16.mxu0 %v1932_v12  ;;  %v1941_v46 = vcombine.low %v509_v25, %v510_v31  ;;  %v582_v49 = vshrl.u32 %v1906_v33, 16  ;;  %v584_v52 = vshll.u32 %v1906_v33, 16  ;;  %v1909_v4 = vcombine.low %v2875_v60, %v2883_v35  ;;  %v1864_v31 = vld [vmem:[%s2520_s27 + $0x20] sm:$0xe]  ;;  %v1865_v33 = vld [vmem:[%s2520_s27 + $0x28] sm:$0xe] }
  0x4f   : > { %2203 = vmatprep.subr.bf16.mxu0 %v2810_v53  ;;  %1564 = vmatprep.mubr.bf16.mxu1 %v1925_v7  ;;  %v593_v3 = vrot.slane %v591_v22, 1  ;;  %v511_v9 = vrot.slane %v1900_v50, 1  ;;  %v512_v47 = vrot.slane %v1901_v26, 1  ;;  %v596_v42 = vshrl.u32 %v1908_v0, 16  ;;  %v1862_v7 = vld [vmem:[%s2520_s27 + $0x10] sm:$0xe] }
  0x50   : > { %1565 = vmatmul.mubr.bf16.vlgmr.msra.gmra.mxu1 %v1924_v10  ;;  %v586_v57 = vrot.slane %v584_v52, 1  ;;  %v598_v5 = vshll.u32 %v1908_v0, 16  ;;  %v1940_v6 = vcombine.low %v459_v36, %v466_v40  ;;  %v603_v10 = vshrl.u32 %v1909_v4, 16  ;;  %v1868_v36 = vld [vmem:[%s2520_s27 + $0x40] sm:$0xe] }
  0x51   : > { %2233 = vmatpush3.bf16.msra.mxu1 %v2782_v51  ;;  %v1934_v51 = vcombine.low %v573_v2, %v580_v38  ;;  %v594_v56 = vor.u32 %v593_v3, %v589_v43  ;;  %v605_v12 = vshll.u32 %v1909_v4, 16  ;;  %v1950_v13 = vcombine.low %v511_v9, %v512_v47  ;;  %v1866_v2 = vld [vmem:[%s2520_s27 + $0x30] sm:$0xe]  ;;  %v1869_v40 = vld [vmem:[%s2520_s27 + $0x48] sm:$0xe] }
  0x52   : > { %2204 = vmatpush3.bf16.msra.mxu0 %v2810_v53  ;;  %2226 = vmatprep.subr.bf16.mxu1 %v2810_v53  ;;  %v587_v54 = vor.u32 %v586_v57, %v582_v49  ;;  %v600_v14 = vrot.slane %v598_v5, 1  ;;  %v1910_v19 = vcombine.low %v1862_v7, %v2767_v29  ;;  %v1911_v21 = vcombine.low %v1863_v17, %v2773_v32 }
  0x53   : > { %2205 = vmatprep.subr.bf16.mxu0 %v2831_v16  ;;  %1572 = vmatprep.mubr.bf16.mxu1 %v1934_v51  ;;  %v607_v15 = vrot.slane %v605_v12, 1  ;;  %v473_v38 = vor.u32 %v2820_v37, %v468_v63  ;;  %v1942_v29 = vcombine.low %v2838_v24, %v2841_v27  ;;  %v1914_v63 = vcombine.low %v1866_v2, %v2850_v41  ;;  %v2377_v37 = vld [vmem:[%s2978_s1 + $0x208] sm:$0xff]   ;;  %v2378_v41 = vld [vmem:[%s2978_s1 + $0x200] sm:$0xff]  }
  0x54   : > { %v1943_v59 = vcombine.low %v587_v54, %v594_v56  ;;  %v601_v20 = vor.u32 %v600_v14, %v596_v42  ;;  %v633_v32 = vrot.slane %v1910_v19, 1  ;;  %v634_v34 = vrot.slane %v1911_v21, 1 }
  0x55   : > { %1508 = vmatmul.mubr.bf16.gmra.mxu0 %v1931_v28  ;;  %2234 = vmatpush3.bf16.msra.mxu1 %v2810_v53  ;;  %v479_v53 = vrot.slane %v477_v48, 1  ;;  %v2369_v48 = vld [vmem:[%s2978_s1 + $0x210] sm:$0xff]   ;;  %v1867_v28 = vld [vmem:[%s2520_s27 + $0x38] sm:$0xe]  ;;  %v1912_v24 = vcombine.low %v1864_v31, %v2802_v55  ;;  %v1913_v27 = vcombine.low %v1865_v33, %v2813_v62  ;;  %v1916_v62 = vcombine.low %v1868_v36, %v2880_v18  ;;  %s2028_s27 = sshll.u32 %s2994_s13, 6 }
  0x56   : > { %2206 = vmatpush3.bf16.msra.mxu0 %v2831_v16  ;;  %2227 = vmatprep.subr.bf16.mxu1 %v2831_v16  ;;  %v1915_v30 = vcombine.low %v1867_v28, %v2853_v23  ;;  %v637_v23 = vrot.slane %v1914_v63, 1  ;;  %v1917_v51 = vcombine.low %v1869_v40, %v2883_v35  ;;  %s2958_s17 = scalar_lea.vmem %s2979_s2, %s2028_s27 }
  0x57   : > { %2207 = vmatprep.subr.bf16.mxu0 %v2847_v39  ;;  %1515 = vmatprep.mubr.bf16.mxu0 %v1941_v46  ;;  %v480_v25 = vor.u32 %v479_v53, %v475_v1  ;;  %v635_v45 = vrot.slane %v1912_v24, 1  ;;  %v636_v55 = vrot.slane %v1913_v27, 1  ;;  %v1951_v46 = vcombine.low %v2872_v58, %v2875_v60 }
  0x58   : > { %1573 = vmatmul.mubr.bf16.gmra.mxu1 %v1933_v61  ;;  %v638_v44 = vrot.slane %v1915_v30, 1  ;;  %v639_v43 = vrot.slane %v1916_v62, 1  ;;  %v640_v22 = vrot.slane %v1917_v51, 1 }
  0x59   : > { %2235 = vmatpush3.bf16.msra.mxu1 %v2831_v16  ;;  %1580 = vmatprep.mubr.bf16.mxu1 %v1943_v59  ;;  %v608_v16 = vor.u32 %v607_v15, %v603_v10  ;;  %v1949_v1 = vcombine.low %v473_v38, %v480_v25  ;;  %v1935_v52 = vcombine.low %v635_v45, %v636_v55 }
  0x5a   : > { %2208 = vmatpush3.bf16.msra.mxu0 %v2847_v39  ;;  %2228 = vmatprep.subr.bf16.mxu1 %v2847_v39  ;;  %v1944_v49 = vcombine.low %v637_v23, %v638_v44  ;;  %v1953_v50 = vcombine.low %v639_v43, %v640_v22 }
  0x5b   : > { %2209 = vmatprep.subr.bf16.mxu0 %v2368_v11  ;;  %v1952_v8 = vcombine.low %v601_v20, %v608_v16 }
  0x5d   : > { %1516 = vmatmul.mubr.bf16.gmra.mxu0 %v1940_v6  ;;  %2236 = vmatpush3.bf16.msra.mxu1 %v2847_v39  ;;  %v1926_v39 = vcombine.low %v633_v32, %v634_v34 }
  0x5e   : > { %2210 = vmatpush3.bf16.msra.mxu0 %v2368_v11  ;;  %1523 = vmatprep.mubr.bf16.mxu0 %v1950_v13 }
  0x5f   : > { %2211 = vmatprep.subr.bf16.mxu0 %v2369_v48  ;;  %2229 = vmatprep.subr.bf16.mxu1 %v2368_v11 }
  0x60   : > { %1581 = vmatmul.mubr.bf16.gmra.mxu1 %v1942_v29 }
  0x61   : > { %2237 = vmatpush3.bf16.msra.mxu1 %v2368_v11  ;;  %1588 = vmatprep.mubr.bf16.mxu1 %v1952_v8 }
  0x62   : > { %2212 = vmatpush3.bf16.msra.mxu0 %v2369_v48  ;;  %2230 = vmatprep.subr.bf16.mxu1 %v2369_v48 }
  0x63   : > { %2213 = vmatprep.subr.bf16.mxu0 %v2377_v37 }
  0x65   : > { %1524 = vmatmul.mubr.bf16.gmra.mxu0 %v1949_v1  ;;  %2238 = vmatpush3.bf16.msra.mxu1 %v2369_v48 }
  0x66   : > { %2214 = vmatpush3.bf16.msra.mxu0 %v2377_v37  ;;  %2217 = vmatprep.mubr.bf16.mxu0 %v1926_v39 }
  0x67   : > { %2215 = vmatprep.subr.bf16.mxu0 %v2378_v41  ;;  %2231 = vmatprep.subr.bf16.mxu1 %v2377_v37 }
  0x68   : > { %1589 = vmatmul.mubr.bf16.gmra.mxu1 %v1951_v46 }
  0x69   : > { %2239 = vmatpush3.bf16.msra.mxu1 %v2377_v37  ;;  %2221 = vmatprep.mubr.bf16.mxu1 %v1944_v49 }
  0x6a   : > { %2216 = vmatpush3.bf16.msra.mxu0 %v2378_v41  ;;  %2232 = vmatprep.subr.bf16.mxu1 %v2378_v41 }
  0x6d   : > { %2218 = vmatmul.mubr.bf16.vlgmr.msra.gmra.mxu0 %v1935_v52  ;;  %2240 = vmatpush3.bf16.msra.mxu1 %v2378_v41 }
  0x70   : > { %2222 = vmatmul.mubr.bf16.vlgmr.msra.gmra.mxu1 %v1953_v50 }
  0xed   : > { %v2045_v26 = vpop.f32.mrf.mxu0 }
  0xee   : > { %v2085_v58 = vpop.f32.mrf.mxu1 }
  0xef   : > { %v2046_v60 = vpop.f32.mrf.mxu0 }
  0xf0   : > { %v2086_v18 = vpop.f32.mrf.mxu1  ;;  %v2047_v45 = vadd.f32 %v2046_v60, %v2045_v26 }
  0xf1   : > { %v2048_v61 = vpop.f32.mrf.mxu0  ;;  %v2087_v55 = vadd.f32 %v2086_v18, %v2085_v58 }
  0xf2   : > { %v2088_v35 = vpop.f32.mrf.mxu1 }
  0xf3   : > { %v2049_v0 = vpop.f32.mrf.mxu0 }
  0xf4   : > { %v2089_v57 = vpop.f32.mrf.mxu1  ;;  %v2050_v49 = vadd.f32 %v2049_v0, %v2048_v61 }
  0xf5   : > { %v2051_v11 = vpop.f32.mrf.mxu0  ;;  %v2090_v52 = vadd.f32 %v2089_v57, %v2088_v35 }
  0xf6   : > { %v2091_v4 = vpop.f32.mrf.mxu1 }
  0xf7   : > { %v2052_v9 = vpop.f32.mrf.mxu0 }
  0xf8   : > { %v2092_v3 = vpop.f32.mrf.mxu1  ;;  %v2053_v41 = vadd.f32 %v2052_v9, %v2051_v11 }
  0xf9   : > { %v2054_v54 = vpop.f32.mrf.mxu0  ;;  %v2093_v23 = vadd.f32 %v2092_v3, %v2091_v4 }
  0xfa   : > { %v2094_v47 = vpop.f32.mrf.mxu1 }
  0xfb   : > { %v2055_v5 = vpop.f32.mrf.mxu0 }
  0xfc   : > { %v2095_v42 = vpop.f32.mrf.mxu1 }
  0xfd   : > { %v2057_v56 = vpop.f32.mrf.mxu0 }
  0xfe   : > { %v2097_v53 = vpop.f32.mrf.mxu1 }
  0xff   : > { %v2058_v10 = vpop.f32.mrf.mxu0 }
 0x100   : > { %v2098_v6 = vpop.f32.mrf.mxu1  ;;  %v2059_v9 = vadd.f32 %v2058_v10, %v2057_v56 }
 0x101   : > { %v2940_v13 = vpop.f32.mrf.mxu0  ;;  %v2099_v11 = vadd.f32 %v2098_v6, %v2097_v53 }
 0x102   : > { %v2938_v12 = vpop.f32.mrf.mxu1  ;;  %2982 = vst [vmem:[#allocation3_spill] sm:$0xff] %v2940_v13  ;;  %v1437_v13 = vadd.f32 %v2087_v55, %v2047_v45 }
 0x103   : > { %2981 = vst [vmem:[#allocation2_spill] sm:$0xff] %v2938_v12  ;;  %v2944_v7 = vpop.f32.mrf.mxu0 }
 0x104   : > { %v2942_v14 = vpop.f32.mrf.mxu1  ;;  %2984 = vst [vmem:[#allocation5_spill] sm:$0xff] %v2944_v7 }
 0x105   : > { %2983 = vst [vmem:[#allocation4_spill] sm:$0xff] %v2942_v14  ;;  %v2063_v59 = vpop.f32.mrf.mxu0  ;;  %v2096_v14 = vadd.f32 %v2095_v42, %v2094_v47 }
 0x106   : > { %v2103_v17 = vpop.f32.mrf.mxu1 }
 0x107   : > { %v2064_v15 = vpop.f32.mrf.mxu0 }
 0x108   : > { %v2104_v48 = vpop.f32.mrf.mxu1  ;;  %v2065_v43 = vadd.f32 %v2064_v15, %v2063_v59  ;;  %v1440_v59 = vadd.f32 %v2090_v52, %v2050_v49 }
 0x109   : > { %v2066_v19 = vpop.f32.mrf.mxu0  ;;  %v2105_v22 = vadd.f32 %v2104_v48, %v2103_v17  ;;  %v2987_v56 = vld [vmem:[#allocation3_spill] sm:$0xff] }
 0x10a   : > { %v2106_v20 = vpop.f32.mrf.mxu1  ;;  %v2989_v10 = vld [vmem:[#allocation2_spill] sm:$0xff] }
 0x10b   : > { %v2067_v21 = vpop.f32.mrf.mxu0  ;;  %v1461_v61 = vadd.f32 %v2105_v22, %v2065_v43  ;;  %v2988_v53 = vld [vmem:[#allocation5_spill] sm:$0xff] }
 0x10c   : > { %v2107_v28 = vpop.f32.mrf.mxu1  ;;  %v2068_v35 = vadd.f32 %v2067_v21, %v2066_v19  ;;  %v2062_v6 = vadd.f32 %v2988_v53, %v2987_v56  ;;  %v2990_v48 = vld [vmem:[#allocation4_spill] sm:$0xff] }
 0x10d   : > { %v2125_v2 = vpop.f32.mrf.mxu0  ;;  %v2108_v57 = vadd.f32 %v2107_v28, %v2106_v20  ;;  %v2102_v15 = vadd.f32 %v2990_v48, %v2989_v10 }
 0x10f   : > { %v2126_v16 = vpop.f32.mrf.mxu0 }
 0x110   : > { %v2165_v25 = vpop.f32.mrf.mxu1  ;;  %v2127_v12 = vadd.f32 %v2126_v16, %v2125_v2 }
 0x111   : > { %v2128_v38 = vpop.f32.mrf.mxu0 }
 0x112   : > { %v2166_v33 = vpop.f32.mrf.mxu1  ;;  %v1502_v47 = vadd.f32 %v2127_v12, %v1437_v13 }
 0x113   : > { %v2129_v31 = vpop.f32.mrf.mxu0  ;;  %v2167_v42 = vadd.f32 %v2166_v33, %v2165_v25 }
 0x114   : > { %v2946_v32 = vpop.f32.mrf.mxu1  ;;  %v2130_v0 = vadd.f32 %v2129_v31, %v2128_v38  ;;  %v1453_v38 = vadd.f32 %v2099_v11, %v2059_v9 }
 0x115   : > { %v2131_v29 = vpop.f32.mrf.mxu0  ;;  %2985 = vst [vmem:[#allocation6_spill] sm:$0xff] %v2946_v32  ;;  %v2056_v32 = vadd.f32 %v2055_v5, %v2054_v54 }
 0x116   : > { %v2948_v8 = vpop.f32.mrf.mxu1  ;;  %v1505_v12 = vadd.f32 %v2130_v0, %v1440_v59 }
 0x117   : > { %v2132_v34 = vpop.f32.mrf.mxu0  ;;  %2986 = vst [vmem:[#allocation7_spill] sm:$0xff] %v2948_v8  ;;  %v1445_v8 = vadd.f32 %v2093_v23, %v2053_v41  ;;  %v1448_v54 = vadd.f32 %v2096_v14, %v2056_v32  ;;  %v1464_v14 = vadd.f32 %v2108_v57, %v2068_v35  ;;  %v1456_v41 = vadd.f32 %v2102_v15, %v2062_v6 }
 0x118   : > { %v2171_v30 = vpop.f32.mrf.mxu1  ;;  %v2133_v51 = vadd.f32 %v2132_v34, %v2131_v29 }
 0x119   : > { %v2134_v63 = vpop.f32.mrf.mxu0 }
 0x11a   : > { %v2172_v24 = vpop.f32.mrf.mxu1  ;;  %v1510_v26 = vadd.f32 %v2133_v51, %v1445_v8 }
 0x11b   : > { %v2135_v37 = vpop.f32.mrf.mxu0  ;;  %v2173_v58 = vadd.f32 %v2172_v24, %v2171_v30 }
 0x11c   : > { %v2174_v1 = vpop.f32.mrf.mxu1  ;;  %v2136_v60 = vadd.f32 %v2135_v37, %v2134_v63  ;;  %v2991_v31 = vld [vmem:[#allocation6_spill] sm:$0xff]  ;;  %v1567_v37 = vadd.f32 %v2167_v42, %v1502_v47 }
 0x11d   : > { %v2137_v27 = vpop.f32.mrf.mxu0  ;;  %v1575_v28 = vadd.f32 %v2173_v58, %v1510_v26 }
 0x11e   : > { %v2175_v39 = vpop.f32.mrf.mxu1  ;;  %v1513_v34 = vadd.f32 %v2136_v60, %v1448_v54  ;;  %v2992_v33 = vld [vmem:[#allocation7_spill] sm:$0xff] }
 0x11f   : > { %v2138_v36 = vpop.f32.mrf.mxu0  ;;  %v2176_v19 = vadd.f32 %v2175_v39, %v2174_v1  ;;  %v2170_v32 = vadd.f32 %v2992_v33, %v2991_v31  ;;  %v1710_v31 = vlaneseq }
 0x120   : > { %v2177_v44 = vpop.f32.mrf.mxu1  ;;  %v2139_v2 = vadd.f32 %v2138_v36, %v2137_v27 }
 0x121   : > { %v2140_v40 = vpop.f32.mrf.mxu0  ;;  %v1578_v55 = vadd.f32 %v2176_v19, %v1513_v34  ;;  %v1570_v43 = vadd.f32 %v2170_v32, %v1505_v12  ;;  %vm1724_vm0 = vcmp.lt.s32.totalorder %v1710_v31, 256 }
 0x122   : > { %v2178_v46 = vpop.f32.mrf.mxu1  ;;  %v1518_v24 = vadd.f32 %v2139_v2, %v1453_v38 }
 0x123   : > { %v2141_v62 = vpop.f32.mrf.mxu0  ;;  %v2179_v27 = vadd.f32 %v2178_v46, %v2177_v44 }
 0x124   : > { %v2180_v7 = vpop.f32.mrf.mxu1  ;;  %v2142_v8 = vadd.f32 %v2141_v62, %v2140_v40 }
 0x125   : > { %v2143_v50 = vpop.f32.mrf.mxu0  ;;  %v1583_v22 = vadd.f32 %v2179_v27, %v1518_v24 }
 0x126   : > { %v2181_v18 = vpop.f32.mrf.mxu1  ;;  %v1521_v52 = vadd.f32 %v2142_v8, %v1456_v41 }
 0x127   : > { %v2144_v4 = vpop.f32.mrf.mxu0  ;;  %v2182_v44 = vadd.f32 %v2181_v18, %v2180_v7 }
 0x128   : > { %v2145_v3 = vadd.f32 %v2144_v4, %v2143_v50  ;;  %v2183_v5 = vpop.f32.mrf.mxu1 }
 0x129   : > { %v2146_v17 = vpop.f32.mrf.mxu0  ;;  %v1586_v57 = vadd.f32 %v2182_v44, %v1521_v52 }
 0x12a   : > { %v1526_v16 = vadd.f32 %v2145_v3, %v1461_v61  ;;  %v2184_v20 = vpop.f32.mrf.mxu1 }
 0x12b   : > { %v2147_v29 = vpop.f32.mrf.mxu0  ;;  %v2185_v13 = vadd.f32 %v2184_v20, %v2183_v5 }
 0x12c   : > { %v2148_v21 = vadd.f32 %v2147_v29, %v2146_v17  ;;  %v2186_v63 = vpop.f32.mrf.mxu1 }
 0x12d   : > { %v2219_v25 = vpop.f32.mrf.mxu0  ;;  %v1591_v36 = vadd.f32 %v2185_v13, %v1526_v16  ;;  %v2391_v13 = vmov 1966171168  }
 0x12e   : > { %v1640_v30 = vadd.f32 %v2219_v25, %v1575_v28  ;;  %v1529_v1 = vadd.f32 %v2148_v21, %v1464_v14  ;;  %v2187_v23 = vpop.f32.mrf.mxu1  ;;  %v1708_v25 = vunpack.c.l.s4 %v2391_v13 }
 0x12f   : > { %v1631_v39 = vpop.f32.mrf.mxu0  ;;  %v2188_v51 = vadd.f32 %v2187_v23, %v2186_v63 }
 0x130   : > { %1664 = vst [vmem:[%s2958_s17 + $0x10] sm:$0xff] %v1640_v30  ;;  %v1632_v45 = vadd.f32 %v1631_v39, %v1567_v37  ;;  %v2223_v40 = vpop.f32.mrf.mxu1  ;;  %v1685_v7 = vmul.f32 %v1640_v30, %v1640_v30  ;;  %v1711_v37 = vshrl.u32 %v1710_v31, 7 }
 0x131   : > { %v2220_v49 = vpop.f32.mrf.mxu0  ;;  %v1656_v46 = vadd.f32 %v2223_v40, %v1591_v36  ;;  %v1594_v50 = vadd.f32 %v2188_v51, %v1529_v1 }
 0x132   : > { %1662 = vst [vmem:[%s2958_s17] sm:$0xff] %v1632_v45  ;;  %v1643_v62 = vadd.f32 %v2220_v49, %v1578_v55  ;;  %v1647_v11 = vpop.f32.mrf.mxu1  ;;  %v1683_v58 = vmul.f32 %v1632_v45, %v1632_v45 }
 0x133   : > { %v1634_v9 = vpop.f32.mrf.mxu0  ;;  %1668 = vst [vmem:[%s2958_s17 + $0x30] sm:$0xff] %v1656_v46  ;;  %v1648_v26 = vadd.f32 %v1647_v11, %v1583_v22  ;;  %v1689_v15 = vmul.f32 %v1656_v46, %v1656_v46 }
 0x134   : > { %1665 = vst [vmem:[%s2958_s17 + $0x18] sm:$0xff] %v1643_v62  ;;  %v1635_v4 = vadd.f32 %v1634_v9, %v1570_v43  ;;  %v2224_v60 = vpop.f32.mrf.mxu1  ;;  %v1686_v54 = vmul.f32 %v1643_v62, %v1643_v62 }
 0x135   : > { %1666 = vst [vmem:[%s2958_s17 + $0x20] sm:$0xff] %v1648_v26  ;;  %v1659_v35 = vadd.f32 %v2224_v60, %v1594_v50  ;;  %v1687_v5 = vmul.f32 %v1648_v26, %v1648_v26 }
 0x136   : > { %1663 = vst [vmem:[%s2958_s17 + $0x8] sm:$0xff] %v1635_v4  ;;  %v1670_v3 = vadd.f32 %v1635_v4, %v1632_v45  ;;  %v1684_v61 = vmul.f32 %v1635_v4, %v1635_v4  ;;  %v1650_v17 = vpop.f32.mrf.mxu1 }
 0x137   : > { %1669 = vst [vmem:[%s2958_s17 + $0x38] sm:$0xff] %v1659_v35  ;;  %v1651_v59 = vadd.f32 %v1650_v17, %v1586_v57  ;;  %v1690_v29 = vmul.f32 %v1659_v35, %v1659_v35 }
 0x138   : > { %v1671_v18 = vadd.f32 %v1670_v3, %v1640_v30  ;;  %v1691_v0 = vadd.f32 %v1684_v61, %v1683_v58  ;;  %v1709_v30 = vunpack.c.0.s8 %v1708_v25 }
 0x139   : > { %1667 = vst [vmem:[%s2958_s17 + $0x28] sm:$0xff] %v1651_v59  ;;  %v1688_v10 = vmul.f32 %v1651_v59, %v1651_v59 }
 0x13a   : > { %v1692_v47 = vadd.f32 %v1691_v0, %v1685_v7  ;;  %v1672_v42 = vadd.f32 %v1671_v18, %v1643_v62  ;;  %v1712_v36 = vsub.s32 %v1709_v30, %v1711_v37 }
 0x13c   : > { %v1673_v56 = vadd.f32 %v1672_v42, %v1648_v26  ;;  %v1693_v53 = vadd.f32 %v1692_v47, %v1686_v54 }
 0x13e   : > { %v1674_v6 = vadd.f32 %v1673_v56, %v1651_v59  ;;  %v1694_v48 = vadd.f32 %v1693_v53, %v1687_v5 }
 0x140   : > { %v1675_v2 = vadd.f32 %v1674_v6, %v1656_v46  ;;  %v1695_v16 = vadd.f32 %v1694_v48, %v1688_v10 }
 0x142   : > { %v1676_v34 = vadd.f32 %v1675_v2, %v1659_v35  ;;  %v1696_v19 = vadd.f32 %v1695_v16, %v1689_v15 }
 0x144   : > { %v1677_v20 = vrot.slane %v1676_v34, 4  ;;  %v1697_v21 = vadd.f32 %v1696_v19, %v1690_v29 }
 0x146   : > { %v1678_v28 = vadd.f32 %v1677_v20, %v1676_v34  ;;  %v1698_v38 = vrot.slane %v1697_v21, 4 }
 0x148   : > { %v1679_v14 = vrot.slane %v1678_v28, 2  ;;  %v1699_v12 = vadd.f32 %v1698_v38, %v1697_v21 }
 0x14a   : > { %v1680_v33 = vadd.f32 %v1679_v14, %v1678_v28  ;;  %v1700_v32 = vrot.slane %v1699_v12, 2 }
 0x14c   : > { %v1681_v8 = vrot.slane %v1680_v33, 1  ;;  %v1701_v63 = vadd.f32 %v1700_v32, %v1699_v12 }
 0x14e   : > { %v1702_v24 = vrot.slane %v1701_v63, 1  ;;  %v1682_v27 = vadd.f32 %v1681_v8, %v1680_v33 }
 0x150   : > { %v1703_v1 = vadd.f32 %v1702_v24, %v1701_v63 }
 0x152   : > { %v1706_v39 = vcombine.low %v1682_v27, %v1703_v1 }
 0x154   : > { %v1713_v41 = vrot.slane %v1706_v39, %v1712_v36 }
 0x156   : > { %v1720_v23 = vrot.slane %v1713_v41, %v1712_v36 }
 0x158   : > { %1726 = vst.msk [vmem:[%s181_s21] sm:$0x3] %vm1724_vm0, %v1720_v23 }
 0x159 PF: > { %s14_s12 = sadd.s32 1, %s2389_s12  }
 0x15a   : > { %p11_p4 = scmp.ge.s32.totalorder %s14_s12, 4  }
 0x15c   :  { %13 = sbr.rel (!%p11_p4) target bundleno = 1 (0x1), region = 72 }

// kernel: resnet18_forward.7
= control target key start
LH: loop header
LB: loop body
LE: loop exit
PB: predicated region body
PF: predicated region fallthrough
CT: control target
= control target key end

     0   :  { %s3435_s18 = smov 0   ;;  %s4217_s0 = inlined_call_operand.vmem [shape: f32[2,64,128], index: 0, kind: input, shape index: {}]   ;;  %s4218_s1 = inlined_call_operand.vmem [shape: f32[1,128], index: 1, kind: input, shape index: {}]   ;;  %s4219_s2 = inlined_call_operand.vmem [shape: f32[1,128], index: 2, kind: input, shape index: {}]   ;;  %s4220_s3 = inlined_call_operand.vmem [shape: bf16[1152,128], index: 3, kind: input, shape index: {}]   ;;  %s4221_s4 = inlined_call_operand.vmem [shape: f32[2,64,128], index: 4, kind: output, shape index: {0}]   ;;  %s4222_s5 = inlined_call_operand.vmem [shape: f32[2,1,256], index: 5, kind: output, shape index: {1}]  }
   0x1 LB: > { %s2756_s19 = sadd.s32 4294967295, %s3401_s18   ;;  %p2760_p0 = scmp.ge.s32.totalorder %s3401_s18, 1  ;;  %s3401_s18 = sphi %s3435_s18, %s16_s18  }
   0x2   : > { %p190_p1 = scmp.lt.s32.totalorder %s3401_s18, 3 }
   0x4   : > { %p191_p2 = pnand %p2760_p0, %p190_p1 }
   0x6   : > { %194 = sbr.rel (%p191_p2) target bundleno = 440 (0x1b8), region = 36 }
   0xb   : > { %v3278_v0 = vld [vmem:[%s4220_s3 + $0x78] sm:$0xff]   ;;  %v3282_v4 = vld [vmem:[%s4220_s3 + $0x70] sm:$0xff]   ;;  %v3403_v7 = vmov 0   ;;  %v3286_v9 = vld [vmem:[%s4220_s3 + $0x68] sm:$0xff]   ;;  %p222_p3 = scmp.lt.s32.totalorder %s2756_s19, 1  ;;  %vm291_vm0 = vcmask 1043459  }
   0xc   : > { %v3279_v1 = vld [vmem:[%s4220_s3 + $0xf8] sm:$0xff]   ;;  %3056 = vmatprep.subr.bf16.mxu0 %v3278_v0  ;;  %v3283_v5 = vld [vmem:[%s4220_s3 + $0xf0] sm:$0xff]   ;;  %360 = vst [vmem:[#allocation2 + $0x8] sm:$0xf] %v3403_v7  ;;  %368 = vst [vmem:[#allocation2 + $0x98] sm:$0xf] %v3403_v7 }
   0xd   : > { %v3280_v2 = vld [vmem:[%s4220_s3 + $0x38] sm:$0xff]   ;;  %3096 = vmatprep.subr.bf16.mxu1 %v3279_v1  ;;  %v3284_v6 = vld [vmem:[%s4220_s3 + $0x30] sm:$0xff]   ;;  %v3287_v10 = vld [vmem:[%s4220_s3 + $0xe8] sm:$0xff]   ;;  %s4254_s19 = smov (!%p222_p3, %s2756_s19), 1  ;;  %vm324_vm1 = vcmask 1040384   ;;  %vm2821_vm6 = vcmask 1043456 }
   0xe   : > { %v3281_v3 = vld [vmem:[%s4220_s3 + $0xb8] sm:$0xff]   ;;  %3057 = vmatpush3.bf16.msra.mxu0 %v3280_v2  ;;  %v3285_v8 = vld [vmem:[%s4220_s3 + $0xb0] sm:$0xff]   ;;  %v3288_v11 = vld [vmem:[%s4220_s3 + $0x28] sm:$0xff]   ;;  %s3054_s28 = sshll.u32 %s4254_s19, 6  ;;  %vm292_vm2 = vsmask.f32 7950 }
   0xf   : > { %3097 = vmatpush3.bf16.msra.mxu1 %v3281_v3  ;;  %3058 = vmatprep.subr.bf16.mxu0 %v3282_v4  ;;  %v3289_v12 = vld [vmem:[%s4220_s3 + $0xa8] sm:$0xff]   ;;  %v3290_v13 = vld [vmem:[%s4220_s3 + $0x60] sm:$0xff]   ;;  %v3294_v17 = vld [vmem:[%s4220_s3 + $0x58] sm:$0xff]   ;;  %s3545_s12 = scalar_lea.vmem %s4217_s0, %s3054_s28  ;;  %vm325_vm4 = vsmask.f32 256  ;;  %s4196_s16 = scalar_lea.vmem %s4221_s4, %s3054_s28 }
  0x10   : > { %3098 = vmatprep.subr.bf16.mxu1 %v3283_v5  ;;  %v3291_v14 = vld [vmem:[%s4220_s3 + $0xe0] sm:$0xff]   ;;  %v3295_v18 = vld [vmem:[%s4220_s3 + $0xd8] sm:$0xff]   ;;  %v3298_v21 = vld [vmem:[%s4220_s3 + $0x50] sm:$0xff]   ;;  %vm1038_vm7 = vsmask.f32 4368  ;;  %s2765_s28 = sshll.u32 %s4254_s19, 1 }
  0x11   : > { %v3292_v15 = vld [vmem:[%s4220_s3 + $0x20] sm:$0xff]   ;;  %v3296_v19 = vld [vmem:[%s4220_s3 + $0x18] sm:$0xff]   ;;  %v3299_v22 = vld [vmem:[%s4220_s3 + $0xd0] sm:$0xff]   ;;  %s235_s21 = scalar_lea.vmem %s4222_s5, %s2765_s28 }
  0x12   : > { %3059 = vmatpush3.bf16.msra.mxu0 %v3284_v6  ;;  %v3293_v16 = vld [vmem:[%s4220_s3 + $0xa0] sm:$0xff]   ;;  %v3297_v20 = vld [vmem:[%s4220_s3 + $0x98] sm:$0xff]   ;;  %v3300_v23 = vld [vmem:[%s4220_s3 + $0x10] sm:$0xff]  }
  0x13   : > { %3099 = vmatpush3.bf16.msra.mxu1 %v3285_v8  ;;  %3060 = vmatprep.subr.bf16.mxu0 %v3286_v9  ;;  %v3301_v24 = vld [vmem:[%s4220_s3 + $0x90] sm:$0xff]   ;;  %v3302_v25 = vld [vmem:[%s4220_s3 + $0x48] sm:$0xff]   ;;  %v3306_v29 = vld [vmem:[%s4220_s3 + $0x40] sm:$0xff]  }
  0x14   : > { %3100 = vmatprep.subr.bf16.mxu1 %v3287_v10  ;;  %v3303_v26 = vld [vmem:[%s4220_s3 + $0xc8] sm:$0xff]   ;;  %v3307_v30 = vld [vmem:[%s4220_s3 + $0xc0] sm:$0xff]   ;;  %vm3567_vm3 = vmand %vm291_vm0, %vm292_vm2 }
  0x15   : > { %v3304_v27 = vld [vmem:[%s4220_s3 + $0x8] sm:$0xff]   ;;  %v3308_v31 = vld [vmem:[%s4220_s3] sm:$0xff]   ;;  %v297_v40 = vld [vmem:[#allocation2 + $0x14] sm:$0x8] }
  0x16   : > { %3061 = vmatpush3.bf16.msra.mxu0 %v3288_v11  ;;  %v3305_v28 = vld [vmem:[%s4220_s3 + $0x88] sm:$0xff]   ;;  %v3309_v32 = vld [vmem:[%s4220_s3 + $0x80] sm:$0xff]   ;;  %v298_v41 = vsel %vm3567_vm3, 0, %v297_v40  ;;  %vm3575_vm5 = vmand %vm324_vm1, %vm325_vm4 }
  0x17   : > { %3101 = vmatpush3.bf16.msra.mxu1 %v3289_v12  ;;  %3062 = vmatprep.subr.bf16.mxu0 %v3290_v13  ;;  %v237_v33 = vld [vmem:[%s3545_s12] sm:$0xff]  ;;  %v238_v34 = vld [vmem:[%s3545_s12 + $0x8] sm:$0xff]  ;;  %299 = vst [vmem:[#allocation2 + $0x14] sm:$0x8] %v298_v41  ;;  %v330_v49 = vld [vmem:[#allocation2 + $0x1c] sm:$0x1] }
  0x18   : > { %3102 = vmatprep.subr.bf16.mxu1 %v3291_v14  ;;  %v3558_v35 = vld [vmem:[%s4218_s1] ss:$0 sm:$0xff]  ;;  %v300_v42 = vld [vmem:[#allocation2 + $0x24] sm:$0x8]  ;;  %v327_v44 = vld [vmem:[#allocation2 + $0xc] sm:$0x1] }
  0x19   : > { %v252_v36 = vmul.f32 %v3558_v35, %v237_v33  ;;  %v253_v37 = vmul.f32 %v3558_v35, %v238_v34  ;;  %v3565_v38 = vld [vmem:[%s4219_s2] ss:$0 sm:$0xff]  ;;  %v301_v47 = vsel %vm3567_vm3, 0, %v300_v42  ;;  %v328_v48 = vsel %vm3575_vm5, 0, %v327_v44  ;;  %v3585_v50 = vld [vmem:[#allocation2 + $0x8] sm:$0xf]  ;;  %vm3640_vm8 = vmor %vm325_vm4, %vm1038_vm7 }
  0x1a   : > { %3063 = vmatpush3.bf16.msra.mxu0 %v3292_v15  ;;  %302 = vst [vmem:[#allocation2 + $0x24] sm:$0x8] %v301_v47  ;;  %329 = vst [vmem:[#allocation2 + $0xc] sm:$0x1] %v328_v48  ;;  %v331_v51 = vsel %vm3575_vm5, 0, %v330_v49  ;;  %v2768_v53 = vcombine.low %v3585_v50, %v3585_v50  ;;  %v3316_v54 = vld [vmem:[%s4220_s3 + $0x178] sm:$0xff]  }
  0x1b   : > { %3103 = vmatpush3.bf16.msra.mxu1 %v3293_v16  ;;  %3064 = vmatprep.subr.bf16.mxu0 %v3294_v17  ;;  %v267_v45 = vadd.f32 %v3565_v38, %v252_v36  ;;  %v268_v46 = vadd.f32 %v3565_v38, %v253_v37  ;;  %v294_v52 = vld [vmem:[#allocation2 + $0x4] sm:$0x8]  ;;  %332 = vst [vmem:[#allocation2 + $0x1c] sm:$0x1] %v331_v51  ;;  %v3317_v58 = vld [vmem:[%s4220_s3 + $0x1f8] sm:$0xff]   ;;  %v239_v10 = vld [vmem:[%s3545_s12 + $0x10] sm:$0xff] }
  0x1c   : > { %3104 = vmatprep.subr.bf16.mxu1 %v3295_v18  ;;  %v295_v57 = vsel %vm3567_vm3, 0, %v294_v52  ;;  %v495_v59 = vshrl.u32 %v2768_v53, 16  ;;  %v498_v60 = vshll.u32 %v2768_v53, 16  ;;  %v254_v14 = vmul.f32 %v3558_v35, %v239_v10  ;;  %v240_v17 = vld [vmem:[%s3545_s12 + $0x18] sm:$0xff]  ;;  %v303_v18 = vld [vmem:[#allocation2 + $0x34] sm:$0x8] }
  0x1d   : > { %v275_v55 = vmax.f32 %v267_v45, 0.0  ;;  %v276_v56 = vmax.f32 %v268_v46, 0.0  ;;  %296 = vst [vmem:[#allocation2 + $0x4] sm:$0x8] %v295_v57 }
  0x1e   : > { %3065 = vmatpush3.bf16.msra.mxu0 %v3296_v19  ;;  %v497_v63 = vrot.slane %v495_v59, 4  ;;  %v500_v0 = vrot.slane %v498_v60, 5  ;;  %v306_v19 = vld [vmem:[#allocation2 + $0x44] sm:$0x8]  ;;  %v405_v33 = vld [vmem:[#allocation2 + $0x14] sm:$0x8] }
  0x1f   : > { %3105 = vmatpush3.bf16.msra.mxu1 %v3297_v20  ;;  %3066 = vmatprep.subr.bf16.mxu0 %v3298_v21  ;;  %v283_v61 = vpack.c.bf16 %v275_v55, %v275_v55  ;;  %v284_v62 = vpack.c.bf16 %v276_v56, %v276_v56  ;;  %v383_v45 = vld [vmem:[#allocation2 + $0x14] sm:$0x8] }
  0x20   : > { %3106 = vmatprep.subr.bf16.mxu1 %v3299_v22  ;;  %v3599_v1 = vor.u32 %v500_v0, %v497_v63 }
  0x21   : > { %373 = vst [vmem:[#allocation2 + $0x18] sm:$0xf] %v283_v61  ;;  %374 = vst [vmem:[#allocation2 + $0x28] sm:$0xf] %v284_v62  ;;  %v361_v2 = vld [vmem:[#allocation2 + $0xc] sm:$0x1] }
  0x22   : > { %3067 = vmatpush3.bf16.msra.mxu0 %v3300_v23  ;;  %v362_v3 = vsel %vm3575_vm5, 0, %v361_v2  ;;  %v398_v4 = vld [vmem:[#allocation2 + $0x1c] sm:$0x1]  ;;  %v2822_v5 = vsel %vm2821_vm6, %v3585_v50, %v3599_v1  ;;  %v407_v20 = vld [vmem:[#allocation2 + $0x24] sm:$0x8] }
  0x23   : > { %3107 = vmatpush3.bf16.msra.mxu1 %v3301_v24  ;;  %3068 = vmatprep.subr.bf16.mxu0 %v3302_v25  ;;  %363 = vst [vmem:[#allocation2 + $0xc] sm:$0x1] %v362_v3  ;;  %v1046_v7 = vshrl.u32 %v2822_v5, 16  ;;  %v1049_v9 = vshll.u32 %v2822_v5, 16  ;;  %v255_v24 = vmul.f32 %v3558_v35, %v240_v17  ;;  %v333_v25 = vld [vmem:[#allocation2 + $0x2c] sm:$0x1] }
  0x24   : > { %3108 = vmatprep.subr.bf16.mxu1 %v3303_v26  ;;  %v357_v6 = vld [vmem:[#allocation2 + $0x4] sm:$0x8]  ;;  %v336_v26 = vld [vmem:[#allocation2 + $0x3c] sm:$0x1]  ;;  %v334_v40 = vsel %vm3575_vm5, 0, %v333_v25 }
  0x25   : > { %v358_v8 = vsel %vm3567_vm3, 0, %v357_v6  ;;  %v1048_v16 = vrot.slane %v1046_v7, 7  ;;  %v270_v37 = vadd.f32 %v3565_v38, %v255_v24  ;;  %335 = vst [vmem:[#allocation2 + $0x2c] sm:$0x1] %v334_v40  ;;  %v337_v52 = vsel %vm3575_vm5, 0, %v336_v26 }
  0x26   : > { %3069 = vmatpush3.bf16.msra.mxu0 %v3304_v27  ;;  %359 = vst [vmem:[#allocation2 + $0x4] sm:$0x8] %v358_v8  ;;  %338 = vst [vmem:[#allocation2 + $0x3c] sm:$0x1] %v337_v52  ;;  %v3318_v52 = vld [vmem:[%s4220_s3 + $0x138] sm:$0xff]  }
  0x27   : > { %3109 = vmatpush3.bf16.msra.mxu1 %v3305_v28  ;;  %3070 = vmatprep.subr.bf16.mxu0 %v3306_v29  ;;  %v269_v28 = vadd.f32 %v3565_v38, %v254_v14  ;;  %v304_v29 = vsel %vm3567_vm3, 0, %v303_v18  ;;  %v278_v51 = vmax.f32 %v270_v37, 0.0  ;;  %v1051_v56 = vor.u32 %v1049_v9, %v1048_v16 }
  0x28   : > { %3110 = vmatprep.subr.bf16.mxu1 %v3307_v30  ;;  %v384_v11 = vld [vmem:[#allocation2 + $0x18] sm:$0xf]  ;;  %v3611_v13 = vld [vmem:[#allocation2 + $0x28] sm:$0xf]  ;;  %v307_v30 = vsel %vm3567_vm3, 0, %v306_v19 }
  0x29   : > { %v3609_v12 = vld [vmem:[#allocation2 + $0x18] sm:$0xf]  ;;  %v2777_v15 = vcombine.low %v384_v11, %v398_v4  ;;  %v609_v22 = vunpack.c.l.b16 %v3611_v13  ;;  %v2769_v23 = vcombine.low %v384_v11, %v384_v11  ;;  %305 = vst [vmem:[#allocation2 + $0x34] sm:$0x8] %v304_v29  ;;  %308 = vst [vmem:[#allocation2 + $0x44] sm:$0x8] %v307_v30 }
  0x2a   : > { %3071 = vmatpush3.bf16.msra.mxu0 %v3308_v31  ;;  %v607_v21 = vunpack.c.l.b16 %v3609_v12  ;;  %v3623_v31 = vld [vmem:[#allocation2 + $0x28] sm:$0xf]  ;;  %v277_v46 = vmax.f32 %v269_v28, 0.0 }
  0x2b   : > { %3111 = vmatpush3.bf16.msra.mxu1 %v3309_v32  ;;  %3136 = vmatprep.subr.bf16.mxu0 %v3316_v54  ;;  %v583_v27 = vrot.slane %v2777_v15, 5  ;;  %v397_v32 = vld [vmem:[#allocation2 + $0xc] sm:$0x1]  ;;  %v503_v34 = vshrl.u32 %v2769_v23, 16  ;;  %v506_v36 = vshll.u32 %v2769_v23, 16  ;;  %v3634_v59 = vcombine.low %v3623_v31, %v3623_v31 }
  0x2c   : > { %3176 = vmatprep.subr.bf16.mxu1 %v3317_v58  ;;  %v2776_v41 = vcombine.low %v3585_v50, %v397_v32  ;;  %v285_v50 = vpack.c.bf16 %v277_v46, %v277_v46  ;;  %v286_v58 = vpack.c.bf16 %v278_v51, %v278_v51  ;;  %v399_v14 = vld [vmem:[#allocation2 + $0x2c] sm:$0x1] }
  0x2d   : > { %v881_v42 = vunpack.c.h.b16 %v583_v27  ;;  %v2828_v44 = vcombine.low %v583_v27, %v407_v20  ;;  %v381_v47 = vld [vmem:[#allocation2 + $0x4] sm:$0x8]  ;;  %v505_v48 = vrot.slane %v503_v34, 4  ;;  %v508_v49 = vrot.slane %v506_v36, 5 }
  0x2e   : > { %v582_v53 = vrot.slane %v2776_v41, 5  ;;  %v2816_v55 = vcombine.low %v381_v47, %v3599_v1  ;;  %375 = vst [vmem:[#allocation2 + $0x38] sm:$0xf] %v285_v50  ;;  %376 = vst [vmem:[#allocation2 + $0x48] sm:$0xf] %v286_v58  ;;  %v511_v15 = vshrl.u32 %v3634_v59, 16  ;;  %v2778_v23 = vcombine.low %v3623_v31, %v399_v14 }
  0x2f   : > { %v974_v54 = vpack.c.b16 %v609_v22, %v881_v42  ;;  %v509_v57 = vor.u32 %v508_v49, %v505_v48  ;;  %v1119_v62 = vshrl.u32 %v2828_v44, 16  ;;  %v400_v22 = vld [vmem:[#allocation2 + $0x3c] sm:$0x1]  ;;  %v514_v28 = vshll.u32 %v3634_v59, 16  ;;  %v3320_v58 = vld [vmem:[%s4220_s3 + $0x170] sm:$0xff]  }
  0x30   : > { %v869_v60 = vunpack.c.h.b16 %v582_v53  ;;  %v2817_v61 = vcombine.low %v582_v53, %v405_v33  ;;  %v1041_v4 = vshrl.u32 %v2816_v55, 16  ;;  %v409_v26 = vld [vmem:[#allocation2 + $0x34] sm:$0x8]  ;;  %v513_v27 = vrot.slane %v511_v15, 4  ;;  %v241_v33 = vld [vmem:[%s3545_s12 + $0x20] sm:$0xff]  ;;  %v242_v55 = vld [vmem:[%s3545_s12 + $0x28] sm:$0xff] }
  0x31   : > { %v1124_v63 = vshrl.u32 %v974_v54, 16  ;;  %v1127_v0 = vshll.u32 %v974_v54, 16  ;;  %v2827_v2 = vcombine.low %v383_v45, %v509_v57  ;;  %v2833_v3 = vsel %vm2821_vm6, %v384_v11, %v509_v57  ;;  %v411_v53 = vld [vmem:[#allocation2 + $0x44] sm:$0x8]  ;;  %v3319_v50 = vld [vmem:[%s4220_s3 + $0x1b8] sm:$0xff]  }
  0x32   : > { %v964_v1 = vpack.c.b16 %v607_v21, %v869_v60  ;;  %v1054_v5 = vshrl.u32 %v2817_v61, 16  ;;  %v1111_v7 = vshrl.u32 %v2833_v3, 16  ;;  %v2904_v8 = vrot.slane %v1041_v4, 11  ;;  %v3321_v61 = vld [vmem:[%s4220_s3 + $0x1f0] sm:$0xff]  }
  0x33   : > { %v1126_v6 = vrot.slane %v1124_v63, 7  ;;  %v1106_v9 = vshrl.u32 %v2827_v2, 16  ;;  %v1114_v10 = vshll.u32 %v2833_v3, 16  ;;  %v2910_v18 = vrot.slane %v1119_v62, 11  ;;  %v3322_v62 = vld [vmem:[%s4220_s3 + $0x130] sm:$0xff]  }
  0x34   : > { %v1059_v11 = vshrl.u32 %v964_v1, 16  ;;  %v1062_v17 = vshll.u32 %v964_v1, 16  ;;  %v1113_v21 = vrot.slane %v1111_v7, 7  ;;  %v2905_v24 = vrot.slane %v1054_v5, 11  ;;  %v3323_v1 = vld [vmem:[%s4220_s3 + $0x1b0] sm:$0xff]  }
  0x35   : > { %v1129_v19 = vor.u32 %v1127_v0, %v1126_v6  ;;  %v2909_v20 = vrot.slane %v1106_v9, 11  ;;  %v1052_v29 = vsel %vm3640_vm8, %v2904_v8, %v1051_v56  ;;  %v584_v32 = vrot.slane %v2778_v23, 5  ;;  %v3651_v37 = vld [vmem:[#allocation2 + $0x38] sm:$0xf]  ;;  %v3655_v41 = vld [vmem:[#allocation2 + $0x48] sm:$0xf] }
  0x36   : > { %v1061_v25 = vrot.slane %v1059_v11, 7  ;;  %v1116_v30 = vor.u32 %v1114_v10, %v1113_v21  ;;  %v3653_v40 = vld [vmem:[#allocation2 + $0x38] sm:$0xf]  ;;  %v256_v42 = vmul.f32 %v3558_v35, %v241_v33  ;;  %v2779_v45 = vcombine.low %v3651_v37, %v400_v22  ;;  %v385_v0 = vld [vmem:[#allocation2 + $0x24] sm:$0x8]  ;;  %v3328_v11 = vld [vmem:[%s4220_s3 + $0x168] sm:$0xff]  }
  0x37   : > { %v1130_v36 = vsel %vm3640_vm8, %v2910_v18, %v1129_v19  ;;  %v611_v46 = vunpack.c.l.b16 %v3653_v40  ;;  %v613_v47 = vunpack.c.l.b16 %v3655_v41  ;;  %v893_v54 = vunpack.c.h.b16 %v584_v32  ;;  %v3329_v21 = vld [vmem:[%s4220_s3 + $0x1e8] sm:$0xff]   ;;  %v309_v22 = vld [vmem:[#allocation2 + $0x54] sm:$0x8] }
  0x38   : > { %v1064_v34 = vor.u32 %v1062_v17, %v1061_v25  ;;  %v1117_v44 = vsel %vm3640_vm8, %v2909_v20, %v1116_v30  ;;  %v585_v59 = vrot.slane %v2779_v45, 5  ;;  %v2839_v60 = vcombine.low %v584_v32, %v409_v26 }
  0x39   : > { %v2944_v49 = vcombine.low %v1052_v29, %v1117_v44  ;;  %v2945_v51 = vcombine.high %v1052_v29, %v1117_v44  ;;  %v984_v63 = vpack.c.b16 %v611_v46, %v893_v54  ;;  %v2771_v2 = vcombine.low %v3651_v37, %v3651_v37  ;;  %v3333_v46 = vld [vmem:[%s4220_s3 + $0x1e0] sm:$0xff]  }
  0x3a   : > { %v1065_v48 = vsel %vm3640_vm8, %v2905_v24, %v1064_v34  ;;  %v516_v3 = vrot.slane %v514_v28, 5  ;;  %v257_v4 = vmul.f32 %v3558_v35, %v242_v55  ;;  %v905_v5 = vunpack.c.h.b16 %v585_v59  ;;  %v387_v24 = vld [vmem:[#allocation2 + $0x34] sm:$0x8]  ;;  %v3330_v28 = vld [vmem:[%s4220_s3 + $0x128] sm:$0xff]  }
  0x3b   : > { %v2946_v56 = vcombine.low %v1065_v48, %v1130_v36  ;;  %v2947_v57 = vcombine.high %v1065_v48, %v1130_v36  ;;  %2312 = vmatprep.mubr.bf16.mxu0 %v2945_v51  ;;  %v2850_v6 = vcombine.low %v585_v59, %v411_v53  ;;  %v1184_v7 = vshrl.u32 %v2839_v60, 16  ;;  %v3331_v34 = vld [vmem:[%s4220_s3 + $0x1a8] sm:$0xff]   ;;  %v3332_v36 = vld [vmem:[%s4220_s3 + $0x160] sm:$0xff]  }
  0x3c   : > { %2313 = vmatmul.mubr.bf16.vlgmr.msra.gmra.mxu0 %v2944_v49  ;;  %v3688_v8 = vadd.f32 %v3565_v38, %v256_v42  ;;  %v1189_v9 = vshrl.u32 %v984_v63, 16  ;;  %v1192_v10 = vshll.u32 %v984_v63, 16  ;;  %v517_v14 = vor.u32 %v516_v3, %v513_v27  ;;  %v3719_v59 = vld [vmem:[#allocation2 + $0x48] sm:$0xf] }
  0x3d   : > { %2377 = vmatprep.mubr.bf16.mxu1 %v2947_v57  ;;  %3137 = vmatpush3.bf16.msra.mxu0 %v3318_v52  ;;  %v519_v15 = vshrl.u32 %v2771_v2, 16  ;;  %v994_v17 = vpack.c.b16 %v613_v47, %v905_v5  ;;  %v2915_v18 = vrot.slane %v1184_v7, 11  ;;  %v1249_v19 = vshrl.u32 %v2850_v6, 16  ;;  %v312_v47 = vld [vmem:[#allocation2 + $0x64] sm:$0x8] }
  0x3e   : > { %2378 = vmatmul.mubr.bf16.vlgmr.msra.gmra.mxu1 %v2946_v56  ;;  %3138 = vmatprep.subr.bf16.mxu0 %v3320_v58  ;;  %v522_v20 = vshll.u32 %v2771_v2, 16  ;;  %v1191_v23 = vrot.slane %v1189_v9, 7  ;;  %v2838_v26 = vcombine.low %v385_v0, %v517_v14  ;;  %v2844_v27 = vsel %vm2821_vm6, %v3623_v31, %v517_v14  ;;  %v3334_v56 = vld [vmem:[%s4220_s3 + $0x120] sm:$0xff]   ;;  %v342_v58 = vld [vmem:[#allocation2 + $0x5c] sm:$0x1]  ;;  %v243_v9 = vld [vmem:[%s3545_s12 + $0x30] sm:$0xff] }
  0x3f   : > { %3177 = vmatpush3.bf16.msra.mxu1 %v3319_v50  ;;  %v521_v25 = vrot.slane %v519_v15, 4  ;;  %v2920_v29 = vrot.slane %v1249_v19, 11  ;;  %v1254_v30 = vshrl.u32 %v994_v17, 16  ;;  %v1257_v32 = vshll.u32 %v994_v17, 16  ;;  %v339_v50 = vld [vmem:[#allocation2 + $0x4c] sm:$0x1] }
  0x40   : > { %3178 = vmatprep.subr.bf16.mxu1 %v3321_v61  ;;  %v524_v33 = vrot.slane %v522_v20, 5  ;;  %v1194_v42 = vor.u32 %v1192_v10, %v1191_v23  ;;  %v1171_v44 = vshrl.u32 %v2838_v26, 16  ;;  %v1176_v31 = vshrl.u32 %v2844_v27, 16  ;;  %v3340_v0 = vld [vmem:[%s4220_s3 + $0x158] sm:$0xff]   ;;  %v315_v19 = vld [vmem:[#allocation2 + $0x74] sm:$0x8] }
  0x41   : > { %3139 = vmatpush3.bf16.msra.mxu0 %v3322_v62  ;;  %v1179_v45 = vshll.u32 %v2844_v27, 16  ;;  %v1256_v48 = vrot.slane %v1254_v30, 7  ;;  %v272_v51 = vadd.f32 %v3565_v38, %v257_v4  ;;  %v279_v52 = vmax.f32 %v3688_v8, 0.0  ;;  %v244_v10 = vld [vmem:[%s3545_s12 + $0x38] sm:$0xff]  ;;  %v318_v20 = vld [vmem:[#allocation2 + $0x84] sm:$0x8] }
  0x42   : > { %v525_v49 = vor.u32 %v524_v33, %v521_v25  ;;  %3140 = vmatprep.subr.bf16.mxu0 %v3328_v11  ;;  %v1195_v53 = vsel %vm3640_vm8, %v2915_v18, %v1194_v42  ;;  %v2914_v54 = vrot.slane %v1171_v44, 11  ;;  %v1178_v55 = vrot.slane %v1176_v31, 7  ;;  %v3341_v18 = vld [vmem:[%s4220_s3 + $0x1d8] sm:$0xff]   ;;  %v345_v26 = vld [vmem:[#allocation2 + $0x6c] sm:$0x1] }
  0x43   : > { %3179 = vmatpush3.bf16.msra.mxu1 %v3323_v1  ;;  %v310_v57 = vsel %vm3567_vm3, 0, %v309_v22  ;;  %v1259_v60 = vor.u32 %v1257_v32, %v1256_v48  ;;  %v280_v63 = vmax.f32 %v272_v51, 0.0  ;;  %v3335_v1 = vld [vmem:[%s4220_s3 + $0x1a0] sm:$0xff]   ;;  %v287_v5 = vpack.c.bf16 %v279_v52, %v279_v52  ;;  %v3342_v25 = vld [vmem:[%s4220_s3 + $0x118] sm:$0xff]  }
  0x44   : > { %3180 = vmatprep.subr.bf16.mxu1 %v3329_v21  ;;  %v2849_v61 = vcombine.low %v387_v24, %v525_v49  ;;  %v2855_v62 = vsel %vm2821_vm6, %v3651_v37, %v525_v49  ;;  %311 = vst [vmem:[#allocation2 + $0x54] sm:$0x8] %v310_v57  ;;  %v1181_v2 = vor.u32 %v1179_v45, %v1178_v55  ;;  %v313_v8 = vsel %vm3567_vm3, 0, %v312_v47  ;;  %v348_v33 = vld [vmem:[#allocation2 + $0x7c] sm:$0x1]  ;;  %v3346_v47 = vld [vmem:[%s4220_s3 + $0x110] sm:$0xff]  }
  0x45   : > { %v1241_v3 = vshrl.u32 %v2855_v62, 16  ;;  %v1244_v4 = vshll.u32 %v2855_v62, 16  ;;  %3141 = vmatpush3.bf16.msra.mxu0 %v3330_v28  ;;  %v1260_v37 = vsel %vm3640_vm8, %v2920_v29, %v1259_v60  ;;  %v288_v7 = vpack.c.bf16 %v280_v63, %v280_v63  ;;  %314 = vst [vmem:[#allocation2 + $0x64] sm:$0x8] %v313_v8  ;;  %377 = vst [vmem:[#allocation2 + $0x58] sm:$0xf] %v287_v5 }
  0x46   : > { %v1236_v6 = vshrl.u32 %v2849_v61, 16  ;;  %3142 = vmatprep.subr.bf16.mxu0 %v3332_v36  ;;  %v2956_v14 = vcombine.high %v1195_v53, %v1260_v37  ;;  %v3737_v15 = vsel %vm3640_vm8, %v2914_v54, %v1181_v2  ;;  %v2955_v17 = vcombine.low %v1195_v53, %v1260_v37  ;;  %v3344_v28 = vld [vmem:[%s4220_s3 + $0x150] sm:$0xff]   ;;  %v3343_v45 = vld [vmem:[%s4220_s3 + $0x198] sm:$0xff]  }
  0x47   : > { %3181 = vmatpush3.bf16.msra.mxu1 %v3331_v34  ;;  %v1243_v11 = vrot.slane %v1241_v3, 7  ;;  %v340_v22 = vsel %vm3575_vm5, 0, %v339_v50  ;;  %v343_v23 = vsel %vm3575_vm5, 0, %v342_v58  ;;  %378 = vst [vmem:[#allocation2 + $0x68] sm:$0xf] %v288_v7  ;;  %v2772_v24 = vcombine.low %v3719_v59, %v3719_v59  ;;  %v3347_v50 = vld [vmem:[%s4220_s3 + $0x190] sm:$0xff]  }
  0x48   : > { %3182 = vmatprep.subr.bf16.mxu1 %v3333_v46  ;;  %v2919_v21 = vrot.slane %v1236_v6, 11  ;;  %2385 = vmatprep.mubr.bf16.mxu1 %v2956_v14  ;;  %341 = vst [vmem:[#allocation2 + $0x4c] sm:$0x1] %v340_v22  ;;  %344 = vst [vmem:[#allocation2 + $0x5c] sm:$0x1] %v343_v23  ;;  %v258_v29 = vmul.f32 %v3558_v35, %v243_v9  ;;  %v259_v30 = vmul.f32 %v3558_v35, %v244_v10  ;;  %v3345_v46 = vld [vmem:[%s4220_s3 + $0x1d0] sm:$0xff]  }
  0x49   : > { %v1246_v27 = vor.u32 %v1244_v4, %v1243_v11  ;;  %3143 = vmatpush3.bf16.msra.mxu0 %v3334_v56  ;;  %v316_v32 = vsel %vm3567_vm3, 0, %v315_v19  ;;  %2386 = vmatmul.mubr.bf16.gmra.mxu1 %v2955_v17  ;;  %v527_v34 = vshrl.u32 %v2772_v24, 16  ;;  %v530_v36 = vshll.u32 %v2772_v24, 16  ;;  %v389_v35 = vld [vmem:[#allocation2 + $0x44] sm:$0x8]  ;;  %v3352_v56 = vld [vmem:[%s4220_s3 + $0x148] sm:$0xff]  }
  0x4a   : > { %3144 = vmatprep.subr.bf16.mxu0 %v3340_v0  ;;  %317 = vst [vmem:[#allocation2 + $0x74] sm:$0x8] %v316_v32  ;;  %v319_v42 = vsel %vm3567_vm3, 0, %v318_v20  ;;  %v346_v44 = vsel %vm3575_vm5, 0, %v345_v26  ;;  %v273_v48 = vadd.f32 %v3565_v38, %v258_v29  ;;  %v274_v49 = vadd.f32 %v3565_v38, %v259_v30 }
  0x4b   : > { %v1247_v31 = vsel %vm3640_vm8, %v2919_v21, %v1246_v27  ;;  %3183 = vmatpush3.bf16.msra.mxu1 %v3335_v1  ;;  %320 = vst [vmem:[#allocation2 + $0x84] sm:$0x8] %v319_v42  ;;  %347 = vst [vmem:[#allocation2 + $0x6c] sm:$0x1] %v346_v44  ;;  %v349_v51 = vsel %vm3575_vm5, 0, %v348_v33  ;;  %v529_v54 = vrot.slane %v527_v34, 4  ;;  %v3784_v38 = vcombine.low %v3609_v12, %v3609_v12 }
  0x4c   : > { %v2954_v52 = vcombine.high %v3737_v15, %v1247_v31  ;;  %v2953_v53 = vcombine.low %v3737_v15, %v1247_v31  ;;  %v532_v55 = vrot.slane %v530_v36, 5  ;;  %3184 = vmatprep.subr.bf16.mxu1 %v3341_v18  ;;  %350 = vst [vmem:[#allocation2 + $0x7c] sm:$0x1] %v349_v51  ;;  %v3788_v57 = vcombine.low %v3611_v13, %v3611_v13  ;;  %v3793_v61 = vld [vmem:[#allocation2 + $0x58] sm:$0xf]  ;;  %v3353_v12 = vld [vmem:[%s4220_s3 + $0x1c8] sm:$0xff]  }
  0x4d   : > { %3145 = vmatpush3.bf16.msra.mxu0 %v3342_v25  ;;  %v281_v58 = vmax.f32 %v273_v48, 0.0  ;;  %v282_v60 = vmax.f32 %v274_v49, 0.0  ;;  %v3795_v62 = vld [vmem:[#allocation2 + $0x58] sm:$0xf]  ;;  %v3802_v13 = vcombine.low %v3653_v40, %v3653_v40  ;;  %v3806_v0 = vcombine.low %v3655_v41, %v3655_v41  ;;  %v3354_v40 = vld [vmem:[%s4220_s3 + $0x108] sm:$0xff]   ;;  %v3356_v36 = vld [vmem:[%s4220_s3 + $0x140] sm:$0xff]  }
  0x4e   : > { %2320 = vmatprep.mubr.bf16.mxu0 %v2954_v52  ;;  %v533_v63 = vor.u32 %v532_v55, %v529_v54  ;;  %3146 = vmatprep.subr.bf16.mxu0 %v3344_v28  ;;  %v3808_v2 = vld [vmem:[#allocation2 + $0x68] sm:$0xf]  ;;  %v615_v3 = vunpack.c.l.b16 %v3795_v62  ;;  %v2773_v4 = vcombine.low %v3793_v61, %v3793_v61  ;;  %v413_v14 = vld [vmem:[#allocation2 + $0x54] sm:$0x8]  ;;  %v415_v15 = vld [vmem:[#allocation2 + $0x64] sm:$0x8] }
  0x4f   : > { %2321 = vmatmul.mubr.bf16.gmra.mxu0 %v2953_v53  ;;  %3185 = vmatpush3.bf16.msra.mxu1 %v3343_v45  ;;  %v289_v1 = vpack.c.bf16 %v281_v58, %v281_v58  ;;  %v290_v5 = vpack.c.bf16 %v282_v60, %v282_v60  ;;  %v3813_v37 = vld [vmem:[#allocation2 + $0x68] sm:$0xf]  ;;  %v401_v6 = vld [vmem:[#allocation2 + $0x4c] sm:$0x1]  ;;  %v402_v41 = vld [vmem:[#allocation2 + $0x5c] sm:$0x1]  ;;  %v617_v7 = vunpack.c.l.b16 %v3808_v2 }
  0x50   : > { %v2860_v8 = vcombine.low %v389_v35, %v533_v63  ;;  %v2866_v9 = vsel %vm2821_vm6, %v3719_v59, %v533_v63  ;;  %3186 = vmatprep.subr.bf16.mxu1 %v3345_v46  ;;  %v3823_v10 = vcombine.low %v3813_v37, %v3813_v37  ;;  %v2780_v11 = vcombine.low %v3719_v59, %v401_v6  ;;  %v3355_v59 = vld [vmem:[%s4220_s3 + $0x188] sm:$0xff]   ;;  %v391_v29 = vld [vmem:[#allocation2 + $0x54] sm:$0x8]  ;;  %v3357_v55 = vld [vmem:[%s4220_s3 + $0x1c0] sm:$0xff]  }
  0x51   : > { %v2781_v17 = vcombine.low %v3793_v61, %v402_v41  ;;  %v535_v18 = vshrl.u32 %v2773_v4, 16  ;;  %v538_v19 = vshll.u32 %v2773_v4, 16  ;;  %3147 = vmatpush3.bf16.msra.mxu0 %v3346_v47  ;;  %379 = vst [vmem:[#allocation2 + $0x78] sm:$0xf] %v289_v1  ;;  %380 = vst [vmem:[#allocation2 + $0x88] sm:$0xf] %v290_v5 }
  0x52   : > { %v1301_v20 = vshrl.u32 %v2860_v8, 16  ;;  %v1306_v21 = vshrl.u32 %v2866_v9, 16  ;;  %v1309_v22 = vshll.u32 %v2866_v9, 16  ;;  %v403_v23 = vld [vmem:[#allocation2 + $0x6c] sm:$0x1]  ;;  %v543_v24 = vshrl.u32 %v3823_v10, 16  ;;  %3148 = vmatprep.subr.bf16.mxu0 %v3352_v56 }
  0x53   : > { %v586_v25 = vrot.slane %v2780_v11, 5  ;;  %v587_v26 = vrot.slane %v2781_v17, 5  ;;  %v537_v27 = vrot.slane %v535_v18, 4  ;;  %v540_v28 = vrot.slane %v538_v19, 5  ;;  %3187 = vmatpush3.bf16.msra.mxu1 %v3347_v50  ;;  %v404_v47 = vld [vmem:[#allocation2 + $0x7c] sm:$0x1] }
  0x54   : > { %v2924_v30 = vrot.slane %v1301_v20, 11  ;;  %v1308_v32 = vrot.slane %v1306_v21, 7  ;;  %v2782_v33 = vcombine.low %v3813_v37, %v403_v23  ;;  %v3832_v34 = vrot.slane %v543_v24, 4  ;;  %3188 = vmatprep.subr.bf16.mxu1 %v3353_v12  ;;  %v3358_v56 = vld [vmem:[%s4220_s3 + $0x100] sm:$0xff]   ;;  %v417_v12 = vld [vmem:[#allocation2 + $0x74] sm:$0x8] }
  0x55   : > { %v917_v42 = vunpack.c.h.b16 %v586_v25  ;;  %v929_v44 = vunpack.c.h.b16 %v587_v26  ;;  %v2861_v31 = vcombine.low %v586_v25, %v413_v14  ;;  %v2872_v35 = vcombine.low %v587_v26, %v415_v15  ;;  %3149 = vmatpush3.bf16.msra.mxu0 %v3354_v40  ;;  %v3359_v17 = vld [vmem:[%s4220_s3 + $0x180] sm:$0xff]   ;;  %v3864_v18 = vld [vmem:[%s4220_s3 + $0x238] sm:$0xff]  }
  0x56   : > { %v541_v45 = vor.u32 %v540_v28, %v537_v27  ;;  %v1311_v46 = vor.u32 %v1309_v22, %v1308_v32  ;;  %v588_v48 = vrot.slane %v2782_v33, 5  ;;  %v546_v49 = vshll.u32 %v3823_v10, 16  ;;  %3150 = vmatprep.subr.bf16.mxu0 %v3356_v36  ;;  %v419_v22 = vld [vmem:[#allocation2 + $0x84] sm:$0x8] }
  0x57   : > { %v1004_v51 = vpack.c.b16 %v615_v3, %v917_v42  ;;  %v1014_v52 = vpack.c.b16 %v617_v7, %v929_v44  ;;  %v1314_v53 = vshrl.u32 %v2861_v31, 16  ;;  %v1379_v54 = vshrl.u32 %v2872_v35, 16  ;;  %3189 = vmatpush3.bf16.msra.mxu1 %v3355_v59  ;;  %v3873_v44 = vld [vmem:[#allocation2 + $0x28] sm:$0xf] }
  0x58   : > { %v2871_v50 = vcombine.low %v391_v29, %v541_v45  ;;  %v2877_v58 = vsel %vm2821_vm6, %v3793_v61, %v541_v45  ;;  %v3848_v60 = vsel %vm3640_vm8, %v2924_v30, %v1311_v46  ;;  %v3850_v63 = vld [vmem:[#allocation2 + $0x78] sm:$0xf]  ;;  %v3854_v4 = vld [vmem:[#allocation2 + $0x88] sm:$0xf]  ;;  %v941_v1 = vunpack.c.h.b16 %v588_v48  ;;  %3190 = vmatprep.subr.bf16.mxu1 %v3357_v55 }
  0x59   : > { %v3852_v3 = vld [vmem:[#allocation2 + $0x78] sm:$0xf]  ;;  %v2925_v5 = vrot.slane %v1314_v53, 11  ;;  %v1319_v40 = vshrl.u32 %v1004_v51, 16  ;;  %v1322_v6 = vshll.u32 %v1004_v51, 16  ;;  %v2930_v41 = vrot.slane %v1379_v54, 11  ;;  %3151 = vmatpush3.bf16.msra.mxu0 %v3358_v56 }
  0x5a   : > { %v1384_v7 = vshrl.u32 %v1014_v52, 16  ;;  %v1387_v61 = vshll.u32 %v1014_v52, 16  ;;  %v1366_v8 = vshrl.u32 %v2871_v50, 16  ;;  %v1371_v9 = vshrl.u32 %v2877_v58, 16  ;;  %3228 = vmatprep.subr.bf16.mxu0 %v3864_v18  ;;  %v393_v56 = vld [vmem:[#allocation2 + $0x64] sm:$0x8] }
  0x5b   : > { %v1321_v10 = vrot.slane %v1319_v40, 7  ;;  %v1374_v14 = vshll.u32 %v2877_v58, 16  ;;  %v2783_v15 = vcombine.low %v3850_v63, %v404_v47  ;;  %v619_v11 = vunpack.c.l.b16 %v3852_v3  ;;  %3191 = vmatpush3.bf16.msra.mxu1 %v3359_v17 }
  0x5c   : > { %v1386_v19 = vrot.slane %v1384_v7, 7  ;;  %v2929_v20 = vrot.slane %v1366_v8, 11  ;;  %v1373_v21 = vrot.slane %v1371_v9, 7  ;;  %v621_v23 = vunpack.c.l.b16 %v3854_v4  ;;  %3252 = vmatprep.subr.bf16.mxu1 %v3864_v18  ;;  %v395_v7 = vld [vmem:[#allocation2 + $0x74] sm:$0x8] }
  0x5d   : > { %v1324_v24 = vor.u32 %v1322_v6, %v1321_v10  ;;  %v589_v25 = vrot.slane %v2783_v15, 5  ;;  %v2883_v26 = vcombine.low %v588_v48, %v417_v12  ;;  %v1024_v27 = vpack.c.b16 %v619_v11, %v941_v1 }
  0x5e   : > { %v1389_v28 = vor.u32 %v1387_v61, %v1386_v19  ;;  %v1376_v59 = vor.u32 %v1374_v14, %v1373_v21  ;;  %v2775_v29 = vcombine.low %v3850_v63, %v3850_v63  ;;  %v548_v30 = vrot.slane %v546_v49, 5 }
  0x5f   : > { %v1325_v32 = vsel %vm3640_vm8, %v2925_v5, %v1324_v24  ;;  %v953_v33 = vunpack.c.h.b16 %v589_v25  ;;  %v2894_v36 = vcombine.low %v589_v25, %v419_v22  ;;  %v1444_v42 = vshrl.u32 %v2883_v26, 16 }
  0x60   : > { %v1390_v31 = vsel %vm3640_vm8, %v2930_v41, %v1389_v28  ;;  %v1377_v35 = vsel %vm3640_vm8, %v2929_v20, %v1376_v59  ;;  %v1449_v45 = vshrl.u32 %v1024_v27, 16  ;;  %v1452_v46 = vshll.u32 %v1024_v27, 16  ;;  %v3884_v41 = vld [vmem:[#allocation2 + $0x38] sm:$0xf] }
  0x61   : > { %v2965_v47 = vcombine.high %v1325_v32, %v1390_v31  ;;  %v2963_v48 = vcombine.high %v3848_v60, %v1377_v35  ;;  %v2964_v49 = vcombine.low %v1325_v32, %v1390_v31  ;;  %v2962_v51 = vcombine.low %v3848_v60, %v1377_v35  ;;  %v430_v31 = vld [vmem:[#allocation2 + $0x24] sm:$0x8] }
  0x62   : > { %v1034_v52 = vpack.c.b16 %v621_v23, %v953_v33  ;;  %v2935_v53 = vrot.slane %v1444_v42, 11  ;;  %v1451_v54 = vrot.slane %v1449_v45, 7  ;;  %v1509_v55 = vshrl.u32 %v2894_v36, 16 }
  0x63   : > { %2393 = vmatprep.mubr.bf16.mxu1 %v2965_v47  ;;  %2328 = vmatprep.mubr.bf16.mxu0 %v2963_v48  ;;  %v549_v50 = vor.u32 %v548_v30, %v3832_v34  ;;  %v551_v58 = vshrl.u32 %v2775_v29, 16  ;;  %v554_v12 = vshll.u32 %v2775_v29, 16  ;;  %v2800_v1 = vcombine.low %v3873_v44, %v3873_v44 }
  0x64   : > { %2394 = vmatmul.mubr.bf16.gmra.mxu1 %v2964_v49  ;;  %2329 = vmatmul.mubr.bf16.gmra.mxu0 %v2962_v51  ;;  %v1454_v5 = vor.u32 %v1452_v46, %v1451_v54  ;;  %v2940_v40 = vrot.slane %v1509_v55, 11  ;;  %v1514_v6 = vshrl.u32 %v1034_v52, 16  ;;  %v1517_v60 = vshll.u32 %v1034_v52, 16 }
  0x65   : > { %v553_v61 = vrot.slane %v551_v58, 4  ;;  %v556_v8 = vrot.slane %v554_v12, 5  ;;  %v2882_v9 = vcombine.low %v393_v56, %v549_v50  ;;  %v2888_v34 = vsel %vm2821_vm6, %v3813_v37, %v549_v50  ;;  %v432_v50 = vld [vmem:[#allocation2 + $0x34] sm:$0x8] }
  0x66   : > { %v1455_v10 = vsel %vm3640_vm8, %v2935_v53, %v1454_v5  ;;  %v1516_v14 = vrot.slane %v1514_v6, 7  ;;  %v1436_v15 = vshrl.u32 %v2888_v34, 16  ;;  %v1439_v11 = vshll.u32 %v2888_v34, 16  ;;  %v422_v34 = vld [vmem:[#allocation2 + $0x2c] sm:$0x1] }
  0x67   : > { %v557_v17 = vor.u32 %v556_v8, %v553_v61  ;;  %v1431_v19 = vshrl.u32 %v2882_v9, 16  ;;  %v2801_v20 = vcombine.low %v3884_v41, %v3884_v41  ;;  %v767_v21 = vshrl.u32 %v2800_v1, 16  ;;  %v421_v9 = vld [vmem:[#allocation2 + $0x1c] sm:$0x1] }
  0x68   : > { %v1519_v22 = vor.u32 %v1517_v60, %v1516_v14  ;;  %v1438_v23 = vrot.slane %v1436_v15, 7  ;;  %v770_v24 = vshll.u32 %v2800_v1, 16  ;;  %v631_v25 = vshrl.u32 %v3784_v38, 16 }
  0x69   : > { %v2893_v26 = vcombine.low %v395_v7, %v557_v17  ;;  %v2899_v37 = vsel %vm2821_vm6, %v3850_v63, %v557_v17  ;;  %v2934_v27 = vrot.slane %v1431_v19, 11  ;;  %v769_v28 = vrot.slane %v767_v21, 4  ;;  %v3908_v19 = vld [vmem:[#allocation2 + $0x48] sm:$0xf] }
  0x6a   : > { %v1520_v59 = vsel %vm3640_vm8, %v2940_v40, %v1519_v22  ;;  %v1441_v29 = vor.u32 %v1439_v11, %v1438_v23  ;;  %v1501_v30 = vshrl.u32 %v2899_v37, 16  ;;  %v1504_v32 = vshll.u32 %v2899_v37, 16 }
  0x6b   : > { %v2974_v33 = vcombine.high %v1455_v10, %v1520_v59  ;;  %v1496_v36 = vshrl.u32 %v2893_v26, 16  ;;  %v2973_v42 = vcombine.low %v1455_v10, %v1520_v59  ;;  %v772_v35 = vrot.slane %v770_v24, 5  ;;  %v3391_v26 = vld [vmem:[#allocation2 + $0x18] sm:$0xf] }
  0x6c   : > { %v1442_v45 = vsel %vm3640_vm8, %v2934_v27, %v1441_v29  ;;  %v1503_v46 = vrot.slane %v1501_v30, 7  ;;  %v775_v47 = vshrl.u32 %v2801_v20, 16  ;;  %v778_v48 = vshll.u32 %v2801_v20, 16  ;;  %v3392_v27 = vld [vmem:[#allocation2 + $0x28] sm:$0xf] }
  0x6d   : > { %2401 = vmatprep.mubr.bf16.mxu1 %v2974_v33  ;;  %v2939_v63 = vrot.slane %v1496_v36, 11  ;;  %v773_v49 = vor.u32 %v772_v35, %v769_v28  ;;  %v633_v51 = vrot.slane %v631_v25, 4  ;;  %v634_v52 = vshll.u32 %v3784_v38, 16 }
  0x6e   : > { %v1506_v53 = vor.u32 %v1504_v32, %v1503_v46  ;;  %2402 = vmatmul.mubr.bf16.gmra.mxu1 %v2973_v42  ;;  %v777_v54 = vrot.slane %v775_v47, 4  ;;  %v780_v55 = vrot.slane %v778_v48, 5  ;;  %v639_v56 = vshrl.u32 %v3788_v57, 16 }
  0x6f   : > { %v2819_v58 = vcombine.low %v430_v31, %v773_v49  ;;  %v2825_v12 = vsel %vm2821_vm6, %v3873_v44, %v773_v49  ;;  %v636_v1 = vrot.slane %v634_v52, 5  ;;  %v642_v5 = vshll.u32 %v3788_v57, 16  ;;  %v3910_v57 = vld [vmem:[#allocation2 + $0x58] sm:$0xf] }
  0x70   : > { %v1507_v40 = vsel %vm3640_vm8, %v2939_v63, %v1506_v53  ;;  %v781_v6 = vor.u32 %v780_v55, %v777_v54  ;;  %v1085_v60 = vshrl.u32 %v2825_v12, 16  ;;  %v1088_v38 = vshll.u32 %v2825_v12, 16  ;;  %v3923_v53 = vld [vmem:[%s4220_s3 + $0x230] sm:$0xff]  }
  0x71   : > { %v2972_v7 = vcombine.high %v1442_v45, %v1507_v40  ;;  %v2971_v61 = vcombine.low %v1442_v45, %v1507_v40  ;;  %v1080_v8 = vshrl.u32 %v2819_v58, 16  ;;  %v637_v10 = vor.u32 %v636_v1, %v633_v51  ;;  %v449_v40 = vld [vmem:[#allocation2 + $0x5c] sm:$0x1] }
  0x72   : > { %v2830_v14 = vcombine.low %v432_v50, %v781_v6  ;;  %v2836_v15 = vsel %vm2821_vm6, %v3884_v41, %v781_v6  ;;  %v1087_v11 = vrot.slane %v1085_v60, 7  ;;  %v641_v17 = vrot.slane %v639_v56, 4 }
  0x73   : > { %2336 = vmatprep.mubr.bf16.mxu0 %v2972_v7  ;;  %v2907_v20 = vrot.slane %v1080_v8, 11  ;;  %v1150_v21 = vshrl.u32 %v2836_v15, 16  ;;  %v1153_v22 = vshll.u32 %v2836_v15, 16  ;;  %v644_v23 = vrot.slane %v642_v5, 5  ;;  %v448_v5 = vld [vmem:[#allocation2 + $0x4c] sm:$0x1] }
  0x74   : > { %2337 = vmatmul.mubr.bf16.gmra.mxu0 %v2971_v61  ;;  %v1090_v24 = vor.u32 %v1088_v38, %v1087_v11  ;;  %v1145_v25 = vshrl.u32 %v2830_v14, 16  ;;  %v2792_v37 = vcombine.low %v3391_v26, %v421_v9  ;;  %v2793_v28 = vcombine.low %v3392_v27, %v422_v34  ;;  %v434_v61 = vld [vmem:[#allocation2 + $0x44] sm:$0x8] }
  0x75   : > { %v1152_v59 = vrot.slane %v1150_v21, 7  ;;  %v645_v29 = vor.u32 %v644_v23, %v641_v17  ;;  %v2802_v30 = vcombine.low %v3908_v19, %v3908_v19  ;;  %v2803_v32 = vcombine.low %v3910_v57, %v3910_v57 }
  0x76   : > { %v1091_v33 = vsel %vm3640_vm8, %v2907_v20, %v1090_v24  ;;  %v2912_v36 = vrot.slane %v1145_v25, 11  ;;  %v718_v42 = vrot.slane %v2792_v37, 5  ;;  %v719_v31 = vrot.slane %v2793_v28, 5  ;;  %v436_v25 = vld [vmem:[#allocation2 + $0x54] sm:$0x8]  ;;  %v3938_v28 = vld [vmem:[%s4220_s3 + $0x228] sm:$0xff]  }
  0x77   : > { %v1155_v35 = vor.u32 %v1153_v22, %v1152_v59  ;;  %v783_v45 = vshrl.u32 %v2802_v30, 16  ;;  %v786_v46 = vshll.u32 %v2802_v30, 16  ;;  %v791_v47 = vshrl.u32 %v2803_v32, 16 }
  0x78   : > { %v2818_v48 = vcombine.low %v637_v10, %v718_v42  ;;  %v2823_v63 = vcombine.high %v637_v10, %v718_v42  ;;  %v2829_v49 = vcombine.low %v645_v29, %v719_v31  ;;  %v2834_v51 = vcombine.high %v645_v29, %v719_v31 }
  0x79   : > { %v1156_v52 = vsel %vm3640_vm8, %v2912_v36, %v1155_v35  ;;  %v785_v54 = vrot.slane %v783_v45, 4  ;;  %v788_v55 = vrot.slane %v786_v46, 5  ;;  %v793_v56 = vrot.slane %v791_v47, 4  ;;  %v423_v47 = vld [vmem:[#allocation2 + $0x3c] sm:$0x1] }
  0x7a   : > { %v2950_v50 = vcombine.low %v1091_v33, %v1156_v52  ;;  %v2951_v58 = vcombine.high %v1091_v33, %v1156_v52  ;;  %v1067_v12 = vshrl.u32 %v2818_v48, 16  ;;  %v1072_v1 = vshrl.u32 %v2823_v63, 16  ;;  %v3959_v52 = vld [vmem:[%s4220_s3 + $0x220] sm:$0xff]  }
  0x7b   : > { %v1075_v6 = vshll.u32 %v2823_v63, 16  ;;  %v1132_v60 = vshrl.u32 %v2829_v49, 16  ;;  %v1137_v38 = vshrl.u32 %v2834_v51, 16  ;;  %v1140_v7 = vshll.u32 %v2834_v51, 16 }
  0x7c   : > { %2507 = vmatprep.mubr.bf16.mxu1 %v2951_v58  ;;  %v2906_v8 = vrot.slane %v1067_v12, 11  ;;  %v1074_v9 = vrot.slane %v1072_v1, 7  ;;  %v789_v34 = vor.u32 %v788_v55, %v785_v54  ;;  %v794_v10 = vshll.u32 %v2803_v32, 16  ;;  %v424_v55 = vld [vmem:[#allocation2 + $0x4c] sm:$0x1] }
  0x7d   : > { %v2911_v14 = vrot.slane %v1132_v60, 11  ;;  %v1139_v15 = vrot.slane %v1137_v38, 7  ;;  %2508 = vmatmul.mubr.bf16.vlgmr.msra.gmra.mxu1 %v2950_v50  ;;  %v2810_v11 = vcombine.low %v3908_v19, %v448_v5  ;;  %v2811_v17 = vcombine.low %v3910_v57, %v449_v40  ;;  %v3393_v5 = vld [vmem:[#allocation2 + $0x38] sm:$0xf] }
  0x7e   : > { %v1077_v20 = vor.u32 %v1075_v6, %v1074_v9  ;;  %3260 = vmatpush3.bf16.msra.mxu1 %v3864_v18  ;;  %v796_v21 = vrot.slane %v794_v10, 5  ;;  %v2841_v22 = vcombine.low %v434_v61, %v789_v34  ;;  %v2847_v23 = vsel %vm2821_vm6, %v3908_v19, %v789_v34  ;;  %v3967_v6 = vld [vmem:[#allocation2 + $0x68] sm:$0xf]  ;;  %v3969_v60 = vld [vmem:[#allocation2 + $0x78] sm:$0xf] }
  0x7f   : > { %v1142_v24 = vor.u32 %v1140_v7, %v1139_v15  ;;  %3253 = vmatprep.subr.bf16.mxu1 %v3923_v53  ;;  %v3931_v26 = vrot.slane %v2810_v11, 5  ;;  %v3933_v37 = vrot.slane %v2811_v17, 5  ;;  %v1215_v27 = vshrl.u32 %v2847_v23, 16  ;;  %v3394_v34 = vld [vmem:[#allocation2 + $0x48] sm:$0xf]  ;;  %v3984_v17 = vld [vmem:[%s4220_s3 + $0x218] sm:$0xff]  }
  0x80   : > { %v1078_v59 = vsel %vm3640_vm8, %v2906_v8, %v1077_v20  ;;  %v797_v29 = vor.u32 %v796_v21, %v793_v56  ;;  %v1210_v30 = vshrl.u32 %v2841_v22, 16  ;;  %v1218_v19 = vshll.u32 %v2847_v23, 16 }
  0x81   : > { %v1143_v32 = vsel %vm3640_vm8, %v2911_v14, %v1142_v24  ;;  %v3946_v33 = vcombine.high %v3931_v26, %v3931_v26  ;;  %v3950_v36 = vcombine.high %v3933_v37, %v3933_v37  ;;  %v1217_v42 = vrot.slane %v1215_v27, 7 }
  0x82   : > { %v2948_v31 = vcombine.low %v1078_v59, %v1143_v32  ;;  %v2949_v35 = vcombine.high %v1078_v59, %v1143_v32  ;;  %3261 = vmatpush3.bf16.msra.mxu1 %v3923_v53  ;;  %v2852_v45 = vcombine.low %v436_v25, %v797_v29  ;;  %v2858_v46 = vsel %vm2821_vm6, %v3910_v57, %v797_v29 }
  0x83   : > { %v2917_v48 = vrot.slane %v1210_v30, 11  ;;  %v1220_v63 = vor.u32 %v1218_v19, %v1217_v42  ;;  %v1280_v49 = vshrl.u32 %v2858_v46, 16  ;;  %v1283_v51 = vshll.u32 %v2858_v46, 16  ;;  %3254 = vmatprep.subr.bf16.mxu1 %v3938_v28 }
  0x84   : > { %2442 = vmatprep.mubr.bf16.mxu0 %v2949_v35  ;;  %v1275_v54 = vshrl.u32 %v2852_v45, 16  ;;  %v647_v56 = vshrl.u32 %v3802_v13, 16  ;;  %v650_v50 = vshll.u32 %v3802_v13, 16  ;;  %v655_v57 = vshrl.u32 %v3806_v0, 16 }
  0x85   : > { %2443 = vmatmul.mubr.bf16.vlgmr.msra.gmra.mxu0 %v2948_v31  ;;  %v1221_v58 = vsel %vm3640_vm8, %v2917_v48, %v1220_v63  ;;  %v1282_v12 = vrot.slane %v1280_v49, 7  ;;  %v658_v1 = vshll.u32 %v3806_v0, 16  ;;  %v2794_v40 = vcombine.low %v3393_v5, %v423_v47 }
  0x86   : > { %3229 = vmatpush3.bf16.msra.mxu0 %v3864_v18  ;;  %v2922_v38 = vrot.slane %v1275_v54, 11  ;;  %v649_v7 = vrot.slane %v647_v56, 4  ;;  %v652_v13 = vrot.slane %v650_v50, 5  ;;  %v657_v61 = vrot.slane %v655_v57, 4  ;;  %3262 = vmatpush3.bf16.msra.mxu1 %v3938_v28  ;;  %v438_v57 = vld [vmem:[#allocation2 + $0x64] sm:$0x8] }
  0x87   : > { %3230 = vmatprep.subr.bf16.mxu0 %v3923_v53  ;;  %v1285_v8 = vor.u32 %v1283_v51, %v1282_v12  ;;  %v660_v9 = vrot.slane %v658_v1, 5  ;;  %v2795_v0 = vcombine.low %v3394_v34, %v424_v55  ;;  %v720_v10 = vrot.slane %v2794_v40, 5  ;;  %3255 = vmatprep.subr.bf16.mxu1 %v3959_v52  ;;  %v440_v34 = vld [vmem:[#allocation2 + $0x74] sm:$0x8] }
  0x88   : > { %v653_v14 = vor.u32 %v652_v13, %v649_v7  ;;  %v2804_v15 = vcombine.low %v3967_v6, %v3967_v6  ;;  %v2805_v18 = vcombine.low %v3969_v60, %v3969_v60  ;;  %v2788_v11 = vcombine.low %v3795_v62, %v3795_v62 }
  0x89   : > { %v1286_v20 = vsel %vm3640_vm8, %v2922_v38, %v1285_v8  ;;  %v661_v21 = vor.u32 %v660_v9, %v657_v61  ;;  %v721_v22 = vrot.slane %v2795_v0, 5  ;;  %v3990_v23 = vcombine.low %v3808_v2, %v3808_v2 }
  0x8a   : > { %3231 = vmatpush3.bf16.msra.mxu0 %v3923_v53  ;;  %v2960_v24 = vcombine.high %v1221_v58, %v1286_v20  ;;  %v2840_v25 = vcombine.low %v653_v14, %v720_v10  ;;  %v2845_v27 = vcombine.high %v653_v14, %v720_v10  ;;  %v2959_v59 = vcombine.low %v1221_v58, %v1286_v20  ;;  %v3999_v53 = vld [vmem:[%s4220_s3 + $0x210] sm:$0xff]  }
  0x8b   : > { %v2851_v29 = vcombine.low %v661_v21, %v721_v22  ;;  %v2856_v30 = vcombine.high %v661_v21, %v721_v22  ;;  %3232 = vmatprep.subr.bf16.mxu0 %v3938_v28  ;;  %3263 = vmatpush3.bf16.msra.mxu1 %v3959_v52  ;;  %v799_v19 = vshrl.u32 %v2804_v15, 16  ;;  %v802_v32 = vshll.u32 %v2804_v15, 16 }
  0x8c   : > { %2515 = vmatprep.mubr.bf16.mxu1 %v2960_v24  ;;  %v1197_v42 = vshrl.u32 %v2840_v25, 16  ;;  %v1202_v31 = vshrl.u32 %v2845_v27, 16  ;;  %v1205_v35 = vshll.u32 %v2845_v27, 16  ;;  %v807_v45 = vshrl.u32 %v2805_v18, 16  ;;  %3256 = vmatprep.subr.bf16.mxu1 %v3984_v17  ;;  %v426_v24 = vld [vmem:[#allocation2 + $0x6c] sm:$0x1] }
  0x8d   : > { %v1262_v46 = vshrl.u32 %v2851_v29, 16  ;;  %v1267_v47 = vshrl.u32 %v2856_v30, 16  ;;  %v1270_v48 = vshll.u32 %v2856_v30, 16  ;;  %2516 = vmatmul.mubr.bf16.gmra.mxu1 %v2959_v59  ;;  %v801_v63 = vrot.slane %v799_v19, 4  ;;  %v4025_v27 = vld [vmem:[%s4220_s3 + $0x200] sm:$0xff]  }
  0x8e   : > { %v2916_v49 = vrot.slane %v1197_v42, 11  ;;  %v1204_v51 = vrot.slane %v1202_v31, 7  ;;  %3233 = vmatpush3.bf16.msra.mxu0 %v3938_v28  ;;  %v804_v54 = vrot.slane %v802_v32, 5  ;;  %v809_v55 = vrot.slane %v807_v45, 4  ;;  %v4009_v28 = vld [vmem:[%s4220_s3 + $0x208] sm:$0xff]  }
  0x8f   : > { %v2921_v56 = vrot.slane %v1262_v46, 11  ;;  %v1269_v50 = vrot.slane %v1267_v47, 7  ;;  %3234 = vmatprep.subr.bf16.mxu0 %v3959_v52  ;;  %v810_v58 = vshll.u32 %v2805_v18, 16  ;;  %v663_v12 = vshrl.u32 %v2788_v11, 16  ;;  %3264 = vmatpush3.bf16.msra.mxu1 %v3984_v17  ;;  %v321_v32 = vld [vmem:[#allocation2 + $0x94] sm:$0x8] }
  0x90   : > { %v1207_v1 = vor.u32 %v1205_v35, %v1204_v51  ;;  %v805_v5 = vor.u32 %v804_v54, %v801_v63  ;;  %v666_v40 = vshll.u32 %v2788_v11, 16  ;;  %v671_v38 = vshrl.u32 %v3990_v23, 16  ;;  %3257 = vmatprep.subr.bf16.mxu1 %v3999_v53  ;;  %v351_v42 = vld [vmem:[#allocation2 + $0x8c] sm:$0x1]  ;;  %v354_v47 = vld [vmem:[#allocation2 + $0x9c] sm:$0x1] }
  0x91   : > { %v1272_v7 = vor.u32 %v1270_v48, %v1269_v50  ;;  %v812_v13 = vrot.slane %v810_v58, 5  ;;  %v665_v61 = vrot.slane %v663_v12, 4  ;;  %v674_v8 = vshll.u32 %v3990_v23, 16  ;;  %v4033_v54 = vld [vmem:[#allocation2 + $0x88] sm:$0xf] }
  0x92   : > { %v1208_v9 = vsel %vm3640_vm8, %v2916_v49, %v1207_v1  ;;  %3235 = vmatpush3.bf16.msra.mxu0 %v3959_v52  ;;  %v2863_v0 = vcombine.low %v438_v57, %v805_v5  ;;  %v2869_v10 = vsel %vm2821_vm6, %v3967_v6, %v805_v5  ;;  %v668_v14 = vrot.slane %v666_v40, 5  ;;  %v425_v52 = vld [vmem:[#allocation2 + $0x5c] sm:$0x1] }
  0x93   : > { %v1273_v15 = vsel %vm3640_vm8, %v2921_v56, %v1272_v7  ;;  %v813_v18 = vor.u32 %v812_v13, %v809_v55  ;;  %v1345_v11 = vshrl.u32 %v2869_v10, 16  ;;  %v1348_v20 = vshll.u32 %v2869_v10, 16  ;;  %3236 = vmatprep.subr.bf16.mxu0 %v3984_v17  ;;  %3265 = vmatpush3.bf16.msra.mxu1 %v3999_v53  ;;  %v4035_v55 = vld [vmem:[#allocation2 + $0x98] sm:$0xf] }
  0x94   : > { %v2958_v21 = vcombine.high %v1208_v9, %v1273_v15  ;;  %v2957_v22 = vcombine.low %v1208_v9, %v1273_v15  ;;  %v1340_v23 = vshrl.u32 %v2863_v0, 16  ;;  %v669_v25 = vor.u32 %v668_v14, %v665_v61  ;;  %3258 = vmatprep.subr.bf16.mxu1 %v4009_v28 }
  0x95   : > { %v2874_v59 = vcombine.low %v440_v34, %v813_v18  ;;  %v2880_v29 = vsel %vm2821_vm6, %v3969_v60, %v813_v18  ;;  %v1347_v30 = vrot.slane %v1345_v11, 7  ;;  %v673_v19 = vrot.slane %v671_v38, 4 }
  0x96   : > { %2450 = vmatprep.mubr.bf16.mxu0 %v2958_v21  ;;  %v2927_v31 = vrot.slane %v1340_v23, 11  ;;  %v1410_v35 = vshrl.u32 %v2880_v29, 16  ;;  %v1413_v45 = vshll.u32 %v2880_v29, 16  ;;  %v676_v46 = vrot.slane %v674_v8, 5  ;;  %3237 = vmatpush3.bf16.msra.mxu0 %v3984_v17 }
  0x97   : > { %2451 = vmatmul.mubr.bf16.gmra.mxu0 %v2957_v22  ;;  %v1350_v48 = vor.u32 %v1348_v20, %v1347_v30  ;;  %v1405_v63 = vshrl.u32 %v2874_v59, 16  ;;  %v2796_v49 = vcombine.low %v3795_v62, %v425_v52  ;;  %v2797_v51 = vcombine.low %v3808_v2, %v426_v24  ;;  %3238 = vmatprep.subr.bf16.mxu0 %v3999_v53  ;;  %v442_v24 = vld [vmem:[#allocation2 + $0x84] sm:$0x8] }
  0x98   : > { %v1412_v56 = vrot.slane %v1410_v35, 7  ;;  %v677_v50 = vor.u32 %v676_v46, %v673_v19  ;;  %v322_v57 = vsel %vm3567_vm3, 0, %v321_v32  ;;  %v352_v17 = vsel %vm3575_vm5, 0, %v351_v42  ;;  %3266 = vmatpush3.bf16.msra.mxu1 %v4009_v28 }
  0x99   : > { %v1351_v62 = vsel %vm3640_vm8, %v2927_v31, %v1350_v48  ;;  %v2932_v2 = vrot.slane %v1405_v63, 11  ;;  %v722_v58 = vrot.slane %v2796_v49, 5  ;;  %v723_v12 = vrot.slane %v2797_v51, 5  ;;  %323 = vst [vmem:[#allocation2 + $0x94] sm:$0x8] %v322_v57  ;;  %3259 = vmatprep.subr.bf16.mxu1 %v4025_v27 }
  0x9a   : > { %353 = vst [vmem:[#allocation2 + $0x8c] sm:$0x1] %v352_v17  ;;  %v1415_v1 = vor.u32 %v1413_v45, %v1412_v56  ;;  %3239 = vmatpush3.bf16.msra.mxu0 %v3999_v53  ;;  %v355_v5 = vsel %vm3575_vm5, 0, %v354_v47  ;;  %v2806_v40 = vcombine.low %v4033_v54, %v4033_v54  ;;  %v2807_v38 = vcombine.low %v4035_v55, %v4035_v55 }
  0x9b   : > { %v2862_v7 = vcombine.low %v669_v25, %v722_v58  ;;  %v2867_v13 = vcombine.high %v669_v25, %v722_v58  ;;  %v2873_v61 = vcombine.low %v677_v50, %v723_v12  ;;  %v2878_v8 = vcombine.high %v677_v50, %v723_v12  ;;  %356 = vst [vmem:[#allocation2 + $0x9c] sm:$0x1] %v355_v5 }
  0x9c   : > { %3240 = vmatprep.subr.bf16.mxu0 %v4009_v28  ;;  %v1416_v9 = vsel %vm3640_vm8, %v2932_v2, %v1415_v1  ;;  %v815_v53 = vshrl.u32 %v2806_v40, 16  ;;  %v818_v34 = vshll.u32 %v2806_v40, 16  ;;  %v823_v0 = vshrl.u32 %v2807_v38, 16  ;;  %3267 = vmatpush3.bf16.msra.mxu1 %v4025_v27  ;;  %v427_v40 = vld [vmem:[#allocation2 + $0x7c] sm:$0x1] }
  0x9d   : > { %v2969_v10 = vcombine.high %v1351_v62, %v1416_v9  ;;  %v1327_v14 = vshrl.u32 %v2862_v7, 16  ;;  %v1332_v15 = vshrl.u32 %v2867_v13, 16  ;;  %v1335_v18 = vshll.u32 %v2867_v13, 16 }
  0x9e   : > { %v1392_v11 = vshrl.u32 %v2873_v61, 16  ;;  %v1397_v20 = vshrl.u32 %v2878_v8, 16  ;;  %v1400_v21 = vshll.u32 %v2878_v8, 16  ;;  %v2968_v22 = vcombine.low %v1351_v62, %v1416_v9  ;;  %3241 = vmatpush3.bf16.msra.mxu0 %v4009_v28 }
  0x9f   : > { %2523 = vmatprep.mubr.bf16.mxu1 %v2969_v10  ;;  %v2926_v23 = vrot.slane %v1327_v14, 11  ;;  %v1334_v52 = vrot.slane %v1332_v15, 7  ;;  %v817_v25 = vrot.slane %v815_v53, 4  ;;  %v820_v59 = vrot.slane %v818_v34, 5  ;;  %3242 = vmatprep.subr.bf16.mxu0 %v4025_v27  ;;  %v450_v15 = vld [vmem:[#allocation2 + $0x6c] sm:$0x1] }
  0xa0   : > { %v2931_v29 = vrot.slane %v1392_v11, 11  ;;  %v1399_v30 = vrot.slane %v1397_v20, 7  ;;  %2524 = vmatmul.mubr.bf16.gmra.mxu1 %v2968_v22  ;;  %v365_v19 = vld [vmem:[#allocation2 + $0x94] sm:$0x8]  ;;  %v2790_v42 = vcombine.low %v3852_v3, %v3852_v3  ;;  %v2791_v31 = vcombine.low %v3854_v4, %v3854_v4 }
  0xa1   : > { %v452_v32 = vld [vmem:[#allocation2 + $0x8c] sm:$0x1]  ;;  %v1337_v28 = vor.u32 %v1335_v18, %v1334_v52  ;;  %v366_v35 = vsel %vm3567_vm3, 0, %v365_v19  ;;  %v821_v45 = vor.u32 %v820_v59, %v817_v25  ;;  %v825_v46 = vrot.slane %v823_v0, 4  ;;  %v451_v18 = vld [vmem:[#allocation2 + $0x7c] sm:$0x1] }
  0xa2   : > { %v1402_v47 = vor.u32 %v1400_v21, %v1399_v30  ;;  %367 = vst [vmem:[#allocation2 + $0x94] sm:$0x8] %v366_v35  ;;  %v369_v48 = vld [vmem:[#allocation2 + $0x9c] sm:$0x1]  ;;  %v826_v63 = vshll.u32 %v2807_v38, 16  ;;  %v2814_v49 = vcombine.low %v4033_v54, %v452_v32  ;;  %v679_v51 = vshrl.u32 %v2790_v42, 16  ;;  %3243 = vmatpush3.bf16.msra.mxu0 %v4025_v27 }
  0xa3   : > { %v1338_v56 = vsel %vm3640_vm8, %v2926_v23, %v1337_v28  ;;  %v370_v50 = vsel %vm3575_vm5, 0, %v369_v48  ;;  %v2885_v57 = vcombine.low %v442_v24, %v821_v45  ;;  %v2891_v39 = vsel %vm2821_vm6, %v4033_v54, %v821_v45  ;;  %v428_v38 = vld [vmem:[#allocation2 + $0x8c] sm:$0x1] }
  0xa4   : > { %v1403_v17 = vsel %vm3640_vm8, %v2931_v29, %v1402_v47  ;;  %371 = vst [vmem:[#allocation2 + $0x9c] sm:$0x1] %v370_v50  ;;  %v828_v62 = vrot.slane %v826_v63, 5  ;;  %v4074_v2 = vrot.slane %v2814_v49, 5  ;;  %v1475_v58 = vshrl.u32 %v2891_v39, 16 }
  0xa5   : > { %v2967_v12 = vcombine.high %v1338_v56, %v1403_v17  ;;  %v2966_v27 = vcombine.low %v1338_v56, %v1403_v17  ;;  %v1470_v1 = vshrl.u32 %v2885_v57, 16  ;;  %v1478_v5 = vshll.u32 %v2891_v39, 16 }
  0xa6   : > { %v829_v43 = vor.u32 %v828_v62, %v825_v46  ;;  %v4078_v7 = vcombine.high %v4074_v2, %v4074_v2  ;;  %v1477_v54 = vrot.slane %v1475_v58, 7  ;;  %v681_v13 = vrot.slane %v679_v51, 4  ;;  %v446_v62 = vld [vmem:[#allocation2 + $0x2c] sm:$0x1] }
  0xa7   : > { %2458 = vmatprep.mubr.bf16.mxu0 %v2967_v12  ;;  %v2937_v61 = vrot.slane %v1470_v1, 11  ;;  %v682_v8 = vshll.u32 %v2790_v42, 16  ;;  %v687_v9 = vshrl.u32 %v2791_v31, 16  ;;  %v690_v53 = vshll.u32 %v2791_v31, 16 }
  0xa8   : > { %2459 = vmatmul.mubr.bf16.gmra.mxu0 %v2966_v27  ;;  %v2902_v34 = vsel %vm2821_vm6, %v4035_v55, %v829_v43  ;;  %v1480_v0 = vor.u32 %v1478_v5, %v1477_v54  ;;  %v2798_v10 = vcombine.low %v3852_v3, %v427_v40  ;;  %v2799_v14 = vcombine.low %v3854_v4, %v428_v38  ;;  %v447_v5 = vld [vmem:[#allocation2 + $0x3c] sm:$0x1] }
  0xa9   : > { %v444_v11 = vld [vmem:[#allocation2 + $0x94] sm:$0x8]  ;;  %v1540_v20 = vshrl.u32 %v2902_v34, 16  ;;  %v1543_v21 = vshll.u32 %v2902_v34, 16  ;;  %v684_v22 = vrot.slane %v682_v8, 5  ;;  %v689_v23 = vrot.slane %v687_v9, 4 }
  0xaa   : > { %v2896_v52 = vcombine.low %v444_v11, %v829_v43  ;;  %v1481_v24 = vsel %vm3640_vm8, %v2937_v61, %v1480_v0  ;;  %v692_v25 = vrot.slane %v690_v53, 5  ;;  %v724_v59 = vrot.slane %v2798_v10, 5 }
  0xab   : > { %v453_v29 = vld [vmem:[#allocation2 + $0x9c] sm:$0x1]  ;;  %v1542_v30 = vrot.slane %v1540_v20, 7  ;;  %v685_v19 = vor.u32 %v684_v22, %v681_v13  ;;  %v725_v32 = vrot.slane %v2799_v14, 5  ;;  %v2812_v3 = vcombine.low %v3967_v6, %v450_v15 }
  0xac   : > { %v2815_v4 = vcombine.low %v4035_v55, %v453_v29  ;;  %v1535_v42 = vshrl.u32 %v2896_v52, 16  ;;  %v693_v31 = vor.u32 %v692_v25, %v689_v23  ;;  %v2813_v28 = vcombine.low %v3969_v60, %v451_v18 }
  0xad   : > { %v1545_v35 = vor.u32 %v1543_v21, %v1542_v30  ;;  %v2884_v45 = vcombine.low %v685_v19, %v724_v59  ;;  %v2889_v46 = vcombine.high %v685_v19, %v724_v59  ;;  %v858_v47 = vrot.slane %v2812_v3, 5 }
  0xae   : > { %v4089_v48 = vrot.slane %v2815_v4, 5  ;;  %v2942_v63 = vrot.slane %v1535_v42, 11  ;;  %v2895_v49 = vcombine.low %v693_v31, %v725_v32  ;;  %v2900_v51 = vcombine.high %v693_v31, %v725_v32 }
  0xaf   : > { %v1457_v56 = vshrl.u32 %v2884_v45, 16  ;;  %v1462_v50 = vshrl.u32 %v2889_v46, 16  ;;  %v1465_v57 = vshll.u32 %v2889_v46, 16  ;;  %v859_v39 = vrot.slane %v2813_v28, 5 }
  0xb0   : > { %v4093_v6 = vcombine.high %v4089_v48, %v4089_v48  ;;  %v1546_v60 = vsel %vm3640_vm8, %v2942_v63, %v1545_v35  ;;  %v1522_v55 = vshrl.u32 %v2895_v49, 16  ;;  %v1527_v17 = vshrl.u32 %v2900_v51, 16 }
  0xb1   : > { %v2978_v58 = vcombine.high %v1481_v24, %v1546_v60  ;;  %v2936_v12 = vrot.slane %v1457_v56, 11  ;;  %v1464_v27 = vrot.slane %v1462_v50, 7  ;;  %v1530_v1 = vshll.u32 %v2900_v51, 16 }
  0xb2   : > { %v2941_v40 = vrot.slane %v1522_v55, 11  ;;  %v1529_v38 = vrot.slane %v1527_v17, 7  ;;  %v2977_v43 = vcombine.low %v1481_v24, %v1546_v60  ;;  %v2864_v54 = vcombine.low %v858_v47, %v858_v47 }
  0xb3   : > { %2531 = vmatprep.mubr.bf16.mxu1 %v2978_v58  ;;  %v1467_v13 = vor.u32 %v1465_v57, %v1464_v27  ;;  %v2870_v61 = vcombine.high %v858_v47, %v858_v47  ;;  %v2875_v8 = vcombine.low %v859_v39, %v859_v39  ;;  %v2881_v9 = vcombine.high %v859_v39, %v859_v39 }
  0xb4   : > { %v1532_v53 = vor.u32 %v1530_v1, %v1529_v38  ;;  %2532 = vmatmul.mubr.bf16.gmra.mxu1 %v2977_v43  ;;  %v1353_v34 = vshrl.u32 %v2864_v54, 16  ;;  %v2808_v0 = vcombine.low %v3873_v44, %v446_v62  ;;  %v2809_v10 = vcombine.low %v3884_v41, %v447_v5 }
  0xb5   : > { %v1468_v14 = vsel %vm3640_vm8, %v2936_v12, %v1467_v13  ;;  %v1358_v15 = vshrl.u32 %v2870_v61, 16  ;;  %v1361_v18 = vshll.u32 %v2870_v61, 16  ;;  %v1418_v11 = vshrl.u32 %v2875_v8, 16 }
  0xb6   : > { %v1533_v20 = vsel %vm3640_vm8, %v2941_v40, %v1532_v53  ;;  %v2928_v21 = vrot.slane %v1353_v34, 11  ;;  %v1423_v22 = vshrl.u32 %v2881_v9, 16  ;;  %v1426_v23 = vshll.u32 %v2881_v9, 16 }
  0xb7   : > { %v2976_v52 = vcombine.high %v1468_v14, %v1533_v20  ;;  %v2975_v24 = vcombine.low %v1468_v14, %v1533_v20  ;;  %v1360_v25 = vrot.slane %v1358_v15, 7  ;;  %v2933_v59 = vrot.slane %v1418_v11, 11 }
  0xb8   : > { %v1425_v29 = vrot.slane %v1423_v22, 7  ;;  %v854_v44 = vrot.slane %v2808_v0, 5  ;;  %v855_v30 = vrot.slane %v2809_v10, 5  ;;  %v2886_v41 = vcombine.low %v4074_v2, %v4074_v2 }
  0xb9   : > { %2466 = vmatprep.mubr.bf16.mxu0 %v2976_v52  ;;  %v1363_v19 = vor.u32 %v1361_v18, %v1360_v25  ;;  %v2897_v32 = vcombine.low %v4089_v48, %v4089_v48  ;;  %v1488_v3 = vshrl.u32 %v4078_v7, 16  ;;  %v1491_v4 = vshll.u32 %v4078_v7, 16 }
  0xba   : > { %2467 = vmatmul.mubr.bf16.gmra.mxu0 %v2975_v24  ;;  %v1428_v42 = vor.u32 %v1426_v23, %v1425_v29  ;;  %v2820_v31 = vcombine.low %v854_v44, %v854_v44  ;;  %v2826_v28 = vcombine.high %v854_v44, %v854_v44  ;;  %v2831_v35 = vcombine.low %v855_v30, %v855_v30 }
  0xbb   : > { %v1364_v45 = vsel %vm3640_vm8, %v2928_v21, %v1363_v19  ;;  %v2837_v46 = vcombine.high %v855_v30, %v855_v30  ;;  %v1483_v47 = vshrl.u32 %v2886_v41, 16  ;;  %v1490_v2 = vrot.slane %v1488_v3, 7 }
  0xbc   : > { %v1429_v63 = vsel %vm3640_vm8, %v2933_v59, %v1428_v42  ;;  %v1093_v49 = vshrl.u32 %v2820_v31, 16  ;;  %v1098_v48 = vshrl.u32 %v2826_v28, 16  ;;  %v1101_v51 = vshll.u32 %v2826_v28, 16 }
  0xbd   : > { %v2970_v56 = vcombine.low %v1364_v45, %v1429_v63  ;;  %v1158_v50 = vshrl.u32 %v2831_v35, 16  ;;  %v1163_v7 = vshrl.u32 %v2837_v46, 16  ;;  %v1166_v57 = vshll.u32 %v2837_v46, 16 }
  0xbe   : > { %v2908_v39 = vrot.slane %v1093_v49, 11  ;;  %v1100_v60 = vrot.slane %v1098_v48, 7  ;;  %v2938_v55 = vrot.slane %v1483_v47, 11  ;;  %v1493_v17 = vor.u32 %v1491_v4, %v1490_v2 }
  0xbf   : > { %3248 = vmatprep.mubr.bf16.mxu1 %v2970_v56  ;;  %v2913_v62 = vrot.slane %v1158_v50, 11  ;;  %v1165_v58 = vrot.slane %v1163_v7, 7  ;;  %v1548_v12 = vshrl.u32 %v2897_v32, 16  ;;  %v1553_v27 = vshrl.u32 %v4093_v6, 16 }
  0xc0   : > { %v1103_v1 = vor.u32 %v1101_v51, %v1100_v60  ;;  %v1494_v5 = vsel %vm3640_vm8, %v2938_v55, %v1493_v17  ;;  %v1556_v40 = vshll.u32 %v4093_v6, 16  ;;  %v2842_v38 = vcombine.low %v3931_v26, %v3931_v26 }
  0xc1   : > { %v1168_v43 = vor.u32 %v1166_v57, %v1165_v58  ;;  %v2943_v54 = vrot.slane %v1548_v12, 11  ;;  %v1555_v13 = vrot.slane %v1553_v27, 7  ;;  %v2853_v61 = vcombine.low %v3933_v37, %v3933_v37 }
  0xc2   : > { %v1104_v8 = vsel %vm3640_vm8, %v2908_v39, %v1103_v1  ;;  %v1223_v9 = vshrl.u32 %v2842_v38, 16  ;;  %v1228_v53 = vshrl.u32 %v3946_v33, 16  ;;  %v1231_v34 = vshll.u32 %v3946_v33, 16 }
  0xc3   : > { %v1169_v6 = vsel %vm3640_vm8, %v2913_v62, %v1168_v43  ;;  %v1558_v0 = vor.u32 %v1556_v40, %v1555_v13  ;;  %v1288_v10 = vshrl.u32 %v2853_v61, 16  ;;  %v1293_v26 = vshrl.u32 %v3950_v36, 16 }
  0xc4   : > { %v2952_v14 = vcombine.low %v1104_v8, %v1169_v6  ;;  %v2918_v15 = vrot.slane %v1223_v9, 11  ;;  %v1230_v18 = vrot.slane %v1228_v53, 7  ;;  %v1296_v37 = vshll.u32 %v3950_v36, 16 }
  0xc5   : > { %v1559_v11 = vsel %vm3640_vm8, %v2943_v54, %v1558_v0  ;;  %v2923_v20 = vrot.slane %v1288_v10, 11  ;;  %v1295_v21 = vrot.slane %v1293_v26, 7 }
  0xc6   : > { %3244 = vmatprep.mubr.bf16.mxu0 %v2952_v14  ;;  %v2979_v22 = vcombine.low %v1494_v5, %v1559_v11  ;;  %v1233_v33 = vor.u32 %v1231_v34, %v1230_v18 }
  0xc7   : > { %v1298_v23 = vor.u32 %v1296_v37, %v1295_v21 }
  0xc8   : > { %3249 = vmatmul.mubr.bf16.vlgmr.msra.gmra.mxu1 %v2979_v22  ;;  %v1234_v52 = vsel %vm3640_vm8, %v2918_v15, %v1233_v33 }
  0xc9   : > { %v1299_v24 = vsel %vm3640_vm8, %v2923_v20, %v1298_v23 }
  0xca   : > { %v2961_v25 = vcombine.low %v1234_v52, %v1299_v24 }
  0xcc   : > { %3245 = vmatmul.mubr.bf16.vlgmr.msra.gmra.mxu0 %v2961_v25 }
  0xfc   : > { %v4137_v36 = vpop.f32.mrf.mxu0 }
  0xfe   : > { %v4135_v59 = vpop.f32.mrf.mxu1  ;;  %v4141_v44 = vpop.f32.mrf.mxu0 }
 0x100   : > { %v4139_v29 = vpop.f32.mrf.mxu1  ;;  %v4145_v41 = vpop.f32.mrf.mxu0 }
 0x101   : > { %4230 = vst [vmem:[#allocation4_spill] sm:$0xff] %v4145_v41 }
 0x102   : > { %v4143_v30 = vpop.f32.mrf.mxu1  ;;  %v4149_v32 = vpop.f32.mrf.mxu0 }
 0x103   : > { %4229 = vst [vmem:[#allocation3_spill] sm:$0xff] %v4143_v30  ;;  %4232 = vst [vmem:[#allocation6_spill] sm:$0xff] %v4149_v32 }
 0x104   : > { %v4147_v19 = vpop.f32.mrf.mxu1 }
 0x105   : > { %4231 = vst [vmem:[#allocation5_spill] sm:$0xff] %v4147_v19  ;;  %v3074_v19 = vadd.f32 %v4141_v44, %v4137_v36 }
 0x109   : > { %v3118_v16 = vpop.f32.mrf.mxu1 }
 0x10b   : > { %v3119_v4 = vpop.f32.mrf.mxu1 }
 0x10d   : > { %v4151_v31 = vpop.f32.mrf.mxu1 }
 0x10f   : > { %v3078_v3 = vpop.f32.mrf.mxu0  ;;  %v4155_v35 = vpop.f32.mrf.mxu1 }
 0x111   : > { %v3079_v42 = vpop.f32.mrf.mxu0 }
 0x113   : > { %v4153_v28 = vpop.f32.mrf.mxu0 }
 0x115   : > { %v4157_v45 = vpop.f32.mrf.mxu0 }
 0x124   : > { %v3124_v46 = vpop.f32.mrf.mxu1  ;;  %v3084_v47 = vpop.f32.mrf.mxu0 }
 0x126   : > { %v3125_v2 = vpop.f32.mrf.mxu1  ;;  %v3085_v63 = vpop.f32.mrf.mxu0 }
 0x127   : > { %v3126_v25 = vadd.f32 %v3125_v2, %v3124_v46  ;;  %v3123_v46 = vadd.f32 %v4155_v35, %v4151_v31  ;;  %v4241_v31 = vld [vmem:[#allocation3_spill] sm:$0xff]  ;;  %v4242_v35 = vld [vmem:[#allocation5_spill] sm:$0xff] }
 0x128   : > { %v3127_v49 = vpop.f32.mrf.mxu1  ;;  %v3087_v48 = vpop.f32.mrf.mxu0 }
 0x12a   : > { %v3128_v51 = vpop.f32.mrf.mxu1  ;;  %v3088_v56 = vpop.f32.mrf.mxu0 }
 0x12e   : > { %v3130_v50 = vpop.f32.mrf.mxu1 }
 0x130   : > { %v3131_v57 = vpop.f32.mrf.mxu1 }
 0x131   : > { %v3132_v22 = vadd.f32 %v3131_v57, %v3130_v50  ;;  %v3114_v57 = vadd.f32 %v4139_v29, %v4135_v59 }
 0x132   : > { %v3133_v60 = vpop.f32.mrf.mxu1 }
 0x134   : > { %v3090_v7 = vpop.f32.mrf.mxu0  ;;  %v3134_v17 = vpop.f32.mrf.mxu1 }
 0x136   : > { %v3091_v39 = vpop.f32.mrf.mxu0 }
 0x137   : > { %v3092_v33 = vadd.f32 %v3091_v39, %v3090_v7 }
 0x138   : > { %v3093_v55 = vpop.f32.mrf.mxu0 }
 0x13a   : > { %v3094_v62 = vpop.f32.mrf.mxu0 }
 0x13d   : > { %v4159_v58 = vpop.f32.mrf.mxu1 }
 0x13e   : > { %4233 = vst [vmem:[#allocation7_spill] sm:$0xff] %v4159_v58 }
 0x13f   : > { %v4161_v27 = vpop.f32.mrf.mxu1 }
 0x140   : > { %4234 = vst [vmem:[#allocation8_spill] sm:$0xff] %v4161_v27  ;;  %v3080_v27 = vadd.f32 %v3079_v42, %v3078_v3  ;;  %v3129_v3 = vadd.f32 %v3128_v51, %v3127_v49 }
 0x141   : > { %v4163_v5 = vpop.f32.mrf.mxu1 }
 0x142   : > { %4235 = vst [vmem:[#allocation9_spill] sm:$0xff] %v4163_v5 }
 0x143   : > { %v4167_v38 = vpop.f32.mrf.mxu1 }
 0x144   : > { %4237 = vst [vmem:[#allocation11_spill] sm:$0xff] %v4167_v38  ;;  %v3086_v38 = vadd.f32 %v3085_v63, %v3084_v47  ;;  %v3083_v47 = vadd.f32 %v4157_v45, %v4153_v28  ;;  %v4243_v28 = vld [vmem:[#allocation4_spill] sm:$0xff]  ;;  %v4244_v45 = vld [vmem:[#allocation6_spill] sm:$0xff] }
 0x145   : > { %v3152_v12 = vpop.f32.mrf.mxu0  ;;  %v3077_v49 = vadd.f32 %v4244_v45, %v4243_v28 }
 0x147   : > { %v3153_v1 = vpop.f32.mrf.mxu0 }
 0x148   : > { %v3154_v39 = vadd.f32 %v3153_v1, %v3152_v12  ;;  %v4245_v1 = vld [vmem:[#allocation7_spill] sm:$0xff] }
 0x149   : > { %v4165_v40 = vpop.f32.mrf.mxu0 }
 0x14a   : > { %4236 = vst [vmem:[#allocation10_spill] sm:$0xff] %v4165_v40  ;;  %v3120_v40 = vadd.f32 %v3119_v4, %v3118_v16  ;;  %v2396_v16 = vadd.f32 %v3126_v25, %v3086_v38  ;;  %v3089_v4 = vadd.f32 %v3088_v56, %v3087_v48  ;;  %v2391_v48 = vadd.f32 %v3123_v46, %v3083_v47 }
 0x14b   : > { %v4169_v43 = vpop.f32.mrf.mxu0 }
 0x14c   : > { %4238 = vst [vmem:[#allocation12_spill] sm:$0xff] %v4169_v43  ;;  %v3095_v43 = vadd.f32 %v3094_v62, %v3093_v55  ;;  %v2388_v63 = vadd.f32 %v3120_v40, %v3080_v27  ;;  %v3117_v62 = vadd.f32 %v4242_v35, %v4241_v31  ;;  %v2399_v51 = vadd.f32 %v3129_v3, %v3089_v4 }
 0x14d   : > { %v3198_v54 = vpop.f32.mrf.mxu1 }
 0x14f   : > { %v3199_v61 = vpop.f32.mrf.mxu1 }
 0x150   : > { %v3200_v56 = vadd.f32 %v3199_v61, %v3198_v54 }
 0x151   : > { %v4171_v9 = vpop.f32.mrf.mxu1  ;;  %v4247_v38 = vld [vmem:[#allocation10_spill] sm:$0xff] }
 0x152   : > { %4239 = vst [vmem:[#allocation13_spill] sm:$0xff] %v4171_v9  ;;  %v3135_v9 = vadd.f32 %v3134_v17, %v3133_v60  ;;  %v2380_v17 = vadd.f32 %v3114_v57, %v3074_v19 }
 0x153   : > { %v4173_v34 = vpop.f32.mrf.mxu1 }
 0x154   : > { %4240 = vst [vmem:[#allocation14_spill] sm:$0xff] %v4173_v34  ;;  %v2404_v34 = vadd.f32 %v3132_v22, %v3092_v33  ;;  %v2407_v42 = vadd.f32 %v3135_v9, %v3095_v43  ;;  %v2445_v40 = vadd.f32 %v3154_v39, %v2380_v17  ;;  %v2383_v9 = vadd.f32 %v3117_v62, %v3077_v49 }
 0x157   : > { %v3158_v13 = vpop.f32.mrf.mxu0 }
 0x159   : > { %v3159_v8 = vpop.f32.mrf.mxu0 }
 0x15a   : > { %v3160_v2 = vadd.f32 %v3159_v8, %v3158_v13 }
 0x15b   : > { %v3161_v53 = vpop.f32.mrf.mxu0 }
 0x15c   : > { %v2453_v27 = vadd.f32 %v3160_v2, %v2388_v63 }
 0x15d   : > { %v3162_v6 = vpop.f32.mrf.mxu0 }
 0x15e   : > { %v3163_v12 = vadd.f32 %v3162_v6, %v3161_v53  ;;  %v4250_v6 = vld [vmem:[#allocation14_spill] sm:$0xff] }
 0x160   : > { %v3204_v0 = vpop.f32.mrf.mxu1 }
 0x162   : > { %v3205_v26 = vpop.f32.mrf.mxu1 }
 0x163   : > { %v3206_v36 = vadd.f32 %v3205_v26, %v3204_v0  ;;  %v2518_v26 = vadd.f32 %v3200_v56, %v2453_v27 }
 0x164   : > { %v3207_v15 = vpop.f32.mrf.mxu1 }
 0x166   : > { %v3208_v37 = vpop.f32.mrf.mxu1 }
 0x168   : > { %v3164_v10 = vpop.f32.mrf.mxu0 }
 0x16a   : > { %v3165_v14 = vpop.f32.mrf.mxu0 }
 0x16b   : > { %v3166_v58 = vadd.f32 %v3165_v14, %v3164_v10  ;;  %v2456_v10 = vadd.f32 %v3163_v12, %v2391_v48 }
 0x16c   : > { %v3167_v18 = vpop.f32.mrf.mxu0 }
 0x16d   : > { %v2461_v44 = vadd.f32 %v3166_v58, %v2396_v16  ;;  %v4246_v58 = vld [vmem:[#allocation8_spill] sm:$0xff] }
 0x16e   : > { %v3168_v11 = vpop.f32.mrf.mxu0 }
 0x16f   : > { %v2526_v61 = vadd.f32 %v3206_v36, %v2461_v44 }
 0x174   : > { %v3210_v20 = vpop.f32.mrf.mxu1 }
 0x176   : > { %v3211_v23 = vpop.f32.mrf.mxu1 }
 0x177   : > { %v3212_v30 = vadd.f32 %v3211_v23, %v3210_v20 }
 0x178   : > { %v3213_v32 = vpop.f32.mrf.mxu1 }
 0x17a   : > { %v3170_v21 = vpop.f32.mrf.mxu0  ;;  %v3214_v60 = vpop.f32.mrf.mxu1 }
 0x17b   : > { %v3215_v55 = vadd.f32 %v3214_v60, %v3213_v32  ;;  %v4248_v32 = vld [vmem:[#allocation12_spill] sm:$0xff] }
 0x17c   : > { %v3171_v52 = vpop.f32.mrf.mxu0  ;;  %v3157_v43 = vadd.f32 %v4248_v32, %v4247_v38  ;;  %v3404_v38 = vmov 1966171168  }
 0x17d   : > { %v3172_v24 = vadd.f32 %v3171_v52, %v3170_v21  ;;  %v2651_v32 = vunpack.c.l.s4 %v3404_v38 }
 0x17e   : > { %v3173_v5 = vpop.f32.mrf.mxu0  ;;  %v2448_v22 = vadd.f32 %v3157_v43, %v2383_v9  ;;  %v2653_v43 = vlaneseq }
 0x17f   : > { %v2469_v50 = vadd.f32 %v3172_v24, %v2404_v34  ;;  %v4249_v34 = vld [vmem:[#allocation13_spill] sm:$0xff] }
 0x180   : > { %v3174_v41 = vpop.f32.mrf.mxu0  ;;  %v3203_v0 = vadd.f32 %v4250_v6, %v4249_v34  ;;  %vm2667_vm9 = vcmp.lt.s32.totalorder %v2653_v43, 256 }
 0x181   : > { %v3175_v7 = vadd.f32 %v3174_v41, %v3173_v5  ;;  %v3169_v41 = vadd.f32 %v3168_v11, %v3167_v18  ;;  %v2534_v29 = vadd.f32 %v3212_v30, %v2469_v50  ;;  %v3194_v5 = vadd.f32 %v4246_v58, %v4245_v1  ;;  %v4252_v18 = vld [vmem:[#allocation11_spill] sm:$0xff] }
 0x182   : > { %v3209_v30 = vadd.f32 %v3208_v37, %v3207_v15  ;;  %v4251_v15 = vld [vmem:[#allocation9_spill] sm:$0xff] }
 0x183   : > { %v2472_v59 = vadd.f32 %v3175_v7, %v2407_v42  ;;  %v2464_v13 = vadd.f32 %v3169_v41, %v2399_v51  ;;  %v3197_v37 = vadd.f32 %v4252_v18, %v4251_v15  ;;  %v2510_v20 = vadd.f32 %v3194_v5, %v2445_v40 }
 0x184   : > { %v2521_v7 = vadd.f32 %v3203_v0, %v2456_v10 }
 0x185   : > { %v2537_v8 = vadd.f32 %v3215_v55, %v2472_v59  ;;  %v2529_v52 = vadd.f32 %v3209_v30, %v2464_v13  ;;  %v2513_v16 = vadd.f32 %v3197_v37, %v2448_v22 }
 0x188   : > { %v3250_v19 = vpop.f32.mrf.mxu1 }
 0x189   : > { %v2599_v54 = vadd.f32 %v3250_v19, %v2534_v29 }
 0x18a   : > { %v2590_v53 = vpop.f32.mrf.mxu1 }
 0x18b   : > { %2611 = vst [vmem:[%s4196_s16 + $0x30] sm:$0xff] %v2599_v54  ;;  %v2591_v14 = vadd.f32 %v2590_v53, %v2526_v61  ;;  %v2632_v28 = vmul.f32 %v2599_v54, %v2599_v54 }
 0x18c   : > { %v3246_v11 = vpop.f32.mrf.mxu0  ;;  %v3251_v21 = vpop.f32.mrf.mxu1 }
 0x18d   : > { %v2583_v33 = vadd.f32 %v3246_v11, %v2518_v26  ;;  %2609 = vst [vmem:[%s4196_s16 + $0x20] sm:$0xff] %v2591_v14  ;;  %v2602_v23 = vadd.f32 %v3251_v21, %v2537_v8  ;;  %v2630_v59 = vmul.f32 %v2591_v14, %v2591_v14  ;;  %v2652_v8 = vunpack.c.0.s8 %v2651_v32 }
 0x18e   : > { %v2574_v24 = vpop.f32.mrf.mxu0  ;;  %v2593_v25 = vpop.f32.mrf.mxu1 }
 0x18f   : > { %2607 = vst [vmem:[%s4196_s16 + $0x10] sm:$0xff] %v2583_v33  ;;  %v2575_v50 = vadd.f32 %v2574_v24, %v2510_v20  ;;  %2612 = vst [vmem:[%s4196_s16 + $0x38] sm:$0xff] %v2602_v23  ;;  %v2594_v57 = vadd.f32 %v2593_v25, %v2529_v52  ;;  %v2628_v39 = vmul.f32 %v2583_v33, %v2583_v33 }
 0x190   : > { %v3247_v46 = vpop.f32.mrf.mxu0  ;;  %v2633_v48 = vmul.f32 %v2602_v23, %v2602_v23 }
 0x191   : > { %2605 = vst [vmem:[%s4196_s16] sm:$0xff] %v2575_v50  ;;  %v2586_v47 = vadd.f32 %v3247_v46, %v2521_v7  ;;  %2610 = vst [vmem:[%s4196_s16 + $0x28] sm:$0xff] %v2594_v57  ;;  %v2626_v42 = vmul.f32 %v2575_v50, %v2575_v50  ;;  %v2631_v31 = vmul.f32 %v2594_v57, %v2594_v57 }
 0x192   : > { %v2577_v3 = vpop.f32.mrf.mxu0 }
 0x193   : > { %2608 = vst [vmem:[%s4196_s16 + $0x18] sm:$0xff] %v2586_v47  ;;  %v2578_v4 = vadd.f32 %v2577_v3, %v2513_v16  ;;  %v2629_v60 = vmul.f32 %v2586_v47, %v2586_v47 }
 0x195   : > { %2606 = vst [vmem:[%s4196_s16 + $0x8] sm:$0xff] %v2578_v4  ;;  %v2613_v2 = vadd.f32 %v2578_v4, %v2575_v50  ;;  %v2627_v63 = vmul.f32 %v2578_v4, %v2578_v4 }
 0x197   : > { %v2614_v36 = vadd.f32 %v2613_v2, %v2583_v33  ;;  %v2634_v44 = vadd.f32 %v2627_v63, %v2626_v42 }
 0x199   : > { %v2615_v41 = vadd.f32 %v2614_v36, %v2586_v47  ;;  %v2635_v55 = vadd.f32 %v2634_v44, %v2628_v39 }
 0x19b   : > { %v2616_v29 = vadd.f32 %v2615_v41, %v2591_v14  ;;  %v2636_v17 = vadd.f32 %v2635_v55, %v2629_v60 }
 0x19d   : > { %v2617_v35 = vadd.f32 %v2616_v29, %v2594_v57  ;;  %v2637_v62 = vadd.f32 %v2636_v17, %v2630_v59 }
 0x19f   : > { %v2618_v45 = vadd.f32 %v2617_v35, %v2599_v54  ;;  %v2638_v49 = vadd.f32 %v2637_v62, %v2631_v31  ;;  %v2654_v54 = vshrl.u32 %v2653_v43, 7 }
 0x1a1   : > { %v2619_v51 = vadd.f32 %v2618_v45, %v2602_v23  ;;  %v2639_v56 = vadd.f32 %v2638_v49, %v2632_v28  ;;  %v2655_v6 = vsub.s32 %v2652_v8, %v2654_v54 }
 0x1a3   : > { %v2620_v27 = vrot.slane %v2619_v51, 4  ;;  %v2640_v12 = vadd.f32 %v2639_v56, %v2633_v48 }
 0x1a5   : > { %v2621_v1 = vadd.f32 %v2620_v27, %v2619_v51  ;;  %v2641_v58 = vrot.slane %v2640_v12, 4 }
 0x1a7   : > { %v2622_v5 = vrot.slane %v2621_v1, 2  ;;  %v2642_v40 = vadd.f32 %v2641_v58, %v2640_v12 }
 0x1a9   : > { %v2623_v30 = vadd.f32 %v2622_v5, %v2621_v1  ;;  %v2643_v19 = vrot.slane %v2642_v40, 2 }
 0x1ab   : > { %v2624_v13 = vrot.slane %v2623_v30, 1  ;;  %v2644_v61 = vadd.f32 %v2643_v19, %v2642_v40 }
 0x1ad   : > { %v2645_v9 = vrot.slane %v2644_v61, 1  ;;  %v2625_v53 = vadd.f32 %v2624_v13, %v2623_v30 }
 0x1af   : > { %v2646_v34 = vadd.f32 %v2645_v9, %v2644_v61 }
 0x1b1   : > { %v2649_v0 = vcombine.low %v2625_v53, %v2646_v34 }
 0x1b3   : > { %v2656_v10 = vrot.slane %v2649_v0, %v2655_v6 }
 0x1b5   : > { %v2663_v26 = vrot.slane %v2656_v10, %v2655_v6 }
 0x1b7   : > { %2669 = vst.msk [vmem:[%s235_s21] sm:$0x3] %vm2667_vm9, %v2663_v26 }
 0x1b8 PF: > { %s16_s18 = sadd.s32 1, %s3401_s18  }
 0x1b9   : > { %p13_p4 = scmp.ge.s32.totalorder %s16_s18, 4  }
 0x1bb   :  { %15 = sbr.rel (!%p13_p4) target bundleno = 1 (0x1), region = 81 }

</bundles_post_ra>
